<compile_context>
chip_gen: v6e
topology: v6e:2x2x1
jax: 0.10.0
libtpu: 0.0.40
codegen_flags: <defaults>
</compile_context>

<pallas_src>
import functools

import jax
import jax.numpy as jnp
import numpy as np
from jax import lax
from jax.experimental import pallas as pl
from jax.experimental.pallas import tpu as pltpu


# ----------------------------------------------------------------------------
# Fused kernel: full MetaLearner.forward for one meta-batch, one episode per
# grid step.
# ----------------------------------------------------------------------------
def _maml_forward_kernel(
    # inputs
    ic1_ref, ic2_ref, sx_ref, qx_ref, w_ref, b_ref,
    mmw_ref, mvw_ref, mmb_ref, mvb_ref,
    # outputs
    accs_ref, nw_ref, nb_ref, nmmw_ref, nmvw_ref, nmmb_ref, nmvb_ref,
    # scratch
    tw_s, tb_s, imw, ivw, imb, ivb, sgw, sgb,
    *, num_updates, b1, b2, eps, mc1, mc2, inv_n, inv_seq):
  e = pl.program_id(0)
  last = pl.num_programs(0) - 1
  bf16 = jnp.bfloat16
  f32 = jnp.float32
  bsz = sx_ref.shape[1]          # support / query batch size (static)
  bsz_f = float(bsz)
  c_g = 2.0 * inv_n

  @pl.when(e == 0)
  def _init():
    # Inner (learner_net) Adam state and sum_grads_pi start at zero for this
    # forward call.
    # TODO(synk): the torch Learner's inner optimizer also persists across
    # forward() calls; here it is re-initialized at the start of each forward.
    imw[...] = jnp.zeros_like(imw)
    ivw[...] = jnp.zeros_like(ivw)
    imb[...] = jnp.zeros_like(imb)
    ivb[...] = jnp.zeros_like(ivb)
    sgw[...] = jnp.zeros_like(sgw)
    sgb[...] = jnp.zeros_like(sgb)

  # Learner.copy_theta(): learner_net <- meta_net (adapted params stay in VMEM
  # scratch, never round-tripping through HBM).
  tw_s[...] = w_ref[...]
  tb_s[...] = b_ref[...]

  # Per-episode Gram matrix + column sums of the support set: the inner-step
  # gradients are linear in (tW, tb) given these, so each inner step's dominant
  # MXU push is a full-depth (K=D) matmul.
  sx = sx_ref[0]                                               # [B, D] f32
  sx_b = sx.astype(bf16)
  gram = lax.dot_general(sx_b, sx_b, (((0,), (0,)), ((), ())),
                         preferred_element_type=f32)           # [D, D]
  gram_b = gram.astype(bf16)
  s_row = jnp.sum(sx, axis=0, keepdims=True)                   # [1, D] f32

  def adam_step(p, g, m_ref, v_ref, c1, c2):
    # torch.optim.Adam semantics: eps AFTER sqrt; exact division (no approx
    # reciprocal — optimizer error compounds across steps).
    m = b1 * m_ref[...] + (1.0 - b1) * g
    v = b2 * v_ref[...] + (1.0 - b2) * (g * g)
    m_ref[...] = m
    v_ref[...] = v
    return p - c1 * m / (jnp.sqrt(v) * c2 + eps)

  # Inner-loop Adam updates on the support set (unrolled; num_updates is small
  # and static, exactly like the reference python loop).
  for j in range(num_updates):
    t_idx = e * num_updates + j            # step counter shared across episodes
    c1 = ic1_ref[pl.ds(t_idx, 1), :]       # [1, H] : lr / (1 - b1**t)
    c2 = ic2_ref[pl.ds(t_idx, 1), :]       # [1, H] : 1 / sqrt(1 - b2**t)
    tw = tw_s[...]                         # [D, H]
    tb = tb_s[...]                         # [1, H]
    # gW = (2/n) * (G @ tW + s^T (x) tb); rank-1 term as sx^T @ (1_B (x) tb).
    tb_rows = jnp.broadcast_to(tb, (bsz, tb.shape[1])).astype(bf16)   # [B, H]
    gw = c_g * (jnp.dot(gram_b, tw.astype(bf16), preferred_element_type=f32)
                + lax.dot_general(sx_b, tb_rows, (((0,), (0,)), ((), ())),
                                  preferred_element_type=f32))        # [D, H]
    gb = c_g * (jnp.dot(s_row, tw, preferred_element_type=f32)
                + bsz_f * tb)                                         # [1, H]
    tw_s[...] = adam_step(tw, gw, imw, ivw, c1, c2)
    tb_s[...] = adam_step(tb, gb, imb, ivb, c1, c2)

  # Query loss + grads_pi w.r.t. the adapted params (loss needed here, so use
  # the direct forward/backward form).
  qx = qx_ref[0]                                               # [B, D]
  tw = tw_s[...]
  tb = tb_s[...]
  y = jnp.dot(qx.astype(bf16), tw.astype(bf16),
              preferred_element_type=f32) + tb                 # [B, H]
  loss_cols = jnp.sum(y * y, axis=0, keepdims=True)            # [1, H]
  q_loss = jnp.sum(loss_cols, axis=1, keepdims=True) * inv_n   # [1, 1]
  # loss.data[0] / seq_len, stored lane-dense (one (1,128) row per episode).
  accs_ref[pl.ds(e, 1), :] = jnp.broadcast_to(
      q_loss * inv_seq, (1, accs_ref.shape[1]))

  gy = c_g * y                                                 # dL/dy
  gw_q = lax.dot_general(qx.astype(bf16), gy.astype(bf16),
                         (((0,), (0,)), ((), ())),
                         preferred_element_type=f32)           # [D, H]
  gb_q = jnp.sum(gy, axis=0, keepdims=True)                    # [1, H]
  sgw[...] += gw_q
  sgb[...] += gb_q

  # write_grads(): the torch backward hooks replace the meta grads with
  # sum_grads_pi, so the meta Adam step consumes sum_grads_pi directly.
  # TODO(synk): the dummy_loss backward / register_hook mechanism has no Pallas
  # equivalent and is pure dead work here, so it is elided.
  @pl.when(e == last)
  def _meta_step():
    gw_sum = sgw[...]
    gb_sum = sgb[...]
    mw = b1 * mmw_ref[...] + (1.0 - b1) * gw_sum
    vw = b2 * mvw_ref[...] + (1.0 - b2) * (gw_sum * gw_sum)
    nw_ref[...] = w_ref[...] - mc1 * mw / (jnp.sqrt(vw) * mc2 + eps)
    nmmw_ref[...] = mw
    nmvw_ref[...] = vw
    mb = b1 * mmb_ref[...] + (1.0 - b1) * gb_sum
    vb = b2 * mvb_ref[...] + (1.0 - b2) * (gb_sum * gb_sum)
    nb_ref[...] = b_ref[...] - mc1 * mb / (jnp.sqrt(vb) * mc2 + eps)
    nmmb_ref[...] = mb
    nmvb_ref[...] = vb


def _fused_maml_forward(support_x, query_x, w, b, mw, vw, mb, vb, *,
                        num_updates, beta, meta_step):
  E, B, D = support_x.shape
  H = w.shape[1]
  f32 = jnp.float32
  b1, b2, eps = 0.9, 0.999, 1e-8

  # Host-side (trace-time) Adam bias-correction constants.
  # Inner optimizer: one shared Adam whose step counter runs across episodes
  # within this forward (episode 1 continues at t = num_updates+1, ...),
  # matching the torch Learner whose optimizer is shared across episodes.
  T = E * num_updates
  t = np.arange(1, T + 1, dtype=np.float64)
  ic1_np = (beta / (1.0 - b1 ** t)).astype(np.float32)          # lr / bc1
  ic2_np = (1.0 / np.sqrt(1.0 - b2 ** t)).astype(np.float32)    # 1/sqrt(bc2)
  ic1 = jnp.asarray(np.broadcast_to(ic1_np[:, None], (T, H)).copy())
  ic2 = jnp.asarray(np.broadcast_to(ic2_np[:, None], (T, H)).copy())
  mc1 = float(beta / (1.0 - b1 ** meta_step))
  mc2 = float(1.0 / np.sqrt(1.0 - b2 ** meta_step))

  kern = functools.partial(
      _maml_forward_kernel,
      num_updates=int(num_updates), b1=b1, b2=b2, eps=eps,
      mc1=mc1, mc2=mc2, inv_n=1.0 / float(B * H), inv_seq=1.0 / 150.0)

  out_shape = (
      jax.ShapeDtypeStruct((E, 128), f32),  # accs (lane-dense, col 0 used)
      jax.ShapeDtypeStruct((D, H), f32),    # new meta W
      jax.ShapeDtypeStruct((1, H), f32),    # new meta b
      jax.ShapeDtypeStruct((D, H), f32),    # meta Adam m_W
      jax.ShapeDtypeStruct((D, H), f32),    # meta Adam v_W
      jax.ShapeDtypeStruct((1, H), f32),    # meta Adam m_b
      jax.ShapeDtypeStruct((1, H), f32),    # meta Adam v_b
  )

  resident_wh = pl.BlockSpec((D, H), lambda e: (0, 0))
  resident_1h = pl.BlockSpec((1, H), lambda e: (0, 0))
  per_episode = pl.BlockSpec((1, B, D), lambda e: (e, 0, 0))
  consts_spec = pl.BlockSpec((T, H), lambda e: (0, 0))

  grid_spec = pltpu.PrefetchScalarGridSpec(
      num_scalar_prefetch=0,
      grid=(E,),
      in_specs=[
          consts_spec, consts_spec,   # inner-Adam bias-correction tables
          per_episode, per_episode,   # support_x, query_x (pipelined per episode)
          resident_wh, resident_1h,   # meta W, b
          resident_wh, resident_wh,   # meta Adam m_W, v_W
          resident_1h, resident_1h,   # meta Adam m_b, v_b
      ],
      out_specs=[
          pl.BlockSpec((E, 128), lambda e: (0, 0)),  # accs (resident)
          resident_wh, resident_1h,
          resident_wh, resident_wh,
          resident_1h, resident_1h,
      ],
      scratch_shapes=[
          pltpu.VMEM((D, H), f32),  # adapted W (learner_net)
          pltpu.VMEM((1, H), f32),  # adapted b
          pltpu.VMEM((D, H), f32),  # inner Adam m_W
          pltpu.VMEM((D, H), f32),  # inner Adam v_W
          pltpu.VMEM((1, H), f32),  # inner Adam m_b
          pltpu.VMEM((1, H), f32),  # inner Adam v_b
          pltpu.VMEM((D, H), f32),  # sum_grads_pi (W)
          pltpu.VMEM((1, H), f32),  # sum_grads_pi (b)
      ],
  )

  return pl.pallas_call(
      kern,
      out_shape=out_shape,
      grid_spec=grid_spec,
      # P8: updated params / optimizer state overwrite their inputs in HBM.
      input_output_aliases={4: 1, 5: 2, 6: 3, 7: 4, 8: 5, 9: 6},
      compiler_params=pltpu.CompilerParams(
          # The episode axis must stay sequential: inner-Adam moments / step
          # counter and sum_grads_pi carry across episodes (shared torch
          # optimizer). TODO(synk): if the inner optimizer were reset per
          # episode, this axis could be "parallel" to use both v7x TensorCores.
          dimension_semantics=("arbitrary",)),
  )(ic1, ic2, support_x, query_x, w, b, mw, vw, mb, vb)


# ----------------------------------------------------------------------------
# Plain-JAX glue reproducing MetaLearner.forward / Learner.forward semantics.
# ----------------------------------------------------------------------------
def init_simple_net(key, in_dim, hidden):
  kw, _ = jax.random.split(key)
  w = 0.1 * jax.random.normal(kw, (in_dim, hidden), jnp.float32)
  b = jnp.zeros((1, hidden), jnp.float32)
  return [w, b]


def init_meta_opt_state(meta_params):
  w, b = meta_params
  return (jnp.zeros_like(w), jnp.zeros_like(w),
          jnp.zeros_like(b), jnp.zeros_like(b))


@functools.partial(jax.jit, static_argnames=("num_updates", "beta", "meta_step"))
def meta_learner_forward(meta_params, meta_opt_state, support_x, query_x, *,
                         num_updates, beta, meta_step=1):
  """support_x / query_x: [meta_batchsz, B, D].

  Returns (accs, new_meta_params, new_meta_opt_state).
  """
  w, b = meta_params
  mw, vw, mb, vb = meta_opt_state
  accs, nw, nb, nmw, nvw, nmb, nvb = _fused_maml_forward(
      support_x, query_x, w, b, mw, vw, mb, vb,
      num_updates=num_updates, beta=beta, meta_step=meta_step)
  return accs[:, 0], [nw, nb], (nmw, nvw, nmb, nvb)


if __name__ == "__main__":
  key = jax.random.PRNGKey(0)
  k_param, k_sup, k_qry = jax.random.split(key, 3)

  # Lane-dense demo shapes (last dim multiple of 128 keeps every store unmasked).
  meta_batchsz, batch, in_dim, hidden = 2, 8, 128, 128
  num_updates, beta = 2, 1e-3

  meta_params = init_simple_net(k_param, in_dim, hidden)
  meta_opt_state = init_meta_opt_state(meta_params)
  support_x = jax.random.normal(k_sup, (meta_batchsz, batch, in_dim), jnp.float32)
  query_x = jax.random.normal(k_qry, (meta_batchsz, batch, in_dim), jnp.float32)

  accs, new_meta_params, new_meta_opt_state = meta_learner_forward(
      meta_params, meta_opt_state, support_x, query_x,
      num_updates=num_updates, beta=beta, meta_step=1)

  jax.block_until_ready(accs)
  jax.block_until_ready(new_meta_params)
  jax.block_until_ready(new_meta_opt_state)
  print("KERNEL_OK")
</pallas_src>

<mosaic_0001>
module attributes {stable_mosaic.version = 11 : i64} {
  func.func @_maml_forward_kernel(%arg0: i32, %arg1: memref<4x128xf32, #tpu.memory_space<vmem>>, %arg2: memref<4x128xf32, #tpu.memory_space<vmem>>, %arg3: memref<1x8x128xf32, #tpu.memory_space<vmem>>, %arg4: memref<1x8x128xf32, #tpu.memory_space<vmem>>, %arg5: memref<128x128xf32, #tpu.memory_space<vmem>>, %arg6: memref<1x128xf32, #tpu.memory_space<vmem>>, %arg7: memref<128x128xf32, #tpu.memory_space<vmem>>, %arg8: memref<128x128xf32, #tpu.memory_space<vmem>>, %arg9: memref<1x128xf32, #tpu.memory_space<vmem>>, %arg10: memref<1x128xf32, #tpu.memory_space<vmem>>, %arg11: memref<2x128xf32, #tpu.memory_space<vmem>>, %arg12: memref<128x128xf32, #tpu.memory_space<vmem>>, %arg13: memref<1x128xf32, #tpu.memory_space<vmem>>, %arg14: memref<128x128xf32, #tpu.memory_space<vmem>>, %arg15: memref<128x128xf32, #tpu.memory_space<vmem>>, %arg16: memref<1x128xf32, #tpu.memory_space<vmem>>, %arg17: memref<1x128xf32, #tpu.memory_space<vmem>>, %arg18: memref<128x128xf32, #tpu.memory_space<vmem>>, %arg19: memref<1x128xf32, #tpu.memory_space<vmem>>, %arg20: memref<128x128xf32, #tpu.memory_space<vmem>>, %arg21: memref<128x128xf32, #tpu.memory_space<vmem>>, %arg22: memref<1x128xf32, #tpu.memory_space<vmem>>, %arg23: memref<1x128xf32, #tpu.memory_space<vmem>>, %arg24: memref<128x128xf32, #tpu.memory_space<vmem>>, %arg25: memref<1x128xf32, #tpu.memory_space<vmem>>) attributes {dimension_semantics = [#tpu.dimension_semantics<arbitrary>], iteration_bounds = array<i64: 2>, scalar_prefetch = 0 : i64, scratch_operands = 8 : i64, tpu.core_type = #tpu.core_type<tc>, window_params = [{pipeline_mode = #tpu.pipeline_mode<synchronous>, transform_indices = @transform_0, window_bounds = array<i64: 4, 128>}, {pipeline_mode = #tpu.pipeline_mode<synchronous>, transform_indices = @transform_1, window_bounds = array<i64: 4, 128>}, {transform_indices = @transform_2, window_bounds = array<i64: 1, 8, 128>}, {transform_indices = @transform_3, window_bounds = array<i64: 1, 8, 128>}, {pipeline_mode = #tpu.pipeline_mode<synchronous>, transform_indices = @transform_4, window_bounds = array<i64: 128, 128>}, {pipeline_mode = #tpu.pipeline_mode<synchronous>, transform_indices = @transform_5, window_bounds = array<i64: 1, 128>}, {pipeline_mode = #tpu.pipeline_mode<synchronous>, transform_indices = @transform_6, window_bounds = array<i64: 128, 128>}, {pipeline_mode = #tpu.pipeline_mode<synchronous>, transform_indices = @transform_7, window_bounds = array<i64: 128, 128>}, {pipeline_mode = #tpu.pipeline_mode<synchronous>, transform_indices = @transform_8, window_bounds = array<i64: 1, 128>}, {pipeline_mode = #tpu.pipeline_mode<synchronous>, transform_indices = @transform_9, window_bounds = array<i64: 1, 128>}, {pipeline_mode = #tpu.pipeline_mode<synchronous>, transform_indices = @transform_10, window_bounds = array<i64: 2, 128>}, {pipeline_mode = #tpu.pipeline_mode<synchronous>, transform_indices = @transform_11, window_bounds = array<i64: 128, 128>}, {pipeline_mode = #tpu.pipeline_mode<synchronous>, transform_indices = @transform_12, window_bounds = array<i64: 1, 128>}, {pipeline_mode = #tpu.pipeline_mode<synchronous>, transform_indices = @transform_13, window_bounds = array<i64: 128, 128>}, {pipeline_mode = #tpu.pipeline_mode<synchronous>, transform_indices = @transform_14, window_bounds = array<i64: 128, 128>}, {pipeline_mode = #tpu.pipeline_mode<synchronous>, transform_indices = @transform_15, window_bounds = array<i64: 1, 128>}, {pipeline_mode = #tpu.pipeline_mode<synchronous>, transform_indices = @transform_16, window_bounds = array<i64: 1, 128>}]} {
    %c0_i32 = arith.constant 0 : i32
    %0 = arith.cmpi eq, %arg0, %c0_i32 : i32
    %1 = arith.extui %0 : i1 to i32
    %c0_i32_0 = arith.constant 0 : i32
    %2 = arith.cmpi ne, %1, %c0_i32_0 : i32
    scf.if %2 {
      %cst_124 = arith.constant 0.000000e+00 : f32
      %194 = vector.broadcast %cst_124 : f32 to vector<128x128xf32>
      %c0_125 = arith.constant 0 : index
      %c0_126 = arith.constant 0 : index
      %195 = vector.load %arg20[%c0_125, %c0_126] : memref<128x128xf32, #tpu.memory_space<vmem>>, vector<128x128xf32>
      tpu.vector_store %arg20[%c0_125, %c0_126], %194 {strides = array<i32>} : memref<128x128xf32, #tpu.memory_space<vmem>>, vector<128x128xf32>,
      %cst_127 = arith.constant 0.000000e+00 : f32
      %196 = vector.broadcast %cst_127 : f32 to vector<128x128xf32>
      %c0_128 = arith.constant 0 : index
      %c0_129 = arith.constant 0 : index
      %197 = vector.load %arg21[%c0_128, %c0_129] : memref<128x128xf32, #tpu.memory_space<vmem>>, vector<128x128xf32>
      tpu.vector_store %arg21[%c0_128, %c0_129], %196 {strides = array<i32>} : memref<128x128xf32, #tpu.memory_space<vmem>>, vector<128x128xf32>,
      %cst_130 = arith.constant 0.000000e+00 : f32
      %198 = vector.broadcast %cst_130 : f32 to vector<1x128xf32>
      %c0_131 = arith.constant 0 : index
      %c0_132 = arith.constant 0 : index
      %199 = vector.load %arg22[%c0_131, %c0_132] : memref<1x128xf32, #tpu.memory_space<vmem>>, vector<1x128xf32>
      tpu.vector_store %arg22[%c0_131, %c0_132], %198 {strides = array<i32>} : memref<1x128xf32, #tpu.memory_space<vmem>>, vector<1x128xf32>,
      %cst_133 = arith.constant 0.000000e+00 : f32
      %200 = vector.broadcast %cst_133 : f32 to vector<1x128xf32>
      %c0_134 = arith.constant 0 : index
      %c0_135 = arith.constant 0 : index
      %201 = vector.load %arg23[%c0_134, %c0_135] : memref<1x128xf32, #tpu.memory_space<vmem>>, vector<1x128xf32>
      tpu.vector_store %arg23[%c0_134, %c0_135], %200 {strides = array<i32>} : memref<1x128xf32, #tpu.memory_space<vmem>>, vector<1x128xf32>,
      %cst_136 = arith.constant 0.000000e+00 : f32
      %202 = vector.broadcast %cst_136 : f32 to vector<128x128xf32>
      %c0_137 = arith.constant 0 : index
      %c0_138 = arith.constant 0 : index
      %203 = vector.load %arg24[%c0_137, %c0_138] : memref<128x128xf32, #tpu.memory_space<vmem>>, vector<128x128xf32>
      tpu.vector_store %arg24[%c0_137, %c0_138], %202 {strides = array<i32>} : memref<128x128xf32, #tpu.memory_space<vmem>>, vector<128x128xf32>,
      %cst_139 = arith.constant 0.000000e+00 : f32
      %204 = vector.broadcast %cst_139 : f32 to vector<1x128xf32>
      %c0_140 = arith.constant 0 : index
      %c0_141 = arith.constant 0 : index
      %205 = vector.load %arg25[%c0_140, %c0_141] : memref<1x128xf32, #tpu.memory_space<vmem>>, vector<1x128xf32>
      tpu.vector_store %arg25[%c0_140, %c0_141], %204 {strides = array<i32>} : memref<1x128xf32, #tpu.memory_space<vmem>>, vector<1x128xf32>,
    } else {
    }
    %c0 = arith.constant 0 : index
    %c0_1 = arith.constant 0 : index
    %3 = vector.load %arg5[%c0, %c0_1] : memref<128x128xf32, #tpu.memory_space<vmem>>, vector<128x128xf32>
    %c0_2 = arith.constant 0 : index
    %c0_3 = arith.constant 0 : index
    %4 = vector.load %arg18[%c0_2, %c0_3] : memref<128x128xf32, #tpu.memory_space<vmem>>, vector<128x128xf32>
    tpu.vector_store %arg18[%c0_2, %c0_3], %3 {strides = array<i32>} : memref<128x128xf32, #tpu.memory_space<vmem>>, vector<128x128xf32>,
    %c0_4 = arith.constant 0 : index
    %c0_5 = arith.constant 0 : index
    %5 = vector.load %arg6[%c0_4, %c0_5] : memref<1x128xf32, #tpu.memory_space<vmem>>, vector<1x128xf32>
    %c0_6 = arith.constant 0 : index
    %c0_7 = arith.constant 0 : index
    %6 = vector.load %arg19[%c0_6, %c0_7] : memref<1x128xf32, #tpu.memory_space<vmem>>, vector<1x128xf32>
    tpu.vector_store %arg19[%c0_6, %c0_7], %5 {strides = array<i32>} : memref<1x128xf32, #tpu.memory_space<vmem>>, vector<1x128xf32>,
    %c0_8 = arith.constant 0 : index
    %c0_9 = arith.constant 0 : index
    %c0_10 = arith.constant 0 : index
    %7 = vector.load %arg3[%c0_8, %c0_9, %c0_10] : memref<1x8x128xf32, #tpu.memory_space<vmem>>, vector<1x8x128xf32>
    %8 = vector.shape_cast %7 : vector<1x8x128xf32> to vector<8x128xf32>
    %9 = arith.truncf %8 : vector<8x128xf32> to vector<8x128xbf16>
    %cst = arith.constant dense<0.000000e+00> : vector<128x128xf32>
    %10 = tpu.matmul %9, %9, %cst {dimension_numbers = #tpu.dot_dimension_numbers<[0], [0], [1], [1], [0, 1, 1, 1], [], []>} : vector<8x128xbf16>, vector<8x128xbf16>, vector<128x128xf32> -> vector<128x128xf32>
    %11 = arith.truncf %10 : vector<128x128xf32> to vector<128x128xbf16>
    %cst_11 = arith.constant dense<0.000000e+00> : vector<128xf32>
    %12 = vector.multi_reduction <add>, %8, %cst_11 [0] : vector<8x128xf32> to vector<128xf32>
    %13 = vector.shape_cast %12 : vector<128xf32> to vector<1x128xf32>
    %c2_i32 = arith.constant 2 : i32
    %14 = arith.muli %arg0, %c2_i32 : i32
    %c0_i32_12 = arith.constant 0 : i32
    %15 = arith.addi %14, %c0_i32_12 : i32
    %16 = arith.index_cast %15 : i32 to index
    %c0_13 = arith.constant 0 : index
    %17 = vector.load %arg1[%16, %c0_13] : memref<4x128xf32, #tpu.memory_space<vmem>>, vector<1x128xf32>
    %18 = arith.index_cast %15 : i32 to index
    %c0_14 = arith.constant 0 : index
    %19 = vector.load %arg2[%18, %c0_14] : memref<4x128xf32, #tpu.memory_space<vmem>>, vector<1x128xf32>
    %c0_15 = arith.constant 0 : index
    %c0_16 = arith.constant 0 : index
    %20 = vector.load %arg18[%c0_15, %c0_16] : memref<128x128xf32, #tpu.memory_space<vmem>>, vector<128x128xf32>
    %c0_17 = arith.constant 0 : index
    %c0_18 = arith.constant 0 : index
    %21 = vector.load %arg19[%c0_17, %c0_18] : memref<1x128xf32, #tpu.memory_space<vmem>>, vector<1x128xf32>
    %22 = vector.shape_cast %21 : vector<1x128xf32> to vector<1x128xf32>
    %23 = vector.broadcast %22 : vector<1x128xf32> to vector<8x128xf32>
    %24 = arith.truncf %23 : vector<8x128xf32> to vector<8x128xbf16>
    %25 = arith.truncf %20 : vector<128x128xf32> to vector<128x128xbf16>
    %cst_19 = arith.constant dense<0.000000e+00> : vector<128x128xf32>
    %26 = tpu.matmul %11, %25, %cst_19 {dimension_numbers = #tpu.dot_dimension_numbers<[1], [0], [0], [1], [0, 0, 1, 1], [], []>} : vector<128x128xbf16>, vector<128x128xbf16>, vector<128x128xf32> -> vector<128x128xf32>
    %cst_20 = arith.constant dense<0.000000e+00> : vector<128x128xf32>
    %27 = tpu.matmul %9, %24, %cst_20 {dimension_numbers = #tpu.dot_dimension_numbers<[0], [0], [1], [1], [0, 1, 1, 1], [], []>} : vector<8x128xbf16>, vector<8x128xbf16>, vector<128x128xf32> -> vector<128x128xf32>
    %28 = arith.addf %26, %27 : vector<128x128xf32>
    %cst_21 = arith.constant 0.001953125 : f32
    %29 = vector.broadcast %cst_21 : f32 to vector<128x128xf32>
    %30 = arith.mulf %29, %28 : vector<128x128xf32>
    %cst_22 = arith.constant dense<0.000000e+00> : vector<1x128xf32>
    %31 = tpu.matmul %13, %20, %cst_22 {dimension_numbers = #tpu.dot_dimension_numbers<[1], [0], [0], [1], [0, 0, 1, 1], [], []>} : vector<1x128xf32>, vector<128x128xf32>, vector<1x128xf32> -> vector<1x128xf32>
    %cst_23 = arith.constant 8.000000e+00 : f32
    %32 = vector.broadcast %cst_23 : f32 to vector<1x128xf32>
    %33 = arith.mulf %32, %21 : vector<1x128xf32>
    %34 = arith.addf %31, %33 : vector<1x128xf32>
    %cst_24 = arith.constant 0.001953125 : f32
    %35 = vector.broadcast %cst_24 : f32 to vector<1x128xf32>
    %36 = arith.mulf %35, %34 : vector<1x128xf32>
    %c0_25 = arith.constant 0 : index
    %c0_26 = arith.constant 0 : index
    %37 = vector.load %arg20[%c0_25, %c0_26] : memref<128x128xf32, #tpu.memory_space<vmem>>, vector<128x128xf32>
    %cst_27 = arith.constant 0.899999976 : f32
    %38 = vector.broadcast %cst_27 : f32 to vector<128x128xf32>
    %39 = arith.mulf %38, %37 : vector<128x128xf32>
    %cst_28 = arith.constant 1.000000e-01 : f32
    %40 = vector.broadcast %cst_28 : f32 to vector<128x128xf32>
    %41 = arith.mulf %40, %30 : vector<128x128xf32>
    %42 = arith.addf %39, %41 : vector<128x128xf32>
    %c0_29 = arith.constant 0 : index
    %c0_30 = arith.constant 0 : index
    %43 = vector.load %arg21[%c0_29, %c0_30] : memref<128x128xf32, #tpu.memory_space<vmem>>, vector<128x128xf32>
    %cst_31 = arith.constant 9.990000e-01 : f32
    %44 = vector.broadcast %cst_31 : f32 to vector<128x128xf32>
    %45 = arith.mulf %44, %43 : vector<128x128xf32>
    %46 = arith.mulf %30, %30 : vector<128x128xf32>
    %cst_32 = arith.constant 1.000000e-03 : f32
    %47 = vector.broadcast %cst_32 : f32 to vector<128x128xf32>
    %48 = arith.mulf %47, %46 : vector<128x128xf32>
    %49 = arith.addf %45, %48 : vector<128x128xf32>
    %c0_33 = arith.constant 0 : index
    %c0_34 = arith.constant 0 : index
    %50 = vector.load %arg20[%c0_33, %c0_34] : memref<128x128xf32, #tpu.memory_space<vmem>>, vector<128x128xf32>
    tpu.vector_store %arg20[%c0_33, %c0_34], %42 {strides = array<i32>} : memref<128x128xf32, #tpu.memory_space<vmem>>, vector<128x128xf32>,
    %c0_35 = arith.constant 0 : index
    %c0_36 = arith.constant 0 : index
    %51 = vector.load %arg21[%c0_35, %c0_36] : memref<128x128xf32, #tpu.memory_space<vmem>>, vector<128x128xf32>
    tpu.vector_store %arg21[%c0_35, %c0_36], %49 {strides = array<i32>} : memref<128x128xf32, #tpu.memory_space<vmem>>, vector<128x128xf32>,
    %52 = vector.broadcast %17 : vector<1x128xf32> to vector<128x128xf32>
    %53 = arith.mulf %52, %42 : vector<128x128xf32>
    %54 = math.sqrt %49 : vector<128x128xf32>
    %55 = vector.broadcast %19 : vector<1x128xf32> to vector<128x128xf32>
    %56 = arith.mulf %54, %55 : vector<128x128xf32>
    %cst_37 = arith.constant 9.99999993E-9 : f32
    %57 = vector.broadcast %cst_37 : f32 to vector<128x128xf32>
    %58 = arith.addf %56, %57 : vector<128x128xf32>
    %59 = arith.divf %53, %58 : vector<128x128xf32>
    %60 = arith.subf %20, %59 : vector<128x128xf32>
    %c0_38 = arith.constant 0 : index
    %c0_39 = arith.constant 0 : index
    %61 = vector.load %arg18[%c0_38, %c0_39] : memref<128x128xf32, #tpu.memory_space<vmem>>, vector<128x128xf32>
    tpu.vector_store %arg18[%c0_38, %c0_39], %60 {strides = array<i32>} : memref<128x128xf32, #tpu.memory_space<vmem>>, vector<128x128xf32>,
    %c0_40 = arith.constant 0 : index
    %c0_41 = arith.constant 0 : index
    %62 = vector.load %arg22[%c0_40, %c0_41] : memref<1x128xf32, #tpu.memory_space<vmem>>, vector<1x128xf32>
    %cst_42 = arith.constant 0.899999976 : f32
    %63 = vector.broadcast %cst_42 : f32 to vector<1x128xf32>
    %64 = arith.mulf %63, %62 : vector<1x128xf32>
    %cst_43 = arith.constant 1.000000e-01 : f32
    %65 = vector.broadcast %cst_43 : f32 to vector<1x128xf32>
    %66 = arith.mulf %65, %36 : vector<1x128xf32>
    %67 = arith.addf %64, %66 : vector<1x128xf32>
    %c0_44 = arith.constant 0 : index
    %c0_45 = arith.constant 0 : index
    %68 = vector.load %arg23[%c0_44, %c0_45] : memref<1x128xf32, #tpu.memory_space<vmem>>, vector<1x128xf32>
    %cst_46 = arith.constant 9.990000e-01 : f32
    %69 = vector.broadcast %cst_46 : f32 to vector<1x128xf32>
    %70 = arith.mulf %69, %68 : vector<1x128xf32>
    %71 = arith.mulf %36, %36 : vector<1x128xf32>
    %cst_47 = arith.constant 1.000000e-03 : f32
    %72 = vector.broadcast %cst_47 : f32 to vector<1x128xf32>
    %73 = arith.mulf %72, %71 : vector<1x128xf32>
    %74 = arith.addf %70, %73 : vector<1x128xf32>
    %c0_48 = arith.constant 0 : index
    %c0_49 = arith.constant 0 : index
    %75 = vector.load %arg22[%c0_48, %c0_49] : memref<1x128xf32, #tpu.memory_space<vmem>>, vector<1x128xf32>
    tpu.vector_store %arg22[%c0_48, %c0_49], %67 {strides = array<i32>} : memref<1x128xf32, #tpu.memory_space<vmem>>, vector<1x128xf32>,
    %c0_50 = arith.constant 0 : index
    %c0_51 = arith.constant 0 : index
    %76 = vector.load %arg23[%c0_50, %c0_51] : memref<1x128xf32, #tpu.memory_space<vmem>>, vector<1x128xf32>
    tpu.vector_store %arg23[%c0_50, %c0_51], %74 {strides = array<i32>} : memref<1x128xf32, #tpu.memory_space<vmem>>, vector<1x128xf32>,
    %77 = arith.mulf %17, %67 : vector<1x128xf32>
    %78 = math.sqrt %74 : vector<1x128xf32>
    %79 = arith.mulf %78, %19 : vector<1x128xf32>
    %cst_52 = arith.constant 9.99999993E-9 : f32
    %80 = vector.broadcast %cst_52 : f32 to vector<1x128xf32>
    %81 = arith.addf %79, %80 : vector<1x128xf32>
    %82 = arith.divf %77, %81 : vector<1x128xf32>
    %83 = arith.subf %21, %82 : vector<1x128xf32>
    %c0_53 = arith.constant 0 : index
    %c0_54 = arith.constant 0 : index
    %84 = vector.load %arg19[%c0_53, %c0_54] : memref<1x128xf32, #tpu.memory_space<vmem>>, vector<1x128xf32>
    tpu.vector_store %arg19[%c0_53, %c0_54], %83 {strides = array<i32>} : memref<1x128xf32, #tpu.memory_space<vmem>>, vector<1x128xf32>,
    %c2_i32_55 = arith.constant 2 : i32
    %85 = arith.muli %arg0, %c2_i32_55 : i32
    %c1_i32 = arith.constant 1 : i32
    %86 = arith.addi %85, %c1_i32 : i32
    %87 = arith.index_cast %86 : i32 to index
    %c0_56 = arith.constant 0 : index
    %88 = vector.load %arg1[%87, %c0_56] : memref<4x128xf32, #tpu.memory_space<vmem>>, vector<1x128xf32>
    %89 = arith.index_cast %86 : i32 to index
    %c0_57 = arith.constant 0 : index
    %90 = vector.load %arg2[%89, %c0_57] : memref<4x128xf32, #tpu.memory_space<vmem>>, vector<1x128xf32>
    %c0_58 = arith.constant 0 : index
    %c0_59 = arith.constant 0 : index
    %91 = vector.load %arg18[%c0_58, %c0_59] : memref<128x128xf32, #tpu.memory_space<vmem>>, vector<128x128xf32>
    %c0_60 = arith.constant 0 : index
    %c0_61 = arith.constant 0 : index
    %92 = vector.load %arg19[%c0_60, %c0_61] : memref<1x128xf32, #tpu.memory_space<vmem>>, vector<1x128xf32>
    %93 = vector.shape_cast %92 : vector<1x128xf32> to vector<1x128xf32>
    %94 = vector.broadcast %93 : vector<1x128xf32> to vector<8x128xf32>
    %95 = arith.truncf %94 : vector<8x128xf32> to vector<8x128xbf16>
    %96 = arith.truncf %91 : vector<128x128xf32> to vector<128x128xbf16>
    %cst_62 = arith.constant dense<0.000000e+00> : vector<128x128xf32>
    %97 = tpu.matmul %11, %96, %cst_62 {dimension_numbers = #tpu.dot_dimension_numbers<[1], [0], [0], [1], [0, 0, 1, 1], [], []>} : vector<128x128xbf16>, vector<128x128xbf16>, vector<128x128xf32> -> vector<128x128xf32>
    %cst_63 = arith.constant dense<0.000000e+00> : vector<128x128xf32>
    %98 = tpu.matmul %9, %95, %cst_63 {dimension_numbers = #tpu.dot_dimension_numbers<[0], [0], [1], [1], [0, 1, 1, 1], [], []>} : vector<8x128xbf16>, vector<8x128xbf16>, vector<128x128xf32> -> vector<128x128xf32>
    %99 = arith.addf %97, %98 : vector<128x128xf32>
    %cst_64 = arith.constant 0.001953125 : f32
    %100 = vector.broadcast %cst_64 : f32 to vector<128x128xf32>
    %101 = arith.mulf %100, %99 : vector<128x128xf32>
    %cst_65 = arith.constant dense<0.000000e+00> : vector<1x128xf32>
    %102 = tpu.matmul %13, %91, %cst_65 {dimension_numbers = #tpu.dot_dimension_numbers<[1], [0], [0], [1], [0, 0, 1, 1], [], []>} : vector<1x128xf32>, vector<128x128xf32>, vector<1x128xf32> -> vector<1x128xf32>
    %cst_66 = arith.constant 8.000000e+00 : f32
    %103 = vector.broadcast %cst_66 : f32 to vector<1x128xf32>
    %104 = arith.mulf %103, %92 : vector<1x128xf32>
    %105 = arith.addf %102, %104 : vector<1x128xf32>
    %cst_67 = arith.constant 0.001953125 : f32
    %106 = vector.broadcast %cst_67 : f32 to vector<1x128xf32>
    %107 = arith.mulf %106, %105 : vector<1x128xf32>
    %c0_68 = arith.constant 0 : index
    %c0_69 = arith.constant 0 : index
    %108 = vector.load %arg20[%c0_68, %c0_69] : memref<128x128xf32, #tpu.memory_space<vmem>>, vector<128x128xf32>
    %cst_70 = arith.constant 0.899999976 : f32
    %109 = vector.broadcast %cst_70 : f32 to vector<128x128xf32>
    %110 = arith.mulf %109, %108 : vector<128x128xf32>
    %cst_71 = arith.constant 1.000000e-01 : f32
    %111 = vector.broadcast %cst_71 : f32 to vector<128x128xf32>
    %112 = arith.mulf %111, %101 : vector<128x128xf32>
    %113 = arith.addf %110, %112 : vector<128x128xf32>
    %c0_72 = arith.constant 0 : index
    %c0_73 = arith.constant 0 : index
    %114 = vector.load %arg21[%c0_72, %c0_73] : memref<128x128xf32, #tpu.memory_space<vmem>>, vector<128x128xf32>
    %cst_74 = arith.constant 9.990000e-01 : f32
    %115 = vector.broadcast %cst_74 : f32 to vector<128x128xf32>
    %116 = arith.mulf %115, %114 : vector<128x128xf32>
    %117 = arith.mulf %101, %101 : vector<128x128xf32>
    %cst_75 = arith.constant 1.000000e-03 : f32
    %118 = vector.broadcast %cst_75 : f32 to vector<128x128xf32>
    %119 = arith.mulf %118, %117 : vector<128x128xf32>
    %120 = arith.addf %116, %119 : vector<128x128xf32>
    %c0_76 = arith.constant 0 : index
    %c0_77 = arith.constant 0 : index
    %121 = vector.load %arg20[%c0_76, %c0_77] : memref<128x128xf32, #tpu.memory_space<vmem>>, vector<128x128xf32>
    tpu.vector_store %arg20[%c0_76, %c0_77], %113 {strides = array<i32>} : memref<128x128xf32, #tpu.memory_space<vmem>>, vector<128x128xf32>,
    %c0_78 = arith.constant 0 : index
    %c0_79 = arith.constant 0 : index
    %122 = vector.load %arg21[%c0_78, %c0_79] : memref<128x128xf32, #tpu.memory_space<vmem>>, vector<128x128xf32>
    tpu.vector_store %arg21[%c0_78, %c0_79], %120 {strides = array<i32>} : memref<128x128xf32, #tpu.memory_space<vmem>>, vector<128x128xf32>,
    %123 = vector.broadcast %88 : vector<1x128xf32> to vector<128x128xf32>
    %124 = arith.mulf %123, %113 : vector<128x128xf32>
    %125 = math.sqrt %120 : vector<128x128xf32>
    %126 = vector.broadcast %90 : vector<1x128xf32> to vector<128x128xf32>
    %127 = arith.mulf %125, %126 : vector<128x128xf32>
    %cst_80 = arith.constant 9.99999993E-9 : f32
    %128 = vector.broadcast %cst_80 : f32 to vector<128x128xf32>
    %129 = arith.addf %127, %128 : vector<128x128xf32>
    %130 = arith.divf %124, %129 : vector<128x128xf32>
    %131 = arith.subf %91, %130 : vector<128x128xf32>
    %c0_81 = arith.constant 0 : index
    %c0_82 = arith.constant 0 : index
    %132 = vector.load %arg18[%c0_81, %c0_82] : memref<128x128xf32, #tpu.memory_space<vmem>>, vector<128x128xf32>
    tpu.vector_store %arg18[%c0_81, %c0_82], %131 {strides = array<i32>} : memref<128x128xf32, #tpu.memory_space<vmem>>, vector<128x128xf32>,
    %c0_83 = arith.constant 0 : index
    %c0_84 = arith.constant 0 : index
    %133 = vector.load %arg22[%c0_83, %c0_84] : memref<1x128xf32, #tpu.memory_space<vmem>>, vector<1x128xf32>
    %cst_85 = arith.constant 0.899999976 : f32
    %134 = vector.broadcast %cst_85 : f32 to vector<1x128xf32>
    %135 = arith.mulf %134, %133 : vector<1x128xf32>
    %cst_86 = arith.constant 1.000000e-01 : f32
    %136 = vector.broadcast %cst_86 : f32 to vector<1x128xf32>
    %137 = arith.mulf %136, %107 : vector<1x128xf32>
    %138 = arith.addf %135, %137 : vector<1x128xf32>
    %c0_87 = arith.constant 0 : index
    %c0_88 = arith.constant 0 : index
    %139 = vector.load %arg23[%c0_87, %c0_88] : memref<1x128xf32, #tpu.memory_space<vmem>>, vector<1x128xf32>
    %cst_89 = arith.constant 9.990000e-01 : f32
    %140 = vector.broadcast %cst_89 : f32 to vector<1x128xf32>
    %141 = arith.mulf %140, %139 : vector<1x128xf32>
    %142 = arith.mulf %107, %107 : vector<1x128xf32>
    %cst_90 = arith.constant 1.000000e-03 : f32
    %143 = vector.broadcast %cst_90 : f32 to vector<1x128xf32>
    %144 = arith.mulf %143, %142 : vector<1x128xf32>
    %145 = arith.addf %141, %144 : vector<1x128xf32>
    %c0_91 = arith.constant 0 : index
    %c0_92 = arith.constant 0 : index
    %146 = vector.load %arg22[%c0_91, %c0_92] : memref<1x128xf32, #tpu.memory_space<vmem>>, vector<1x128xf32>
    tpu.vector_store %arg22[%c0_91, %c0_92], %138 {strides = array<i32>} : memref<1x128xf32, #tpu.memory_space<vmem>>, vector<1x128xf32>,
    %c0_93 = arith.constant 0 : index
    %c0_94 = arith.constant 0 : index
    %147 = vector.load %arg23[%c0_93, %c0_94] : memref<1x128xf32, #tpu.memory_space<vmem>>, vector<1x128xf32>
    tpu.vector_store %arg23[%c0_93, %c0_94], %145 {strides = array<i32>} : memref<1x128xf32, #tpu.memory_space<vmem>>, vector<1x128xf32>,
    %148 = arith.mulf %88, %138 : vector<1x128xf32>
    %149 = math.sqrt %145 : vector<1x128xf32>
    %150 = arith.mulf %149, %90 : vector<1x128xf32>
    %cst_95 = arith.constant 9.99999993E-9 : f32
    %151 = vector.broadcast %cst_95 : f32 to vector<1x128xf32>
    %152 = arith.addf %150, %151 : vector<1x128xf32>
    %153 = arith.divf %148, %152 : vector<1x128xf32>
    %154 = arith.subf %92, %153 : vector<1x128xf32>
    %c0_96 = arith.constant 0 : index
    %c0_97 = arith.constant 0 : index
    %155 = vector.load %arg19[%c0_96, %c0_97] : memref<1x128xf32, #tpu.memory_space<vmem>>, vector<1x128xf32>
    tpu.vector_store %arg19[%c0_96, %c0_97], %154 {strides = array<i32>} : memref<1x128xf32, #tpu.memory_space<vmem>>, vector<1x128xf32>,
    %c0_98 = arith.constant 0 : index
    %c0_99 = arith.constant 0 : index
    %c0_100 = arith.constant 0 : index
    %156 = vector.load %arg4[%c0_98, %c0_99, %c0_100] : memref<1x8x128xf32, #tpu.memory_space<vmem>>, vector<1x8x128xf32>
    %157 = vector.shape_cast %156 : vector<1x8x128xf32> to vector<8x128xf32>
    %c0_101 = arith.constant 0 : index
    %c0_102 = arith.constant 0 : index
    %158 = vector.load %arg18[%c0_101, %c0_102] : memref<128x128xf32, #tpu.memory_space<vmem>>, vector<128x128xf32>
    %c0_103 = arith.constant 0 : index
    %c0_104 = arith.constant 0 : index
    %159 = vector.load %arg19[%c0_103, %c0_104] : memref<1x128xf32, #tpu.memory_space<vmem>>, vector<1x128xf32>
    %160 = arith.truncf %157 : vector<8x128xf32> to vector<8x128xbf16>
    %161 = arith.truncf %158 : vector<128x128xf32> to vector<128x128xbf16>
    %cst_105 = arith.constant dense<0.000000e+00> : vector<8x128xf32>
    %162 = tpu.matmul %160, %161, %cst_105 {dimension_numbers = #tpu.dot_dimension_numbers<[1], [0], [0], [1], [0, 0, 1, 1], [], []>} : vector<8x128xbf16>, vector<128x128xbf16>, vector<8x128xf32> -> vector<8x128xf32>
    %163 = vector.broadcast %159 : vector<1x128xf32> to vector<8x128xf32>
    %164 = arith.addf %162, %163 : vector<8x128xf32>
    %165 = arith.mulf %164, %164 : vector<8x128xf32>
    %cst_106 = arith.constant dense<0.000000e+00> : vector<128xf32>
    %166 = vector.multi_reduction <add>, %165, %cst_106 [0] : vector<8x128xf32> to vector<128xf32>
    %167 = vector.shape_cast %166 : vector<128xf32> to vector<1x128xf32>
    %cst_107 = arith.constant dense<0.000000e+00> : vector<1xf32>
    %168 = vector.multi_reduction <add>, %167, %cst_107 [1] : vector<1x128xf32> to vector<1xf32>
    %169 = vector.shape_cast %168 : vector<1xf32> to vector<1x1xf32>
    %cst_108 = arith.constant 9.765625E-4 : f32
    %170 = vector.broadcast %cst_108 : f32 to vector<1x1xf32>
    %171 = arith.mulf %169, %170 : vector<1x1xf32>
    %cst_109 = arith.constant 0.00666666683 : f32
    %172 = vector.broadcast %cst_109 : f32 to vector<1x1xf32>
    %173 = arith.mulf %171, %172 : vector<1x1xf32>
    %174 = vector.shape_cast %173 : vector<1x1xf32> to vector<1x1xf32>
    %175 = vector.broadcast %174 : vector<1x1xf32> to vector<1x128xf32>
    %176 = arith.index_cast %arg0 : i32 to index
    %c0_110 = arith.constant 0 : index
    %177 = vector.load %arg11[%176, %c0_110] : memref<2x128xf32, #tpu.memory_space<vmem>>, vector<1x128xf32>
    tpu.vector_store %arg11[%176, %c0_110], %175 {strides = array<i32>} : memref<2x128xf32, #tpu.memory_space<vmem>>, vector<1x128xf32>,
    %cst_111 = arith.constant 0.001953125 : f32
    %178 = vector.broadcast %cst_111 : f32 to vector<8x128xf32>
    %179 = arith.mulf %178, %164 : vector<8x128xf32>
    %180 = arith.truncf %157 : vector<8x128xf32> to vector<8x128xbf16>
    %181 = arith.truncf %179 : vector<8x128xf32> to vector<8x128xbf16>
    %cst_112 = arith.constant dense<0.000000e+00> : vector<128x128xf32>
    %182 = tpu.matmul %180, %181, %cst_112 {dimension_numbers = #tpu.dot_dimension_numbers<[0], [0], [1], [1], [0, 1, 1, 1], [], []>} : vector<8x128xbf16>, vector<8x128xbf16>, vector<128x128xf32> -> vector<128x128xf32>
    %cst_113 = arith.constant dense<0.000000e+00> : vector<128xf32>
    %183 = vector.multi_reduction <add>, %179, %cst_113 [0] : vector<8x128xf32> to vector<128xf32>
    %184 = vector.shape_cast %183 : vector<128xf32> to vector<1x128xf32>
    %c0_114 = arith.constant 0 : index
    %c0_115 = arith.constant 0 : index
    %185 = vector.load %arg24[%c0_114, %c0_115] : memref<128x128xf32, #tpu.memory_space<vmem>>, vector<128x128xf32>
    %186 = arith.addf %185, %182 : vector<128x128xf32>
    %c0_116 = arith.constant 0 : index
    %c0_117 = arith.constant 0 : index
    %187 = vector.load %arg24[%c0_116, %c0_117] : memref<128x128xf32, #tpu.memory_space<vmem>>, vector<128x128xf32>
    tpu.vector_store %arg24[%c0_116, %c0_117], %186 {strides = array<i32>} : memref<128x128xf32, #tpu.memory_space<vmem>>, vector<128x128xf32>,
    %c0_118 = arith.constant 0 : index
    %c0_119 = arith.constant 0 : index
    %188 = vector.load %arg25[%c0_118, %c0_119] : memref<1x128xf32, #tpu.memory_space<vmem>>, vector<1x128xf32>
    %189 = arith.addf %188, %184 : vector<1x128xf32>
    %c0_120 = arith.constant 0 : index
    %c0_121 = arith.constant 0 : index
    %190 = vector.load %arg25[%c0_120, %c0_121] : memref<1x128xf32, #tpu.memory_space<vmem>>, vector<1x128xf32>
    tpu.vector_store %arg25[%c0_120, %c0_121], %189 {strides = array<i32>} : memref<1x128xf32, #tpu.memory_space<vmem>>, vector<1x128xf32>,
    %c1_i32_122 = arith.constant 1 : i32
    %191 = arith.cmpi eq, %arg0, %c1_i32_122 : i32
    %192 = arith.extui %191 : i1 to i32
    %c0_i32_123 = arith.constant 0 : i32
    %193 = arith.cmpi ne, %192, %c0_i32_123 : i32
    scf.if %193 {
      %c0_124 = arith.constant 0 : index
      %c0_125 = arith.constant 0 : index
      %194 = vector.load %arg24[%c0_124, %c0_125] : memref<128x128xf32, #tpu.memory_space<vmem>>, vector<128x128xf32>
      %c0_126 = arith.constant 0 : index
      %c0_127 = arith.constant 0 : index
      %195 = vector.load %arg25[%c0_126, %c0_127] : memref<1x128xf32, #tpu.memory_space<vmem>>, vector<1x128xf32>
      %c0_128 = arith.constant 0 : index
      %c0_129 = arith.constant 0 : index
      %196 = vector.load %arg7[%c0_128, %c0_129] : memref<128x128xf32, #tpu.memory_space<vmem>>, vector<128x128xf32>
      %cst_130 = arith.constant 0.899999976 : f32
      %197 = vector.broadcast %cst_130 : f32 to vector<128x128xf32>
      %198 = arith.mulf %197, %196 : vector<128x128xf32>
      %cst_131 = arith.constant 1.000000e-01 : f32
      %199 = vector.broadcast %cst_131 : f32 to vector<128x128xf32>
      %200 = arith.mulf %199, %194 : vector<128x128xf32>
      %201 = arith.addf %198, %200 : vector<128x128xf32>
      %c0_132 = arith.constant 0 : index
      %c0_133 = arith.constant 0 : index
      %202 = vector.load %arg8[%c0_132, %c0_133] : memref<128x128xf32, #tpu.memory_space<vmem>>, vector<128x128xf32>
      %cst_134 = arith.constant 9.990000e-01 : f32
      %203 = vector.broadcast %cst_134 : f32 to vector<128x128xf32>
      %204 = arith.mulf %203, %202 : vector<128x128xf32>
      %205 = arith.mulf %194, %194 : vector<128x128xf32>
      %cst_135 = arith.constant 1.000000e-03 : f32
      %206 = vector.broadcast %cst_135 : f32 to vector<128x128xf32>
      %207 = arith.mulf %206, %205 : vector<128x128xf32>
      %208 = arith.addf %204, %207 : vector<128x128xf32>
      %c0_136 = arith.constant 0 : index
      %c0_137 = arith.constant 0 : index
      %209 = vector.load %arg5[%c0_136, %c0_137] : memref<128x128xf32, #tpu.memory_space<vmem>>, vector<128x128xf32>
      %cst_138 = arith.constant 0.00999999977 : f32
      %210 = vector.broadcast %cst_138 : f32 to vector<128x128xf32>
      %211 = arith.mulf %210, %201 : vector<128x128xf32>
      %212 = math.sqrt %208 : vector<128x128xf32>
      %cst_139 = arith.constant 31.622776 : f32
      %213 = vector.broadcast %cst_139 : f32 to vector<128x128xf32>
      %214 = arith.mulf %212, %213 : vector<128x128xf32>
      %cst_140 = arith.constant 9.99999993E-9 : f32
      %215 = vector.broadcast %cst_140 : f32 to vector<128x128xf32>
      %216 = arith.addf %214, %215 : vector<128x128xf32>
      %217 = arith.divf %211, %216 : vector<128x128xf32>
      %218 = arith.subf %209, %217 : vector<128x128xf32>
      %c0_141 = arith.constant 0 : index
      %c0_142 = arith.constant 0 : index
      %219 = vector.load %arg12[%c0_141, %c0_142] : memref<128x128xf32, #tpu.memory_space<vmem>>, vector<128x128xf32>
      tpu.vector_store %arg12[%c0_141, %c0_142], %218 {strides = array<i32>} : memref<128x128xf32, #tpu.memory_space<vmem>>, vector<128x128xf32>,
      %c0_143 = arith.constant 0 : index
      %c0_144 = arith.constant 0 : index
      %220 = vector.load %arg14[%c0_143, %c0_144] : memref<128x128xf32, #tpu.memory_space<vmem>>, vector<128x128xf32>
      tpu.vector_store %arg14[%c0_143, %c0_144], %201 {strides = array<i32>} : memref<128x128xf32, #tpu.memory_space<vmem>>, vector<128x128xf32>,
      %c0_145 = arith.constant 0 : index
      %c0_146 = arith.constant 0 : index
      %221 = vector.load %arg15[%c0_145, %c0_146] : memref<128x128xf32, #tpu.memory_space<vmem>>, vector<128x128xf32>
      tpu.vector_store %arg15[%c0_145, %c0_146], %208 {strides = array<i32>} : memref<128x128xf32, #tpu.memory_space<vmem>>, vector<128x128xf32>,
      %c0_147 = arith.constant 0 : index
      %c0_148 = arith.constant 0 : index
      %222 = vector.load %arg9[%c0_147, %c0_148] : memref<1x128xf32, #tpu.memory_space<vmem>>, vector<1x128xf32>
      %cst_149 = arith.constant 0.899999976 : f32
      %223 = vector.broadcast %cst_149 : f32 to vector<1x128xf32>
      %224 = arith.mulf %223, %222 : vector<1x128xf32>
      %cst_150 = arith.constant 1.000000e-01 : f32
      %225 = vector.broadcast %cst_150 : f32 to vector<1x128xf32>
      %226 = arith.mulf %225, %195 : vector<1x128xf32>
      %227 = arith.addf %224, %226 : vector<1x128xf32>
      %c0_151 = arith.constant 0 : index
      %c0_152 = arith.constant 0 : index
      %228 = vector.load %arg10[%c0_151, %c0_152] : memref<1x128xf32, #tpu.memory_space<vmem>>, vector<1x128xf32>
      %cst_153 = arith.constant 9.990000e-01 : f32
      %229 = vector.broadcast %cst_153 : f32 to vector<1x128xf32>
      %230 = arith.mulf %229, %228 : vector<1x128xf32>
      %231 = arith.mulf %195, %195 : vector<1x128xf32>
      %cst_154 = arith.constant 1.000000e-03 : f32
      %232 = vector.broadcast %cst_154 : f32 to vector<1x128xf32>
      %233 = arith.mulf %232, %231 : vector<1x128xf32>
      %234 = arith.addf %230, %233 : vector<1x128xf32>
      %c0_155 = arith.constant 0 : index
      %c0_156 = arith.constant 0 : index
      %235 = vector.load %arg6[%c0_155, %c0_156] : memref<1x128xf32, #tpu.memory_space<vmem>>, vector<1x128xf32>
      %cst_157 = arith.constant 0.00999999977 : f32
      %236 = vector.broadcast %cst_157 : f32 to vector<1x128xf32>
      %237 = arith.mulf %236, %227 : vector<1x128xf32>
      %238 = math.sqrt %234 : vector<1x128xf32>
      %cst_158 = arith.constant 31.622776 : f32
      %239 = vector.broadcast %cst_158 : f32 to vector<1x128xf32>
      %240 = arith.mulf %238, %239 : vector<1x128xf32>
      %cst_159 = arith.constant 9.99999993E-9 : f32
      %241 = vector.broadcast %cst_159 : f32 to vector<1x128xf32>
      %242 = arith.addf %240, %241 : vector<1x128xf32>
      %243 = arith.divf %237, %242 : vector<1x128xf32>
      %244 = arith.subf %235, %243 : vector<1x128xf32>
      %c0_160 = arith.constant 0 : index
      %c0_161 = arith.constant 0 : index
      %245 = vector.load %arg13[%c0_160, %c0_161] : memref<1x128xf32, #tpu.memory_space<vmem>>, vector<1x128xf32>
      tpu.vector_store %arg13[%c0_160, %c0_161], %244 {strides = array<i32>} : memref<1x128xf32, #tpu.memory_space<vmem>>, vector<1x128xf32>,
      %c0_162 = arith.constant 0 : index
      %c0_163 = arith.constant 0 : index
      %246 = vector.load %arg16[%c0_162, %c0_163] : memref<1x128xf32, #tpu.memory_space<vmem>>, vector<1x128xf32>
      tpu.vector_store %arg16[%c0_162, %c0_163], %227 {strides = array<i32>} : memref<1x128xf32, #tpu.memory_space<vmem>>, vector<1x128xf32>,
      %c0_164 = arith.constant 0 : index
      %c0_165 = arith.constant 0 : index
      %247 = vector.load %arg17[%c0_164, %c0_165] : memref<1x128xf32, #tpu.memory_space<vmem>>, vector<1x128xf32>
      tpu.vector_store %arg17[%c0_164, %c0_165], %234 {strides = array<i32>} : memref<1x128xf32, #tpu.memory_space<vmem>>, vector<1x128xf32>,
    } else {
    }
    return
  }
  func.func @transform_0(%arg0: i32) -> (i32, i32) {
    %c0_i32 = arith.constant 0 : i32
    %c0_i32_0 = arith.constant 0 : i32
    %c0_i32_1 = arith.constant 0 : i32
    return %c0_i32, %c0_i32_0 : i32, i32
  }
  func.func @transform_1(%arg0: i32) -> (i32, i32) {
    %c0_i32 = arith.constant 0 : i32
    %c0_i32_0 = arith.constant 0 : i32
    %c0_i32_1 = arith.constant 0 : i32
    return %c0_i32, %c0_i32_0 : i32, i32
  }
  func.func @transform_2(%arg0: i32) -> (i32, i32, i32) {
    %c0_i32 = arith.constant 0 : i32
    %c0_i32_0 = arith.constant 0 : i32
    %c0_i32_1 = arith.constant 0 : i32
    return %arg0, %c0_i32, %c0_i32_0 : i32, i32, i32
  }
  func.func @transform_3(%arg0: i32) -> (i32, i32, i32) {
    %c0_i32 = arith.constant 0 : i32
    %c0_i32_0 = arith.constant 0 : i32
    %c0_i32_1 = arith.constant 0 : i32
    return %arg0, %c0_i32, %c0_i32_0 : i32, i32, i32
  }
  func.func @transform_4(%arg0: i32) -> (i32, i32) {
    %c0_i32 = arith.constant 0 : i32
    %c0_i32_0 = arith.constant 0 : i32
    %c0_i32_1 = arith.constant 0 : i32
    return %c0_i32, %c0_i32_0 : i32, i32
  }
  func.func @transform_5(%arg0: i32) -> (i32, i32) {
    %c0_i32 = arith.constant 0 : i32
    %c0_i32_0 = arith.constant 0 : i32
    %c0_i32_1 = arith.constant 0 : i32
    return %c0_i32, %c0_i32_0 : i32, i32
  }
  func.func @transform_6(%arg0: i32) -> (i32, i32) {
    %c0_i32 = arith.constant 0 : i32
    %c0_i32_0 = arith.constant 0 : i32
    %c0_i32_1 = arith.constant 0 : i32
    return %c0_i32, %c0_i32_0 : i32, i32
  }
  func.func @transform_7(%arg0: i32) -> (i32, i32) {
    %c0_i32 = arith.constant 0 : i32
    %c0_i32_0 = arith.constant 0 : i32
    %c0_i32_1 = arith.constant 0 : i32
    return %c0_i32, %c0_i32_0 : i32, i32
  }
  func.func @transform_8(%arg0: i32) -> (i32, i32) {
    %c0_i32 = arith.constant 0 : i32
    %c0_i32_0 = arith.constant 0 : i32
    %c0_i32_1 = arith.constant 0 : i32
    return %c0_i32, %c0_i32_0 : i32, i32
  }
  func.func @transform_9(%arg0: i32) -> (i32, i32) {
    %c0_i32 = arith.constant 0 : i32
    %c0_i32_0 = arith.constant 0 : i32
    %c0_i32_1 = arith.constant 0 : i32
    return %c0_i32, %c0_i32_0 : i32, i32
  }
  func.func @transform_10(%arg0: i32) -> (i32, i32) {
    %c0_i32 = arith.constant 0 : i32
    %c0_i32_0 = arith.constant 0 : i32
    %c0_i32_1 = arith.constant 0 : i32
    return %c0_i32, %c0_i32_0 : i32, i32
  }
  func.func @transform_11(%arg0: i32) -> (i32, i32) {
    %c0_i32 = arith.constant 0 : i32
    %c0_i32_0 = arith.constant 0 : i32
    %c0_i32_1 = arith.constant 0 : i32
    return %c0_i32, %c0_i32_0 : i32, i32
  }
  func.func @transform_12(%arg0: i32) -> (i32, i32) {
    %c0_i32 = arith.constant 0 : i32
    %c0_i32_0 = arith.constant 0 : i32
    %c0_i32_1 = arith.constant 0 : i32
    return %c0_i32, %c0_i32_0 : i32, i32
  }
  func.func @transform_13(%arg0: i32) -> (i32, i32) {
    %c0_i32 = arith.constant 0 : i32
    %c0_i32_0 = arith.constant 0 : i32
    %c0_i32_1 = arith.constant 0 : i32
    return %c0_i32, %c0_i32_0 : i32, i32
  }
  func.func @transform_14(%arg0: i32) -> (i32, i32) {
    %c0_i32 = arith.constant 0 : i32
    %c0_i32_0 = arith.constant 0 : i32
    %c0_i32_1 = arith.constant 0 : i32
    return %c0_i32, %c0_i32_0 : i32, i32
  }
  func.func @transform_15(%arg0: i32) -> (i32, i32) {
    %c0_i32 = arith.constant 0 : i32
    %c0_i32_0 = arith.constant 0 : i32
    %c0_i32_1 = arith.constant 0 : i32
    return %c0_i32, %c0_i32_0 : i32, i32
  }
  func.func @transform_16(%arg0: i32) -> (i32, i32) {
    %c0_i32 = arith.constant 0 : i32
    %c0_i32_0 = arith.constant 0 : i32
    %c0_i32_1 = arith.constant 0 : i32
    return %c0_i32, %c0_i32_0 : i32, i32
  }
}

</mosaic_0001>

<bundles_post_ra>
// kernel: meta_learner_forward.1
= control target key start
LH: loop header
LB: loop body
LE: loop exit
PB: predicated region body
PF: predicated region fallthrough
CT: control target
= control target key end

     0   :  { %s3816_s21 = smov 0   ;;  %s5671_s0 = inlined_call_operand.vmem [shape: f32[4,128], index: 0, kind: input, shape index: {}]   ;;  %s5672_s1 = inlined_call_operand.vmem [shape: f32[4,128], index: 1, kind: input, shape index: {}]   ;;  %s5673_s2 = inlined_call_operand.vmem [shape: f32[2,8,128], index: 2, kind: input, shape index: {}]   ;;  %s5674_s3 = inlined_call_operand.vmem [shape: f32[2,8,128], index: 3, kind: input, shape index: {}]   ;;  %s5675_s4 = inlined_call_operand.vmem [shape: f32[128,128], index: 4, kind: input, shape index: {}, may-alias: {4,11}]   ;;  %s5676_s5 = inlined_call_operand.vmem [shape: f32[1,128], index: 5, kind: input, shape index: {}, may-alias: {5,12}]   ;;  %s5677_s6 = inlined_call_operand.vmem [shape: f32[128,128], index: 6, kind: input, shape index: {}, may-alias: {6,13}]   ;;  %s5678_s7 = inlined_call_operand.vmem [shape: f32[128,128], index: 7, kind: input, shape index: {}, may-alias: {7,14}]   ;;  %s5679_s8 = inlined_call_operand.vmem [shape: f32[1,128], index: 8, kind: input, shape index: {}, may-alias: {8,15}]   ;;  %s5680_s9 = inlined_call_operand.vmem [shape: f32[1,128], index: 9, kind: input, shape index: {}, may-alias: {9,16}]   ;;  %s5681_s10 = inlined_call_operand.vmem [shape: f32[2,128], index: 10, kind: output, shape index: {0}]   ;;  %s5682_s11 = inlined_call_operand.vmem [shape: f32[128,128], index: 11, kind: output, shape index: {1}, may-alias: {4,11}]   ;;  %s5683_s12 = inlined_call_operand.vmem [shape: f32[1,128], index: 12, kind: output, shape index: {2}, may-alias: {5,12}]   ;;  %s5684_s13 = inlined_call_operand.vmem [shape: f32[128,128], index: 13, kind: output, shape index: {3}, may-alias: {6,13}]   ;;  %s5685_s14 = inlined_call_operand.vmem [shape: f32[128,128], index: 14, kind: output, shape index: {4}, may-alias: {7,14}]   ;;  %s5686_s15 = inlined_call_operand.vmem [shape: f32[1,128], index: 15, kind: output, shape index: {5}, may-alias: {8,15}]   ;;  %s5687_s16 = inlined_call_operand.vmem [shape: f32[1,128], index: 16, kind: output, shape index: {6}, may-alias: {9,16}]  }
   0x1   :  { %5703 = sst [smem:[#allocation23_spill]] %s5671_s0 }
   0x2 LB: > { %s3822_s22 = sadd.s32 4294967295, %s3726_s21   ;;  %p3100_p0 = scmp.ge.s32.totalorder %s3726_s21, 1  ;;  %s3726_s21 = sphi %s3816_s21, %s27_s21  }
   0x3   : > { %p448_p1 = scmp.lt.s32.totalorder %s3726_s21, 3 }
   0x5   : > { %p449_p2 = pnand %p3100_p0, %p448_p1 }
   0x7   : > { %452 = sbr.rel (%p449_p2) target bundleno = 1643 (0x66b), region = 60 }
   0xc   : > { %p496_p3 = scmp.lt.s32.totalorder %s3822_s22, 1  ;;  %p3103_p4 = scmp.ne.s32.totalorder %s3822_s22, 0 }
   0xe   : > { %s497_s23 = scalar_select %p496_p3, %s3822_s22, 1 }
   0xf   : > { %508 = sbr.rel (%p3103_p4) target bundleno = 47 (0x2f), region = 64 }
  0x10   : > { %s3101_s24 = sshll.u32 %s497_s23, 3 }
  0x11   : > { %s3831_s27 = scalar_lea.vmem %s5673_s2, %s3101_s24  ;;  %s3836_s30 = scalar_lea.vmem %s5674_s3, %s3101_s24 }
  0x14   : > { %v3728_v0 = vmov 0.0  }
  0x15   : > { %509 = vst [vmem:[#allocation4 + $0x30] sm:$0xff] %v3728_v0  ;;  %510 = vst [vmem:[#allocation4] sm:$0xff] %v3728_v0 }
  0x16   : > { %511 = vst [vmem:[#allocation4 + $0x58] sm:$0xff] %v3728_v0  ;;  %512 = vst [vmem:[#allocation4 + $0x18] sm:$0xff] %v3728_v0 }
  0x17   : > { %513 = vst [vmem:[#allocation4 + $0x50] sm:$0xff] %v3728_v0  ;;  %514 = vst [vmem:[#allocation4 + $0x68] sm:$0xff] %v3728_v0 }
  0x18   : > { %515 = vst [vmem:[#allocation4 + $0x8] sm:$0xff] %v3728_v0  ;;  %516 = vst [vmem:[#allocation4 + $0x48] sm:$0xff] %v3728_v0 }
  0x19   : > { %517 = vst [vmem:[#allocation4 + $0x40] sm:$0xff] %v3728_v0  ;;  %518 = vst [vmem:[#allocation4 + $0x20] sm:$0xff] %v3728_v0 }
  0x1a   : > { %519 = vst [vmem:[#allocation4 + $0x10] sm:$0xff] %v3728_v0  ;;  %520 = vst [vmem:[#allocation4 + $0x38] sm:$0xff] %v3728_v0 }
  0x1b   : > { %521 = vst [vmem:[#allocation4 + $0x60] sm:$0xff] %v3728_v0  ;;  %522 = vst [vmem:[#allocation4 + $0x70] sm:$0xff] %v3728_v0 }
  0x1c   : > { %523 = vst [vmem:[#allocation4 + $0x78] sm:$0xff] %v3728_v0  ;;  %524 = vst [vmem:[#allocation4 + $0x28] sm:$0xff] %v3728_v0 }
  0x1d   : > { %525 = vst [vmem:[#allocation5 + $0x28] sm:$0xff] %v3728_v0  ;;  %526 = vst [vmem:[#allocation5 + $0x68] sm:$0xff] %v3728_v0 }
  0x1e   : > { %527 = vst [vmem:[#allocation5 + $0x10] sm:$0xff] %v3728_v0  ;;  %528 = vst [vmem:[#allocation5 + $0x40] sm:$0xff] %v3728_v0 }
  0x1f   : > { %529 = vst [vmem:[#allocation5 + $0x48] sm:$0xff] %v3728_v0  ;;  %530 = vst [vmem:[#allocation5 + $0x30] sm:$0xff] %v3728_v0 }
  0x20   : > { %531 = vst [vmem:[#allocation5 + $0x70] sm:$0xff] %v3728_v0  ;;  %532 = vst [vmem:[#allocation5 + $0x38] sm:$0xff] %v3728_v0 }
  0x21   : > { %533 = vst [vmem:[#allocation5 + $0x20] sm:$0xff] %v3728_v0  ;;  %534 = vst [vmem:[#allocation5 + $0x78] sm:$0xff] %v3728_v0 }
  0x22   : > { %535 = vst [vmem:[#allocation5 + $0x18] sm:$0xff] %v3728_v0  ;;  %536 = vst [vmem:[#allocation5 + $0x58] sm:$0xff] %v3728_v0 }
  0x23   : > { %537 = vst [vmem:[#allocation5] sm:$0xff] %v3728_v0  ;;  %538 = vst [vmem:[#allocation5 + $0x8] sm:$0xff] %v3728_v0 }
  0x24   : > { %539 = vst [vmem:[#allocation5 + $0x60] sm:$0xff] %v3728_v0  ;;  %540 = vst [vmem:[#allocation5 + $0x50] sm:$0xff] %v3728_v0 }
  0x25   : > { %541 = vst [vmem:[#allocation6] sm:$0x1] %v3728_v0  ;;  %542 = vst [vmem:[#allocation7] sm:$0x1] %v3728_v0 }
  0x26   : > { %543 = vst [vmem:[#allocation8 + $0x8] sm:$0xff] %v3728_v0  ;;  %544 = vst [vmem:[#allocation8] sm:$0xff] %v3728_v0 }
  0x27   : > { %545 = vst [vmem:[#allocation8 + $0x48] sm:$0xff] %v3728_v0  ;;  %546 = vst [vmem:[#allocation8 + $0x60] sm:$0xff] %v3728_v0 }
  0x28   : > { %547 = vst [vmem:[#allocation8 + $0x68] sm:$0xff] %v3728_v0  ;;  %548 = vst [vmem:[#allocation8 + $0x18] sm:$0xff] %v3728_v0 }
  0x29   : > { %549 = vst [vmem:[#allocation8 + $0x10] sm:$0xff] %v3728_v0  ;;  %550 = vst [vmem:[#allocation8 + $0x38] sm:$0xff] %v3728_v0 }
  0x2a   : > { %551 = vst [vmem:[#allocation8 + $0x40] sm:$0xff] %v3728_v0  ;;  %552 = vst [vmem:[#allocation8 + $0x28] sm:$0xff] %v3728_v0 }
  0x2b   : > { %553 = vst [vmem:[#allocation8 + $0x70] sm:$0xff] %v3728_v0  ;;  %554 = vst [vmem:[#allocation8 + $0x20] sm:$0xff] %v3728_v0 }
  0x2c   : > { %555 = vst [vmem:[#allocation8 + $0x58] sm:$0xff] %v3728_v0  ;;  %556 = vst [vmem:[#allocation8 + $0x30] sm:$0xff] %v3728_v0 }
  0x2d   : > { %557 = vst [vmem:[#allocation8 + $0x50] sm:$0xff] %v3728_v0  ;;  %558 = vst [vmem:[#allocation8 + $0x78] sm:$0xff] %v3728_v0 }
  0x2e   : > { %559 = vst [vmem:[#allocation9] sm:$0x1] %v3728_v0 }
  0x2f PF: > { %v3840_v1 = vld [vmem:[%s3831_s27] sm:$0xff]  ;;  %vm637_vm0 = vcmask 1043456   ;;  %v775_v3 = vlaneseq  ;;  %v575_v11 = vld [vmem:[%s5675_s4 + $0x78] sm:$0xff]  ;;  %v574_v12 = vld [vmem:[%s5675_s4 + $0x70] sm:$0xff]  ;;  %v5688_v15 = vmov 0.0   ;;  %vm612_vm1 = vcmask 64512  }
  0x30   : > { %v592_v2 = vld [vmem:[%s5676_s5] sm:$0x1]  ;;  %v595_v4 = vpack.c.bf16 %v3840_v1, %v3840_v1  ;;  %v788_v13 = vpack.c.bf16 %v575_v11, %v574_v12  ;;  %v573_v17 = vld [vmem:[%s5675_s4 + $0x68] sm:$0xff]  ;;  %v571_v21 = vld [vmem:[%s5675_s4 + $0x58] sm:$0xff]  ;;  %v746_v29 = vrot.slane %v3840_v1, 4  ;;  %vm3730_vm2 = vmmov 0  }
  0x31   : > { %593 = vst [vmem:[#allocation3] sm:$0x1] %v592_v2  ;;  %v776_v5 = vshrl.u32 %v775_v3, 7  ;;  %v572_v18 = vld [vmem:[%s5675_s4 + $0x60] sm:$0xff]  ;;  %v570_v22 = vld [vmem:[%s5675_s4 + $0x50] sm:$0xff]  ;;  %v569_v25 = vld [vmem:[%s5675_s4 + $0x48] sm:$0xff] }
  0x32   : > { %596 = vxpose.xlu0.c.b16.start.end [1/1] (short) %v595_v4, 128  ;;  %3482 = vmatprep.subr.msk.bf16.mxu0 %vm637_vm0, %v595_v4  ;;  %v639_v6 = vsel %vm637_vm0, %v595_v4, 0  ;;  %v787_v19 = vpack.c.bf16 %v573_v17, %v572_v18  ;;  %v786_v23 = vpack.c.bf16 %v571_v21, %v570_v22  ;;  %v568_v26 = vld [vmem:[%s5675_s4 + $0x40] sm:$0xff]  ;;  %v567_v30 = vld [vmem:[%s5675_s4 + $0x38] sm:$0xff]  ;;  %v566_v31 = vld [vmem:[%s5675_s4 + $0x30] sm:$0xff]  ;;  %v747_v34 = vadd.f32 %v746_v29, %v3840_v1  ;;  %s3112_s28 = sshll.u32 %s3822_s22, 1  ;;  %s5704_s20 = sld [smem:[#allocation23_spill]] }
  0x33   : > { %3257 = vmatpush3.bf16.msra.mxu0 %v639_v6  ;;  %v3849_v7 = vsub.s32 0, %v776_v5  ;;  %v785_v28 = vpack.c.bf16 %v569_v25, %v568_v26  ;;  %v784_v33 = vpack.c.bf16 %v567_v30, %v566_v31  ;;  %v565_v35 = vld [vmem:[%s5675_s4 + $0x28] sm:$0xff]  ;;  %v564_v36 = vld [vmem:[%s5675_s4 + $0x20] sm:$0xff]  ;;  %v563_v43 = vld [vmem:[%s5675_s4 + $0x18] sm:$0xff]  ;;  %s4036_s17 = scalar_lea.vmem %s5672_s1, %s3112_s28  ;;  %p3142_p5 = scmp.ne.s32.totalorder %s3822_s22, 1 }
  0x34   : > { %3292 = vmatprep.subr.bf16.mxu0 %v788_v13  ;;  %v783_v38 = vpack.c.bf16 %v565_v35, %v564_v36  ;;  %v748_v39 = vrot.slane %v747_v34, 2  ;;  %v562_v45 = vld [vmem:[%s5675_s4 + $0x10] sm:$0xff]  ;;  %v561_v46 = vld [vmem:[%s5675_s4 + $0x8] sm:$0xff]  ;;  %v560_v47 = vld [vmem:[%s5675_s4] sm:$0xff] }
  0x35   : > { %v782_v49 = vpack.c.bf16 %v563_v43, %v562_v45  ;;  %v781_v50 = vpack.c.bf16 %v561_v46, %v560_v47 }
  0x36   : > { %v749_v41 = vadd.f32 %v748_v39, %v747_v34  ;;  %v1486_v39 = vld [vmem:[#allocation7] sm:$0x1] }
  0x38   : > { %v3851_v8 = vld [vmem:[#allocation3] sm:$0x1]  ;;  %v750_v44 = vrot.slane %v749_v41, 1  ;;  %s4045_s23 = scalar_lea.vmem %s5704_s20, %s3112_s28 }
  0x39   : > { %v778_v9 = vrot.slane %v3851_v8, %v3849_v7 }
  0x3a   : > { %v3972_v48 = vadd.f32 %v750_v44, %v749_v41 }
  0x3b   : > { %v780_v10 = vpack.c.bf16 %v778_v9, %v778_v9 }
  0x3d   : > { %3483 = vmatprep.subr.msk.bf16.mxu1 %vm637_vm0, %v780_v10  ;;  %v790_v14 = vsel %vm637_vm0, %v780_v10, 0 }
  0x3e   : > { %3275 = vmatpush3.bf16.msra.mxu1 %v790_v14 }
  0x3f   : > { %3324 = vmatprep.subr.mxu1 %v5688_v15 }
  0x94   : > { %v3864_v16 = vpop.trf.xlu0 }
  0x95   : > { %3258 = vmatprep.mubr.msk.bf16.mxu0 %vm612_vm1, %v3864_v16  ;;  %3276 = vmatprep.mubr.msk.bf16.mxu1 %vm612_vm1, %v3864_v16 }
  0x98   : > { %v3876_v20 = vpop.trf.xlu0 }
  0x99   : > { %3259 = vmatmul.mubr.msk.bf16.vlgmr.msra.gmra.mxu0 %vm612_vm1, %v3876_v20  ;;  %3277 = vmatmul.mubr.msk.bf16.vlgmr.msra.gmra.mxu1 %vm612_vm1, %v3876_v20 }
  0x9a   : > { %3325 = vmatpush3.msra.mxu1 %v575_v11  ;;  %3293 = vmatpush3.bf16.msra.mxu0 %v788_v13 }
  0x9b   : > { %3326 = vmatprep.subr.mxu1 %v5688_v15  ;;  %3294 = vmatprep.subr.bf16.mxu0 %v787_v19 }
  0x9c   : > { %v3889_v24 = vpop.trf.xlu0  ;;  %3327 = vmatpush3.msra.mxu1 %v574_v12 }
  0x9d   : > { %3262 = vmatprep.mubr.msk.bf16.mxu0 %vm612_vm1, %v3889_v24  ;;  %3280 = vmatprep.mubr.msk.bf16.mxu1 %vm612_vm1, %v3889_v24 }
  0x9e   : > { %3328 = vmatprep.subr.mxu1 %v5688_v15  ;;  %3295 = vmatpush3.bf16.msra.mxu0 %v787_v19 }
  0x9f   : > { %3329 = vmatpush3.msra.mxu1 %v573_v17  ;;  %3296 = vmatprep.subr.bf16.mxu0 %v786_v23 }
  0xa0   : > { %3330 = vmatprep.subr.mxu1 %v5688_v15  ;;  %v3903_v27 = vpop.trf.xlu0 }
  0xa1   : > { %3331 = vmatpush3.msra.mxu1 %v572_v18  ;;  %3263 = vmatmul.mubr.msk.bf16.gmra.mxu0 %vm612_vm1, %v3903_v27 }
  0xa2   : > { %3281 = vmatmul.mubr.msk.bf16.gmra.mxu1 %vm612_vm1, %v3903_v27  ;;  %3332 = vmatprep.subr.mxu1 %v5688_v15 }
  0xa3   : > { %3333 = vmatpush3.msra.mxu1 %v571_v21  ;;  %3297 = vmatpush3.bf16.msra.mxu0 %v786_v23 }
  0xa4   : > { %3334 = vmatprep.subr.mxu1 %v5688_v15  ;;  %v3918_v32 = vpop.trf.xlu0  ;;  %3298 = vmatprep.subr.bf16.mxu0 %v785_v28 }
  0xa5   : > { %3335 = vmatpush3.msra.mxu1 %v570_v22  ;;  %3266 = vmatprep.mubr.msk.bf16.mxu0 %vm612_vm1, %v3918_v32 }
  0xa6   : > { %3284 = vmatprep.mubr.msk.bf16.mxu1 %vm612_vm1, %v3918_v32  ;;  %3336 = vmatprep.subr.mxu1 %v5688_v15 }
  0xa7   : > { %3337 = vmatpush3.msra.mxu1 %v569_v25  ;;  %3299 = vmatpush3.bf16.msra.mxu0 %v785_v28 }
  0xa8   : > { %3338 = vmatprep.subr.mxu1 %v5688_v15  ;;  %v3933_v37 = vpop.trf.xlu0  ;;  %3300 = vmatprep.subr.bf16.mxu0 %v784_v33 }
  0xa9   : > { %3339 = vmatpush3.msra.mxu1 %v568_v26  ;;  %3267 = vmatmul.mubr.msk.bf16.gmra.mxu0 %vm612_vm1, %v3933_v37 }
  0xaa   : > { %3285 = vmatmul.mubr.msk.bf16.gmra.mxu1 %vm612_vm1, %v3933_v37  ;;  %3340 = vmatprep.subr.mxu1 %v5688_v15 }
  0xab   : > { %3341 = vmatpush3.msra.mxu1 %v567_v30  ;;  %3301 = vmatpush3.bf16.msra.mxu0 %v784_v33  ;;  %v1002_v30 = vmul.f32 8.0, %v3851_v8 }
  0xac   : > { %3342 = vmatprep.subr.mxu1 %v5688_v15  ;;  %v3941_v40 = vpop.trf.xlu0  ;;  %3302 = vmatprep.subr.bf16.mxu0 %v783_v38 }
  0xad   : > { %3343 = vmatpush3.msra.mxu1 %v566_v31  ;;  %3270 = vmatprep.mubr.msk.bf16.mxu0 %vm612_vm1, %v3941_v40 }
  0xae   : > { %3288 = vmatprep.mubr.msk.bf16.mxu1 %vm612_vm1, %v3941_v40  ;;  %3344 = vmatprep.subr.mxu1 %v5688_v15 }
  0xaf   : > { %3345 = vmatpush3.msra.mxu1 %v565_v35  ;;  %3303 = vmatpush3.bf16.msra.mxu0 %v783_v38 }
  0xb0   : > { %3346 = vmatprep.subr.mxu1 %v5688_v15  ;;  %v3949_v42 = vpop.trf.xlu0  ;;  %3304 = vmatprep.subr.bf16.mxu0 %v782_v49 }
  0xb1   : > { %3347 = vmatpush3.msra.mxu1 %v564_v36  ;;  %3271 = vmatmul.mubr.msk.bf16.gmra.mxu0 %vm612_vm1, %v3949_v42  ;;  %v1482_v36 = vld [vmem:[#allocation6] sm:$0x1] }
  0xb2   : > { %3289 = vmatmul.mubr.msk.bf16.gmra.mxu1 %vm612_vm1, %v3949_v42  ;;  %3348 = vmatprep.subr.mxu1 %v5688_v15  ;;  %v1483_v44 = vmul.f32 0.9, %v1482_v36 }
  0xb3   : > { %3349 = vmatpush3.msra.mxu1 %v563_v43  ;;  %3356 = vmatprep.mubr.msk.f32.mxu1 %vm3730_vm2, %v5688_v15 }
  0xb4   : > { %3350 = vmatprep.subr.mxu1 %v5688_v15  ;;  %3305 = vmatpush3.bf16.msra.mxu0 %v782_v49 }
  0xb5   : > { %3351 = vmatpush3.msra.mxu1 %v562_v45  ;;  %3306 = vmatprep.subr.bf16.mxu0 %v781_v50 }
  0xb6   : > { %3352 = vmatprep.subr.mxu1 %v5688_v15 }
  0xb7   : > { %3353 = vmatpush3.msra.mxu1 %v561_v46  ;;  %v1487_v46 = vmul.f32 0.999, %v1486_v39  ;;  %v1139_v39 = vld [vmem:[#allocation5 + $0x68] sm:$0xff] }
  0xb8   : > { %3354 = vmatprep.subr.mxu1 %v5688_v15  ;;  %3307 = vmatpush3.bf16.msra.mxu0 %v781_v50 }
  0xb9   : > { %3355 = vmatpush3.msra.mxu1 %v560_v47 }
  0xba   : > { %3357 = vmatmul.mubr.f32.vlgmr.msra.gmra.mxu1 %v3972_v48 }
  0xbb   : > { %3361 = vmatprep.mubr.msk.bf16.mxu1 %vm612_vm1, %v3864_v16 }
 0x159   : > { %v3260_v51 = vpop.f32.mrf.mxu0  ;;  %v3978_v52 = vpop.f32.mrf.mxu1 }
 0x15b   : > { %v675_v53 = vpop.f32.mrf.mxu0  ;;  %v3980_v54 = vpop.f32.mrf.mxu1 }
 0x15d   : > { %v3261_v55 = vpop.f32.mrf.mxu0  ;;  %v3982_v56 = vpop.f32.mrf.mxu1 }
 0x15e   : > { %v3986_v60 = vpack.c.bf16 %v3261_v55, %v3260_v51 }
 0x15f   : > { %v678_v57 = vpop.f32.mrf.mxu0  ;;  %v3984_v58 = vpop.f32.mrf.mxu1 }
 0x160   : > { %v738_v59 = vpack.c.bf16 %v678_v57, %v675_v53 }
 0x161   : > { %v3264_v61 = vpop.f32.mrf.mxu0 }
 0x162   : > { %v3988_v62 = vpop.f32.mrf.mxu1  ;;  %3308 = vmatprep.mubr.bf16.mxu0 %v738_v59 }
 0x163   : > { %v691_v63 = vpop.f32.mrf.mxu0  ;;  %3309 = vmatmul.mubr.bf16.vlgmr.msra.gmra.mxu0 %v3986_v60 }
 0x164   : > { %v3991_v0 = vpop.f32.mrf.mxu1 }
 0x165   : > { %v3265_v1 = vpop.f32.mrf.mxu0 }
 0x166   : > { %v3993_v2 = vpop.f32.mrf.mxu1  ;;  %v3999_v6 = vpack.c.bf16 %v3265_v1, %v3264_v61 }
 0x167   : > { %v694_v3 = vpop.f32.mrf.mxu0 }
 0x168   : > { %v3995_v4 = vpack.c.bf16 %v694_v3, %v691_v63  ;;  %v3997_v5 = vpop.f32.mrf.mxu1 }
 0x169   : > { %v3268_v9 = vpop.f32.mrf.mxu0 }
 0x16a   : > { %v4001_v10 = vpop.f32.mrf.mxu1  ;;  %3312 = vmatprep.mubr.bf16.mxu0 %v3995_v4 }
 0x16b   : > { %v707_v11 = vpop.f32.mrf.mxu0  ;;  %3313 = vmatmul.mubr.bf16.gmra.mxu0 %v3999_v6 }
 0x16c   : > { %v4005_v12 = vpop.f32.mrf.mxu1 }
 0x16d   : > { %v3269_v13 = vpop.f32.mrf.mxu0 }
 0x16e   : > { %v4007_v14 = vpop.f32.mrf.mxu1  ;;  %v4013_v19 = vpack.c.bf16 %v3269_v13, %v3268_v9  ;;  %v4048_v9 = vld [vmem:[%s4045_s23] sm:$0x1] }
 0x16f   : > { %v710_v16 = vpop.f32.mrf.mxu0 }
 0x170   : > { %v4009_v17 = vpack.c.bf16 %v710_v16, %v707_v11  ;;  %v4011_v18 = vpop.f32.mrf.mxu1 }
 0x171   : > { %v3272_v21 = vpop.f32.mrf.mxu0 }
 0x172   : > { %v4015_v22 = vpop.f32.mrf.mxu1  ;;  %3316 = vmatprep.mubr.bf16.mxu0 %v4009_v17 }
 0x173   : > { %v723_v23 = vpop.f32.mrf.mxu0  ;;  %3317 = vmatmul.mubr.bf16.gmra.mxu0 %v4013_v19 }
 0x174   : > { %v4019_v25 = vpop.f32.mrf.mxu1 }
 0x175   : > { %v3273_v26 = vpop.f32.mrf.mxu0 }
 0x176   : > { %v4021_v28 = vpop.f32.mrf.mxu1  ;;  %v4028_v34 = vpack.c.bf16 %v3273_v26, %v3272_v21 }
 0x177   : > { %v726_v29 = vpop.f32.mrf.mxu0 }
 0x178   : > { %v4024_v31 = vpack.c.bf16 %v726_v29, %v723_v23  ;;  %v4026_v33 = vpop.f32.mrf.mxu1 }
 0x17a   : > { %v1069_v35 = vpop.f32.mrf.mxu1  ;;  %3320 = vmatprep.mubr.bf16.mxu0 %v4024_v31 }
 0x17b   : > { %v1070_v38 = vadd.f32 %v1069_v35, %v1002_v30  ;;  %3321 = vmatmul.mubr.bf16.gmra.mxu0 %v4028_v34  ;;  %v1138_v30 = vld [vmem:[#allocation5 + $0x28] sm:$0xff]  ;;  %v1077_v35 = vld [vmem:[#allocation4 + $0x18] sm:$0xff] }
 0x17c   : > { %3393 = vmatprep.mubr.bf16.mxu0 %v738_v59  ;;  %v3358_v41 = vpop.f32.mrf.mxu1  ;;  %v4039_v59 = vld [vmem:[%s4036_s17] sm:$0x1] }
 0x17d   : > { %v1073_v43 = vmul.f32 0.001953125, %v1070_v38  ;;  %v1141_v38 = vld [vmem:[#allocation5 + $0x40] sm:$0xff] }
 0x17f   : > { %v1484_v45 = vmul.f32 0.1, %v1073_v43  ;;  %v1488_v47 = vmul.f32 %v1073_v43, %v1073_v43 }
 0x181   : > { %v1485_v49 = vadd.f32 %v1484_v45, %v1483_v44  ;;  %v1489_v50 = vmul.f32 0.001, %v1488_v47  ;;  %v1154_v44 = vmul.f32 0.999, %v1138_v30  ;;  %v1080_v47 = vld [vmem:[#allocation4 + $0x8] sm:$0xff] }
 0x182   : > { %v1081_v30 = vld [vmem:[#allocation4 + $0x48] sm:$0xff] }
 0x183   : > { %v1490_v51 = vadd.f32 %v1489_v50, %v1487_v46  ;;  %1491 = vst [vmem:[#allocation6] sm:$0x1] %v1485_v49  ;;  %v1493_v11 = vmul.f32 %v1485_v49, %v4048_v9  ;;  %v1093_v46 = vmul.f32 0.9, %v1077_v35  ;;  %v1144_v49 = vld [vmem:[#allocation5 + $0x70] sm:$0xff] }
 0x185   : > { %1492 = vst [vmem:[#allocation7] sm:$0x1] %v1490_v51  ;;  %3498 = vrsqrt.f32 %v1490_v51  ;;  %vm1496_vm3 = vcmp.eq.f32.partialorder %v1490_v51, inf  ;;  %v1499_v55 = vand.u32 2147483648, %v1490_v51  ;;  %vm1498_vm4 = vcmp.eq.f32.partialorder %v1490_v51, 0.0 }
 0x192   : > { %v3499_v53 = vpop.eup %3498 }
 0x193   : > { %v1495_v57 = vmul.f32 %v3499_v53, %v1490_v51 }
 0x195   : > { %v1497_v61 = vsel %vm1496_vm3, %v1490_v51, %v1495_v57  ;;  %v1157_v51 = vmul.f32 0.999, %v1141_v38  ;;  %v1079_v38 = vld [vmem:[#allocation4 + $0x68] sm:$0xff] }
 0x196   : > { %v1500_v63 = vsel %vm1498_vm4, %v1499_v55, %v1497_v61  ;;  %v4073_v55 = vmul.f32 0.999, %v1139_v39 }
 0x197   : > { %v1501_v1 = vmul.f32 %v1500_v63, %v4039_v59 }
 0x199   : > { %v1502_v3 = vadd.f32 1e-08, %v1501_v1  ;;  %v1078_v1 = vld [vmem:[#allocation4 + $0x50] sm:$0xff] }
 0x19b   : > { %3500 = vrcp.f32 %v1502_v3 }
 0x1a8   : > { %v3501_v13 = vpop.eup %3500 }
 0x1a9   : > { %v1504_v16 = vmul.f32 %v3501_v13, %v1493_v11  ;;  %v4076_v11 = vmul.f32 0.9, %v1080_v47  ;;  %v4078_v13 = vmul.f32 0.999, %v1144_v49  ;;  %v1084_v47 = vld [vmem:[#allocation4 + $0x10] sm:$0xff] }
 0x1ab   : > { %v1505_v21 = vsub.f32 %v3851_v8, %v1504_v16  ;;  %v1076_v8 = vld [vmem:[#allocation4 + $0x58] sm:$0xff] }
 0x1ac   : > { %v1092_v36 = vmul.f32 0.9, %v1076_v8 }
 0x1ad   : > { %1506 = vst [vmem:[#allocation3] sm:$0x1] %v1505_v21 }
 0x1b4   : > { %v3719_v23 = vld [vmem:[#allocation3] ss:$0 sm:$0xff] }
 0x1b5   : > { %v1535_v26 = vpack.c.bf16 %v3719_v23, %v3719_v23 }
 0x1b7   : > { %3484 = vmatprep.subr.msk.bf16.mxu1 %vm637_vm0, %v1535_v26  ;;  %v1545_v29 = vsel %vm637_vm0, %v1535_v26, 0 }
 0x1b8   : > { %3360 = vmatpush3.bf16.msra.mxu1 %v1545_v29 }
 0x1b9   : > { %3409 = vmatprep.subr.mxu1 %v5688_v15 }
 0x1bb   : > { %3362 = vmatmul.mubr.msk.bf16.vlgmr.msra.gmra.mxu1 %vm612_vm1, %v3876_v20  ;;  %v1140_v20 = vld [vmem:[#allocation5 + $0x10] sm:$0xff] }
 0x1bc   : > { %3365 = vmatprep.mubr.msk.bf16.mxu1 %vm612_vm1, %v3889_v24  ;;  %v1074_v24 = vld [vmem:[#allocation4 + $0x30] sm:$0xff]  ;;  %v1156_v41 = vmul.f32 0.999, %v1140_v20 }
 0x1bd   : > { %v1090_v43 = vmul.f32 0.9, %v1074_v24  ;;  %v4083_v24 = vmul.f32 0.9, %v1078_v1 }
 0x1c3   : > { %3366 = vmatmul.mubr.msk.bf16.gmra.mxu1 %vm612_vm1, %v3903_v27 }
 0x1c4   : > { %3369 = vmatprep.mubr.msk.bf16.mxu1 %vm612_vm1, %v3918_v32 }
 0x1cb   : > { %3370 = vmatmul.mubr.msk.bf16.gmra.mxu1 %vm612_vm1, %v3933_v37  ;;  %v1075_v37 = vld [vmem:[#allocation4] sm:$0xff] }
 0x1cc   : > { %3373 = vmatprep.mubr.msk.bf16.mxu1 %vm612_vm1, %v3941_v40  ;;  %v1091_v53 = vmul.f32 0.9, %v1075_v37 }
 0x1d3   : > { %3374 = vmatmul.mubr.msk.bf16.gmra.mxu1 %vm612_vm1, %v3949_v42 }
 0x1d4   : > { %3441 = vmatprep.mubr.msk.f32.mxu1 %vm3730_vm2, %v5688_v15 }
 0x223   : > { %v3310_v27 = vpop.f32.mrf.mxu0 }
 0x224   : > { %v932_v32 = vadd.f32 %v3310_v27, %v3978_v52 }
 0x225   : > { %v923_v40 = vpop.f32.mrf.mxu0 }
 0x226   : > { %v988_v42 = vmul.f32 0.001953125, %v932_v32  ;;  %v924_v45 = vadd.f32 %v923_v40, %v3980_v54  ;;  %v1142_v54 = vld [vmem:[#allocation5 + $0x48] sm:$0xff] }
 0x227   : > { %v3311_v50 = vpop.f32.mrf.mxu0 }
 0x228   : > { %v1108_v52 = vmul.f32 0.1, %v988_v42  ;;  %v1172_v57 = vmul.f32 %v988_v42, %v988_v42  ;;  %v986_v61 = vmul.f32 0.001953125, %v924_v45  ;;  %v935_v63 = vadd.f32 %v3311_v50, %v3982_v56  ;;  %v1145_v56 = vld [vmem:[#allocation5 + $0x38] sm:$0xff]  ;;  %v1143_v45 = vld [vmem:[#allocation5 + $0x30] sm:$0xff] }
 0x229   : > { %v926_v3 = vpop.f32.mrf.mxu0 }
 0x22a   : > { %v4080_v16 = vadd.f32 %v1108_v52, %v1092_v36  ;;  %v1188_v21 = vmul.f32 0.001, %v1172_v57  ;;  %v1106_v23 = vmul.f32 0.1, %v986_v61  ;;  %v1170_v26 = vmul.f32 %v986_v61, %v986_v61  ;;  %v1148_v61 = vld [vmem:[#allocation5 + $0x18] sm:$0xff] }
 0x22b   : > { %v989_v29 = vmul.f32 0.001953125, %v935_v63  ;;  %v927_v8 = vadd.f32 %v926_v3, %v3984_v58  ;;  %v3314_v20 = vpop.f32.mrf.mxu0  ;;  %v4090_v36 = vmul.f32 0.999, %v1142_v54 }
 0x22c   : > { %v4085_v27 = vadd.f32 %v1188_v21, %v1156_v41  ;;  %1220 = vst [vmem:[#allocation4 + $0x58] sm:$0xff] %v4080_v16  ;;  %v4088_v35 = vadd.f32 %v1106_v23, %v1090_v43  ;;  %v1186_v32 = vmul.f32 0.001, %v1170_v26  ;;  %v948_v58 = vadd.f32 %v3314_v20, %v3988_v62  ;;  %v1082_v23 = vld [vmem:[#allocation4 + $0x40] sm:$0xff] }
 0x22d   : > { %v1109_v37 = vmul.f32 0.1, %v989_v29  ;;  %v1173_v39 = vmul.f32 %v989_v29, %v989_v29  ;;  %v987_v40 = vmul.f32 0.001953125, %v927_v8  ;;  %v939_v42 = vpop.f32.mrf.mxu0  ;;  %v4096_v41 = vmul.f32 0.9, %v1081_v30  ;;  %v1146_v26 = vld [vmem:[#allocation5 + $0x20] sm:$0xff] }
 0x22e   : > { %1236 = vst [vmem:[#allocation5 + $0x10] sm:$0xff] %v4085_v27  ;;  %3502 = vrsqrt.f32 %v4085_v27  ;;  %1218 = vst [vmem:[#allocation4 + $0x30] sm:$0xff] %v4088_v35  ;;  %v4098_v43 = vmul.f32 0.999, %v1145_v56  ;;  %v4100_v49 = vadd.f32 %v1186_v32, %v1154_v44  ;;  %v4104_v62 = vmul.f32 0.9, %v1079_v38 }
 0x22f   : > { %v4102_v50 = vadd.f32 %v1109_v37, %v1093_v46  ;;  %v1189_v52 = vmul.f32 0.001, %v1173_v39  ;;  %v3315_v57 = vpop.f32.mrf.mxu0  ;;  %v1107_v63 = vmul.f32 0.1, %v987_v40  ;;  %v1171_v1 = vmul.f32 %v987_v40, %v987_v40  ;;  %v1085_v30 = vld [vmem:[#allocation4 + $0x38] sm:$0xff] }
 0x230   : > { %v992_v3 = vmul.f32 0.001953125, %v948_v58  ;;  %v940_v54 = vadd.f32 %v939_v42, %v3991_v0  ;;  %v4109_v21 = vrot.slane %v4048_v9, %v3849_v7  ;;  %1234 = vst [vmem:[#allocation5 + $0x28] sm:$0xff] %v4100_v49  ;;  %3504 = vrsqrt.f32 %v4100_v49  ;;  %v1149_v40 = vld [vmem:[#allocation5 + $0x58] sm:$0xff]  ;;  %v1083_v58 = vld [vmem:[#allocation4 + $0x20] sm:$0xff] }
 0x231   : > { %1221 = vst [vmem:[#allocation4 + $0x18] sm:$0xff] %v4102_v50  ;;  %v4114_v44 = vmul.f32 0.999, %v1143_v45  ;;  %v4116_v46 = vmul.f32 0.9, %v1084_v47  ;;  %v4118_v29 = vadd.f32 %v1189_v52, %v1157_v51  ;;  %v4120_v8 = vadd.f32 %v1107_v63, %v1091_v53  ;;  %v942_v20 = vpop.f32.mrf.mxu0 }
 0x232   : > { %v1187_v0 = vmul.f32 0.001, %v1171_v1  ;;  %v4122_v9 = vmul.f32 0.999, %v1148_v61  ;;  %v1112_v56 = vmul.f32 0.1, %v992_v3  ;;  %v1176_v32 = vmul.f32 %v992_v3, %v992_v3 }
 0x233   : > { %v990_v38 = vmul.f32 0.001953125, %v940_v54  ;;  %v951_v37 = vadd.f32 %v3315_v57, %v3993_v2  ;;  %v4127_v39 = vrot.slane %v4039_v59, %v3849_v7  ;;  %1237 = vst [vmem:[#allocation5 + $0x40] sm:$0xff] %v4118_v29  ;;  %3506 = vrsqrt.f32 %v4118_v29  ;;  %1219 = vst [vmem:[#allocation4] sm:$0xff] %v4120_v8  ;;  %v3318_v63 = vpop.f32.mrf.mxu0 }
 0x234   : > { %v4132_v51 = vmul.f32 0.9, %v1082_v23  ;;  %v4134_v53 = vmul.f32 0.999, %v1146_v26  ;;  %v4137_v42 = vadd.f32 %v1187_v0, %v4073_v55  ;;  %v4140_v2 = vadd.f32 %v1112_v56, %v4076_v11 }
 0x235   : > { %v1192_v59 = vmul.f32 0.001, %v1176_v32  ;;  %v4142_v45 = vmul.f32 0.9, %v1085_v30  ;;  %v1110_v47 = vmul.f32 0.1, %v990_v38  ;;  %v1174_v52 = vmul.f32 %v990_v38, %v990_v38 }
 0x236   : > { %v993_v57 = vmul.f32 0.001953125, %v951_v37  ;;  %v943_v61 = vadd.f32 %v942_v20, %v3997_v5  ;;  %v4147_v1 = vmul.f32 %v4109_v21, %v4080_v16  ;;  %1235 = vst [vmem:[#allocation5 + $0x68] sm:$0xff] %v4137_v42  ;;  %3508 = vrsqrt.f32 %v4137_v42  ;;  %1224 = vst [vmem:[#allocation4 + $0x8] sm:$0xff] %v4140_v2 }
 0x237   : > { %v4152_v55 = vmul.f32 0.999, %v1149_v40  ;;  %v4154_v11 = vmul.f32 0.9, %v1083_v58  ;;  %vm1286_vm5 = vcmp.eq.f32.partialorder %v4085_v27, inf  ;;  %v4158_v3 = vadd.f32 %v1192_v59, %v4078_v13  ;;  %v955_v40 = vpop.f32.mrf.mxu0 }
 0x238   : > { %v4161_v5 = vadd.f32 %v1110_v47, %v4083_v24  ;;  %v1190_v16 = vmul.f32 0.001, %v1174_v52  ;;  %v1113_v54 = vmul.f32 0.1, %v993_v57  ;;  %v1177_v23 = vmul.f32 %v993_v57, %v993_v57 }
 0x239   : > { %v991_v26 = vmul.f32 0.001953125, %v943_v61  ;;  %v964_v0 = vadd.f32 %v3318_v63, %v4001_v10  ;;  %vm1288_vm6 = vcmp.eq.f32.partialorder %v4085_v27, 0.0  ;;  %v1289_v20 = vand.u32 2147483648, %v4085_v27  ;;  %1240 = vst [vmem:[#allocation5 + $0x70] sm:$0xff] %v4158_v3 }
 0x23a   : > { %v4168_v30 = vmul.f32 %v4109_v21, %v4088_v35  ;;  %3510 = vrsqrt.f32 %v4158_v3  ;;  %1222 = vst [vmem:[#allocation4 + $0x50] sm:$0xff] %v4161_v5  ;;  %vm1272_vm7 = vcmp.eq.f32.partialorder %v4100_v49, inf  ;;  %v4175_v24 = vadd.f32 %v1190_v16, %v4090_v36 }
 0x23b   : > { %v3503_v13 = vpop.eup %3502  ;;  %v4178_v10 = vadd.f32 %v1113_v54, %v4096_v41  ;;  %v1193_v56 = vmul.f32 0.001, %v1177_v23  ;;  %v1111_v35 = vmul.f32 0.1, %v991_v26  ;;  %v1175_v38 = vmul.f32 %v991_v26, %v991_v26 }
 0x23c   : > { %v1285_v32 = vmul.f32 %v3503_v13, %v4085_v27  ;;  %v996_v37 = vmul.f32 0.001953125, %v964_v0  ;;  %vm1274_vm8 = vcmp.eq.f32.partialorder %v4100_v49, 0.0  ;;  %v1275_v58 = vand.u32 2147483648, %v4100_v49  ;;  %1238 = vst [vmem:[#allocation5 + $0x48] sm:$0xff] %v4175_v24 }
 0x23d   : > { %vm1293_vm9 = vcmp.eq.f32.partialorder %v4118_v29, inf  ;;  %3512 = vrsqrt.f32 %v4175_v24  ;;  %1225 = vst [vmem:[#allocation4 + $0x48] sm:$0xff] %v4178_v10  ;;  %v3505_v36 = vpop.eup %3504  ;;  %vm1295_vm10 = vcmp.eq.f32.partialorder %v4118_v29, 0.0  ;;  %v4192_v59 = vadd.f32 %v1193_v56, %v4098_v43  ;;  %v3319_v43 = vpop.f32.mrf.mxu0 }
 0x23e   : > { %v1287_v41 = vsel %vm1286_vm5, %v4085_v27, %v1285_v32  ;;  %v4195_v47 = vadd.f32 %v1111_v35, %v4104_v62  ;;  %v1271_v57 = vmul.f32 %v3505_v36, %v4100_v49  ;;  %v1191_v61 = vmul.f32 0.001, %v1175_v38 }
 0x23f   : > { %v1290_v52 = vsel %vm1288_vm6, %v1289_v20, %v1287_v41  ;;  %v1116_v63 = vmul.f32 0.1, %v996_v37  ;;  %v1296_v54 = vand.u32 2147483648, %v4118_v29  ;;  %vm1279_vm11 = vcmp.eq.f32.partialorder %v4137_v42, inf  ;;  %1241 = vst [vmem:[#allocation5 + $0x38] sm:$0xff] %v4192_v59  ;;  %v958_v38 = vpop.f32.mrf.mxu0 }
 0x240   : > { %v1388_v16 = vmul.f32 %v4127_v39, %v1290_v52  ;;  %3514 = vrsqrt.f32 %v4192_v59  ;;  %1223 = vst [vmem:[#allocation4 + $0x68] sm:$0xff] %v4195_v47  ;;  %v3507_v62 = vpop.eup %3506  ;;  %v1273_v27 = vsel %vm1272_vm7, %v4100_v49, %v1271_v57  ;;  %vm1281_vm12 = vcmp.eq.f32.partialorder %v4137_v42, 0.0 }
 0x241   : > { %v1282_v23 = vand.u32 2147483648, %v4137_v42  ;;  %v4212_v26 = vadd.f32 %v1191_v61, %v4114_v44  ;;  %v1276_v20 = vsel %vm1274_vm8, %v1275_v58, %v1273_v27  ;;  %v1292_v13 = vmul.f32 %v3507_v62, %v4118_v29 }
 0x242   : > { %v1404_v0 = vadd.f32 1e-08, %v1388_v16  ;;  %v4218_v56 = vadd.f32 %v1116_v63, %v4116_v46  ;;  %v1386_v32 = vmul.f32 %v4127_v39, %v1276_v20  ;;  %vm1314_vm13 = vcmp.eq.f32.partialorder %v4158_v3, inf }
 0x243   : > { %vm1316_vm14 = vcmp.eq.f32.partialorder %v4158_v3, 0.0  ;;  %1239 = vst [vmem:[#allocation5 + $0x30] sm:$0xff] %v4212_v26  ;;  %3516 = vrsqrt.f32 %v4212_v26  ;;  %v3509_v44 = vpop.eup %3508  ;;  %v1294_v49 = vsel %vm1293_vm9, %v4118_v29, %v1292_v13  ;;  %v1317_v35 = vand.u32 2147483648, %v4158_v3 }
 0x244   : > { %3518 = vrcp.f32 %v1404_v0  ;;  %v1180_v46 = vmul.f32 %v996_v37, %v996_v37  ;;  %1228 = vst [vmem:[#allocation4 + $0x10] sm:$0xff] %v4218_v56  ;;  %v1402_v58 = vadd.f32 1e-08, %v1386_v32  ;;  %v1297_v36 = vsel %vm1295_vm10, %v1296_v54, %v1294_v49  ;;  %v3322_v32 = vpop.f32.mrf.mxu0 }
 0x245   : > { %v1278_v41 = vmul.f32 %v3509_v44, %v4137_v42  ;;  %vm1300_vm15 = vcmp.eq.f32.partialorder %v4175_v24, inf  ;;  %v1389_v52 = vmul.f32 %v4127_v39, %v1297_v36  ;;  %v956_v61 = vadd.f32 %v955_v40, %v4005_v12 }
 0x246   : > { %v1196_v57 = vmul.f32 0.001, %v1180_v46  ;;  %v967_v63 = vadd.f32 %v3319_v43, %v4007_v14  ;;  %3520 = vrcp.f32 %v1402_v58  ;;  %vm1302_vm3 = vcmp.eq.f32.partialorder %v4175_v24, 0.0 }
 0x247   : > { %v3511_v16 = vpop.eup %3510  ;;  %v1280_v37 = vsel %vm1279_vm11, %v4137_v42, %v1278_v41  ;;  %v959_v29 = vadd.f32 %v958_v38, %v4011_v18  ;;  %v1405_v54 = vadd.f32 1e-08, %v1389_v52  ;;  %v1303_v40 = vand.u32 2147483648, %v4175_v24 }
 0x248   : > { %v1283_v62 = vsel %vm1281_vm12, %v1282_v23, %v1280_v37  ;;  %v1313_v27 = vmul.f32 %v3511_v16, %v4158_v3  ;;  %v4246_v12 = vadd.f32 %v1196_v57, %v4122_v9  ;;  %v994_v43 = vmul.f32 0.001953125, %v956_v61 }
 0x249   : > { %v1387_v14 = vmul.f32 %v4127_v39, %v1283_v62  ;;  %v997_v0 = vmul.f32 0.001953125, %v967_v63  ;;  %3522 = vrcp.f32 %v1405_v54  ;;  %vm1321_vm4 = vcmp.eq.f32.partialorder %v4192_v59, inf  ;;  %v971_v54 = vpop.f32.mrf.mxu0 }
 0x24a   : > { %v3513_v20 = vpop.eup %3512  ;;  %v1315_v18 = vsel %vm1314_vm13, %v4158_v3, %v1313_v27  ;;  %vm1323_vm5 = vcmp.eq.f32.partialorder %v4192_v59, 0.0  ;;  %1244 = vst [vmem:[#allocation5 + $0x18] sm:$0xff] %v4246_v12  ;;  %v1324_v13 = vand.u32 2147483648, %v4192_v59  ;;  %v1114_v49 = vmul.f32 0.1, %v994_v43 }
 0x24b   : > { %v1403_v9 = vadd.f32 1e-08, %v1387_v14  ;;  %v1318_v42 = vsel %vm1316_vm14, %v1317_v35, %v1315_v18  ;;  %v1299_v23 = vmul.f32 %v3513_v20, %v4175_v24  ;;  %v1178_v46 = vmul.f32 %v994_v43, %v994_v43 }
 0x24c   : > { %v1392_v44 = vmul.f32 %v4127_v39, %v1318_v42  ;;  %v995_v38 = vmul.f32 0.001953125, %v959_v29  ;;  %v1117_v41 = vmul.f32 0.1, %v997_v0  ;;  %v1181_v52 = vmul.f32 %v997_v0, %v997_v0  ;;  %v1147_v42 = vld [vmem:[#allocation5 + $0x78] sm:$0xff] }
 0x24d   : > { %v3515_v58 = vpop.eup %3514  ;;  %3524 = vrcp.f32 %v1403_v9  ;;  %v1301_v36 = vsel %vm1300_vm15, %v4175_v24, %v1299_v23  ;;  %v4268_v61 = vadd.f32 %v1114_v49, %v4132_v51  ;;  %v1194_v16 = vmul.f32 0.001, %v1178_v46  ;;  %v1088_v23 = vld [vmem:[#allocation4 + $0x78] sm:$0xff] }
 0x24e   : > { %v1408_v3 = vadd.f32 1e-08, %v1392_v44  ;;  %v1304_v35 = vsel %vm1302_vm3, %v1303_v40, %v1301_v36  ;;  %v1320_v57 = vmul.f32 %v3515_v58, %v4192_v59  ;;  %v4272_v37 = vadd.f32 %v1117_v41, %v4142_v45  ;;  %v1152_v36 = vld [vmem:[#allocation5 + $0x60] sm:$0xff] }
 0x24f   : > { %v1390_v63 = vmul.f32 %v4127_v39, %v1304_v35  ;;  %v1197_v29 = vmul.f32 0.001, %v1181_v52  ;;  %vm1307_vm6 = vcmp.eq.f32.partialorder %v4212_v26, inf  ;;  %v1310_v27 = vand.u32 2147483648, %v4212_v26  ;;  %1226 = vst [vmem:[#allocation4 + $0x40] sm:$0xff] %v4268_v61  ;;  %v1086_v41 = vld [vmem:[#allocation4 + $0x60] sm:$0xff] }
 0x250   : > { %v3517_v62 = vpop.eup %3516  ;;  %3526 = vrcp.f32 %v1408_v3  ;;  %v1322_v24 = vsel %vm1321_vm4, %v4192_v59, %v1320_v57  ;;  %v4284_v43 = vadd.f32 %v1194_v16, %v4134_v53  ;;  %1229 = vst [vmem:[#allocation4 + $0x38] sm:$0xff] %v4272_v37  ;;  %v1115_v9 = vmul.f32 0.1, %v995_v38 }
 0x251   : > { %v3519_v51 = vpop.eup %3518  ;;  %v1406_v14 = vadd.f32 1e-08, %v1390_v63  ;;  %v1325_v45 = vsel %vm1323_vm5, %v1324_v13, %v1322_v24  ;;  %v1306_v40 = vmul.f32 %v3517_v62, %v4212_v26  ;;  %v4292_v18 = vadd.f32 %v1197_v29, %v4152_v55  ;;  %v3323_v13 = vpop.f32.mrf.mxu0 }
 0x252   : > { %v4288_v0 = vmul.f32 %v3519_v51, %v4147_v1  ;;  %v1393_v20 = vmul.f32 %v4127_v39, %v1325_v45  ;;  %vm1309_vm7 = vcmp.eq.f32.partialorder %v4212_v26, 0.0  ;;  %1242 = vst [vmem:[#allocation5 + $0x20] sm:$0xff] %v4284_v43  ;;  %v980_v53 = vadd.f32 %v3322_v32, %v4015_v22 }
 0x253   : > { %3528 = vrcp.f32 %v1406_v14  ;;  %v1308_v59 = vsel %vm1307_vm6, %v4212_v26, %v1306_v40  ;;  %v3521_v1 = vpop.eup %3520  ;;  %1245 = vst [vmem:[#allocation5 + $0x58] sm:$0xff] %v4292_v18  ;;  %v1163_v58 = vmul.f32 0.999, %v1147_v42  ;;  %v1257_v26 = vmul.f32 %v4109_v21, %v4102_v50  ;;  %v974_v63 = vpop.f32.mrf.mxu0  ;;  %v1089_v14 = vld [vmem:[#allocation4 + $0x28] sm:$0xff] }
 0x254   : > { %v1409_v44 = vadd.f32 1e-08, %v1393_v20  ;;  %v1311_v49 = vsel %vm1309_vm7, %v1310_v27, %v1308_v59  ;;  %v4300_v55 = vmul.f32 %v3521_v1, %v4168_v30  ;;  %v4306_v22 = vadd.f32 %v1115_v9, %v4154_v11  ;;  %v1153_v1 = vld [vmem:[#allocation5 + $0x50] sm:$0xff] }
 0x255   : > { %v1391_v46 = vmul.f32 %v4127_v39, %v1311_v49  ;;  %v1104_v32 = vmul.f32 0.9, %v1088_v23  ;;  %v1179_v35 = vmul.f32 %v995_v38, %v995_v38  ;;  %v1000_v57 = vmul.f32 0.001953125, %v980_v53 }
 0x256   : > { %3530 = vrcp.f32 %v1409_v44  ;;  %v3523_v52 = vpop.eup %3522  ;;  %v972_v30 = vadd.f32 %v971_v54, %v4019_v25  ;;  %1227 = vst [vmem:[#allocation4 + $0x20] sm:$0xff] %v4306_v22  ;;  %v1168_v29 = vmul.f32 0.999, %v1152_v36  ;;  %v1102_v62 = vmul.f32 0.9, %v1086_v41  ;;  %v1150_v54 = vld [vmem:[#allocation5] sm:$0xff] }
 0x257   : > { %v1407_v3 = vadd.f32 1e-08, %v1391_v46  ;;  %v4309_v16 = vmul.f32 %v3523_v52, %v1257_v26  ;;  %v983_v50 = vadd.f32 %v3323_v13, %v4021_v28  ;;  %v1255_v11 = vmul.f32 %v4109_v21, %v4120_v8 }
 0x258   : > { %v1195_v24 = vmul.f32 0.001, %v1179_v35  ;;  %v1120_v27 = vmul.f32 0.1, %v1000_v57  ;;  %v1184_v38 = vmul.f32 %v1000_v57, %v1000_v57  ;;  %v998_v25 = vmul.f32 0.001953125, %v972_v30 }
 0x259   : > { %3532 = vrcp.f32 %v1407_v3  ;;  %v975_v45 = vadd.f32 %v974_v63, %v4026_v33  ;;  %v1001_v9 = vmul.f32 0.001953125, %v983_v50  ;;  %v1260_v8 = vmul.f32 %v4109_v21, %v4140_v2 }
 0x25a   : > { %v3525_v51 = vpop.eup %3524  ;;  %3534 = vrsqrt.f32 %v4292_v18  ;;  %v4319_v20 = vadd.f32 %v1195_v24, %v1163_v58  ;;  %v4321_v28 = vadd.f32 %v1120_v27, %v1104_v32  ;;  %v1200_v42 = vmul.f32 0.001, %v1184_v38  ;;  %v1087_v58 = vld [vmem:[#allocation4 + $0x70] sm:$0xff]  ;;  %v1151_v24 = vld [vmem:[#allocation5 + $0x8] sm:$0xff] }
 0x25b   : > { %v4317_v40 = vmul.f32 %v3525_v51, %v1255_v11  ;;  %v1118_v59 = vmul.f32 0.1, %v998_v25  ;;  %v1182_v53 = vmul.f32 %v998_v25, %v998_v25  ;;  %3536 = vrsqrt.f32 %v4246_v12 }
 0x25c   : > { %1243 = vst [vmem:[#allocation5 + $0x78] sm:$0xff] %v4319_v20  ;;  %1232 = vst [vmem:[#allocation4 + $0x78] sm:$0xff] %v4321_v28  ;;  %v1166_v33 = vmul.f32 0.999, %v1150_v54  ;;  %v1105_v13 = vmul.f32 0.9, %v1089_v14  ;;  %v1258_v49 = vmul.f32 %v4109_v21, %v4161_v5  ;;  %v4332_v46 = vadd.f32 %v1200_v42, %v1168_v29 }
 0x25d   : > { %v3527_v23 = vpop.eup %3526  ;;  %v999_v2 = vmul.f32 0.001953125, %v975_v45  ;;  %3538 = vrsqrt.f32 %v4319_v20  ;;  %v4335_v36 = vadd.f32 %v1118_v59, %v1102_v62  ;;  %v1198_v41 = vmul.f32 0.001, %v1182_v53 }
 0x25e   : > { %v4328_v44 = vmul.f32 %v3527_v23, %v1260_v8  ;;  %v1121_v26 = vmul.f32 0.1, %v1001_v9  ;;  %1248 = vst [vmem:[#allocation5 + $0x60] sm:$0xff] %v4332_v46  ;;  %3540 = vrsqrt.f32 %v4332_v46  ;;  %v1169_v52 = vmul.f32 0.999, %v1153_v1 }
 0x25f   : > { %3542 = vrsqrt.f32 %v4284_v43  ;;  %v4342_v5 = vadd.f32 %v1198_v41, %v1166_v33  ;;  %1230 = vst [vmem:[#allocation4 + $0x60] sm:$0xff] %v4335_v36  ;;  %v1103_v35 = vmul.f32 0.9, %v1087_v58  ;;  %v1261_v57 = vmul.f32 %v4109_v21, %v4178_v10 }
 0x260   : > { %v3529_v32 = vpop.eup %3528  ;;  %v4347_v30 = vadd.f32 %v1121_v26, %v1105_v13  ;;  %v1185_v63 = vmul.f32 %v1001_v9, %v1001_v9  ;;  %v1119_v29 = vmul.f32 0.1, %v999_v2  ;;  %v1259_v27 = vmul.f32 %v4109_v21, %v4195_v47 }
 0x261   : > { %v4339_v3 = vmul.f32 %v3529_v32, %v1258_v49  ;;  %1246 = vst [vmem:[#allocation5] sm:$0xff] %v4342_v5  ;;  %3544 = vrsqrt.f32 %v4342_v5  ;;  %v1183_v25 = vmul.f32 %v999_v2, %v999_v2  ;;  %v1167_v45 = vmul.f32 0.999, %v1151_v24 }
 0x262   : > { %v1201_v11 = vmul.f32 0.001, %v1185_v63  ;;  %1233 = vst [vmem:[#allocation4 + $0x28] sm:$0xff] %v4347_v30  ;;  %v4356_v51 = vadd.f32 %v1119_v29, %v1103_v35  ;;  %vm1342_vm8 = vcmp.eq.f32.partialorder %v4246_v12, inf  ;;  %vm1349_vm9 = vcmp.eq.f32.partialorder %v4292_v18, inf }
 0x263   : > { %v3531_v62 = vpop.eup %3530  ;;  %v1199_v9 = vmul.f32 0.001, %v1183_v25  ;;  %vm1351_vm10 = vcmp.eq.f32.partialorder %v4292_v18, 0.0  ;;  %vm1370_vm11 = vcmp.eq.f32.partialorder %v4332_v46, inf  ;;  %v1373_v49 = vand.u32 2147483648, %v4332_v46 }
 0x264   : > { %v4351_v50 = vmul.f32 %v3531_v62, %v1261_v57  ;;  %v4358_v38 = vadd.f32 %v1201_v11, %v1169_v52  ;;  %1231 = vst [vmem:[#allocation4 + $0x70] sm:$0xff] %v4356_v51  ;;  %v1352_v58 = vand.u32 2147483648, %v4292_v18  ;;  %vm1372_vm12 = vcmp.eq.f32.partialorder %v4332_v46, 0.0 }
 0x265   : > { %v4366_v42 = vadd.f32 %v1199_v9, %v1167_v45  ;;  %vm1356_vm13 = vcmp.eq.f32.partialorder %v4342_v5, inf  ;;  %v1345_v62 = vand.u32 2147483648, %v4246_v12  ;;  %vm1335_vm14 = vcmp.eq.f32.partialorder %v4319_v20, inf }
 0x266   : > { %v3533_v10 = vpop.eup %3532  ;;  %1249 = vst [vmem:[#allocation5 + $0x50] sm:$0xff] %v4358_v38  ;;  %3546 = vrsqrt.f32 %v4358_v38  ;;  %vm1358_vm15 = vcmp.eq.f32.partialorder %v4342_v5, 0.0  ;;  %vm1344_vm3 = vcmp.eq.f32.partialorder %v4246_v12, 0.0  ;;  %vm1328_vm4 = vcmp.eq.f32.partialorder %v4284_v43, inf }
 0x267   : > { %v3535_v54 = vpop.eup %3534  ;;  %v4360_v14 = vmul.f32 %v3533_v10, %v1259_v27  ;;  %1247 = vst [vmem:[#allocation5 + $0x8] sm:$0xff] %v4366_v42  ;;  %3548 = vrsqrt.f32 %v4366_v42  ;;  %vm1337_vm5 = vcmp.eq.f32.partialorder %v4319_v20, 0.0  ;;  %vm1377_vm6 = vcmp.eq.f32.partialorder %v4358_v38, inf }
 0x268   : > { %v3537_v8 = vpop.eup %3536  ;;  %v1348_v47 = vmul.f32 %v3535_v54, %v4292_v18  ;;  %v1338_v54 = vand.u32 2147483648, %v4319_v20  ;;  %vm1379_vm7 = vcmp.eq.f32.partialorder %v4358_v38, 0.0 }
 0x269   : > { %v1341_v23 = vmul.f32 %v3537_v8, %v4246_v12 }
 0x26a   : > { %v3539_v59 = vpop.eup %3538  ;;  %v1350_v1 = vsel %vm1349_vm9, %v4292_v18, %v1348_v47  ;;  %v1359_v18 = vand.u32 2147483648, %v4342_v5  ;;  %v1380_v47 = vand.u32 2147483648, %v4358_v38  ;;  %vm1363_vm9 = vcmp.eq.f32.partialorder %v4366_v42, inf }
 0x26b   : > { %v3541_v53 = vpop.eup %3540  ;;  %v1334_v41 = vmul.f32 %v3539_v59, %v4319_v20  ;;  %v1343_v32 = vsel %vm1342_vm8, %v4246_v12, %v1341_v23  ;;  %v1353_v63 = vsel %vm1351_vm10, %v1352_v58, %v1350_v1  ;;  %vm1330_vm8 = vcmp.eq.f32.partialorder %v4284_v43, 0.0 }
 0x26c   : > { %v3543_v33 = vpop.eup %3542  ;;  %v1369_v13 = vmul.f32 %v3541_v53, %v4332_v46  ;;  %v1346_v10 = vsel %vm1344_vm3, %v1345_v62, %v1343_v32  ;;  %v1397_v25 = vmul.f32 %v4127_v39, %v1353_v63  ;;  %v1331_v53 = vand.u32 2147483648, %v4284_v43 }
 0x26d   : > { %v1327_v52 = vmul.f32 %v3543_v33, %v4284_v43  ;;  %v1336_v11 = vsel %vm1335_vm14, %v4319_v20, %v1334_v41  ;;  %v1396_v59 = vmul.f32 %v4127_v39, %v1346_v10  ;;  %vm1365_vm10 = vcmp.eq.f32.partialorder %v4366_v42, 0.0 }
 0x26e   : > { %v3545_v2 = vpop.eup %3544  ;;  %v1371_v26 = vsel %vm1370_vm11, %v4332_v46, %v1369_v13  ;;  %v1339_v8 = vsel %vm1337_vm5, %v1338_v54, %v1336_v11  ;;  %v1413_v20 = vadd.f32 1e-08, %v1397_v25  ;;  %v1266_v54 = vmul.f32 %v4109_v21, %v4335_v36 }
 0x26f   : > { %v1374_v35 = vsel %vm1372_vm12, %v1373_v49, %v1371_v26  ;;  %v1355_v57 = vmul.f32 %v3545_v2, %v4342_v5  ;;  %v1329_v45 = vsel %vm1328_vm4, %v4284_v43, %v1327_v52  ;;  %v1395_v49 = vmul.f32 %v4127_v39, %v1339_v8 }
 0x270   : > { %v1400_v29 = vmul.f32 %v4127_v39, %v1374_v35  ;;  %v1332_v1 = vsel %vm1330_vm8, %v1331_v53, %v1329_v45  ;;  %v1412_v26 = vadd.f32 1e-08, %v1396_v59  ;;  %v1267_v36 = vmul.f32 %v4109_v21, %v4356_v51  ;;  %v3636_v51 = vld [vmem:[%s5675_s4 + $0x58] sm:$0xff] }
 0x271   : > { %v1357_v46 = vsel %vm1356_vm13, %v4342_v5, %v1355_v57  ;;  %v1394_v43 = vmul.f32 %v4127_v39, %v1332_v1  ;;  %v1411_v35 = vadd.f32 1e-08, %v1395_v49 }
 0x272   : > { %v1360_v24 = vsel %vm1358_vm15, %v1359_v18, %v1357_v46  ;;  %v1416_v9 = vadd.f32 1e-08, %v1400_v29  ;;  %v1268_v46 = vmul.f32 %v4109_v21, %v4321_v28  ;;  %v3634_v28 = vld [vmem:[%s5675_s4 + $0x78] sm:$0xff] }
 0x273   : > { %v3547_v27 = vpop.eup %3546  ;;  %v1398_v12 = vmul.f32 %v4127_v39, %v1360_v24  ;;  %v1410_v29 = vadd.f32 1e-08, %v1394_v43  ;;  %v3640_v43 = vld [vmem:[%s5675_s4 + $0x48] sm:$0xff] }
 0x274   : > { %v1376_v5 = vmul.f32 %v3547_v27, %v4358_v38  ;;  %v3549_v13 = vpop.eup %3548  ;;  %3550 = vrcp.f32 %v1416_v9 }
 0x275   : > { %v1414_v58 = vadd.f32 1e-08, %v1398_v12  ;;  %v1362_v41 = vmul.f32 %v3549_v13, %v4366_v42  ;;  %3552 = vrcp.f32 %v1413_v20  ;;  %v1263_v20 = vmul.f32 %v4109_v21, %v4306_v22  ;;  %v3637_v22 = vld [vmem:[%s5675_s4 + $0x60] sm:$0xff] }
 0x276   : > { %v1378_v23 = vsel %vm1377_vm6, %v4358_v38, %v1376_v5  ;;  %v1366_v38 = vand.u32 2147483648, %v4366_v42 }
 0x277   : > { %v1381_v33 = vsel %vm1379_vm7, %v1380_v47, %v1378_v23  ;;  %v1364_v52 = vsel %vm1363_vm9, %v4366_v42, %v1362_v41  ;;  %v1269_v42 = vmul.f32 %v4109_v21, %v4347_v30  ;;  %v3635_v30 = vld [vmem:[%s5675_s4 + $0x70] sm:$0xff] }
 0x278   : > { %v1401_v2 = vmul.f32 %v4127_v39, %v1381_v33  ;;  %v1367_v57 = vsel %vm1365_vm10, %v1366_v38, %v1364_v52 }
 0x279   : > { %v1399_v63 = vmul.f32 %v4127_v39, %v1367_v57  ;;  %v1265_v39 = vmul.f32 %v4109_v21, %v4272_v37  ;;  %v1264_v37 = vmul.f32 %v4109_v21, %v4218_v56  ;;  %v1262_v56 = vmul.f32 %v4109_v21, %v4268_v61  ;;  %v3638_v21 = vld [vmem:[%s5675_s4 + $0x68] sm:$0xff] }
 0x27a   : > { %v1417_v32 = vadd.f32 1e-08, %v1401_v2 }
 0x27b   : > { %v1415_v18 = vadd.f32 1e-08, %v1399_v63 }
 0x27c   : > { %3554 = vrcp.f32 %v1417_v32 }
 0x27d   : > { %3556 = vrcp.f32 %v1414_v58 }
 0x27e   : > { %3558 = vrcp.f32 %v1412_v26  ;;  %v3639_v26 = vld [vmem:[%s5675_s4 + $0x50] sm:$0xff] }
 0x27f   : > { %3560 = vrcp.f32 %v1411_v35  ;;  %v3641_v35 = vld [vmem:[%s5675_s4 + $0x40] sm:$0xff] }
 0x280   : > { %3562 = vrcp.f32 %v1415_v18 }
 0x281   : > { %3564 = vrcp.f32 %v1410_v29  ;;  %v3551_v62 = vpop.eup %3550  ;;  %v3642_v29 = vld [vmem:[%s5675_s4 + $0x38] sm:$0xff] }
 0x282   : > { %v3553_v11 = vpop.eup %3552  ;;  %v1447_v24 = vmul.f32 %v3551_v62, %v1268_v46  ;;  %v4496_v18 = vsub.f32 %v3642_v29, %v4351_v50  ;;  %v3643_v62 = vld [vmem:[%s5675_s4 + $0x30] sm:$0xff] }
 0x283   : > { %v1441_v9 = vmul.f32 %v3553_v11, %v1265_v39  ;;  %v4504_v46 = vsub.f32 %v3643_v62, %v4328_v44  ;;  %v3644_v11 = vld [vmem:[%s5675_s4 + $0x28] sm:$0xff]  ;;  %v3645_v44 = vld [vmem:[%s5675_s4 + $0x20] sm:$0xff]  ;;  %v1899_v29 = vld [vmem:[#allocation5 + $0x70] sm:$0xff] }
 0x284   : > { %v4433_v8 = vsub.f32 %v3635_v30, %v1447_v24  ;;  %v4514_v24 = vsub.f32 %v3644_v11, %v4360_v14  ;;  %v1833_v62 = vld [vmem:[#allocation4 + $0x50] sm:$0xff] }
 0x285   : > { %v4451_v1 = vsub.f32 %v3636_v51, %v1441_v9  ;;  %v1539_v50 = vpack.c.bf16 %v4496_v18, %v4504_v46 }
 0x286   : > { %5706 = vst [vmem:[#allocation11_spill] sm:$0xff] %v4433_v8  ;;  %5713 = vst [vmem:[#allocation18_spill] sm:$0xff] %v4514_v24 }
 0x287   : > { %5707 = vst [vmem:[#allocation12_spill] sm:$0xff] %v4451_v1 }
 0x289   : > { %v3555_v27 = vpop.eup %3554 }
 0x28a   : > { %v3557_v10 = vpop.eup %3556  ;;  %v1449_v25 = vmul.f32 %v3555_v27, %v1269_v42  ;;  %v4522_v42 = vsub.f32 %v3645_v44, %v4339_v3  ;;  %v3646_v27 = vld [vmem:[%s5675_s4 + $0x18] sm:$0xff]  ;;  %v3647_v3 = vld [vmem:[%s5675_s4 + $0x10] sm:$0xff] }
 0x28b   : > { %v3559_v45 = vpop.eup %3558  ;;  %v1443_v47 = vmul.f32 %v3557_v10, %v1266_v54  ;;  %v4532_v10 = vsub.f32 %v3646_v27, %v4309_v16  ;;  %v4540_v39 = vsub.f32 %v3647_v3, %v4288_v0  ;;  %v3649_v0 = vld [vmem:[%s5675_s4] sm:$0xff] }
 0x28c   : > { %v4428_v5 = vsub.f32 %v3634_v28, %v1449_v25  ;;  %v3561_v12 = vpop.eup %3560  ;;  %v1439_v23 = vmul.f32 %v3559_v45, %v1264_v37  ;;  %5714 = vst [vmem:[#allocation19_spill] sm:$0xff] %v4522_v42  ;;  %v1538_v14 = vpack.c.bf16 %v4514_v24, %v4522_v42  ;;  %v3648_v25 = vld [vmem:[%s5675_s4 + $0x8] sm:$0xff]  ;;  %v4558_v45 = vsub.f32 %v3649_v0, %v4300_v55 }
 0x28d   : > { %v3563_v59 = vpop.eup %3562  ;;  %v1437_v49 = vmul.f32 %v3561_v12, %v1263_v20  ;;  %v4457_v2 = vsub.f32 %v3637_v22, %v1443_v47  ;;  %5715 = vst [vmem:[#allocation20_spill] sm:$0xff] %v4540_v39  ;;  %v1537_v16 = vpack.c.bf16 %v4532_v10, %v4540_v39  ;;  %v4550_v54 = vsub.f32 %v3648_v25, %v4317_v40  ;;  %v1893_v22 = vld [vmem:[#allocation5 + $0x28] sm:$0xff] }
 0x28e   : > { %5705 = vst [vmem:[#allocation10_spill] sm:$0xff] %v4428_v5  ;;  %3410 = vmatpush3.msra.mxu1 %v4428_v5  ;;  %v1543_v53 = vpack.c.bf16 %v4428_v5, %v4433_v8  ;;  %v1445_v33 = vmul.f32 %v3563_v59, %v1267_v36  ;;  %v3565_v13 = vpop.eup %3564  ;;  %v4470_v32 = vsub.f32 %v3639_v26, %v1439_v23  ;;  %5717 = vst [vmem:[#allocation22_spill] sm:$0xff] %v4558_v45  ;;  %v4606_v36 = vld [vmem:[%s4036_s17 + $0x1] sm:$0x1]  ;;  %v4610_v23 = vld [vmem:[#allocation3] sm:$0x1] }
 0x28f   : > { %3411 = vmatprep.subr.mxu1 %v5688_v15  ;;  %5708 = vst [vmem:[#allocation13_spill] sm:$0xff] %v4457_v2  ;;  %v1435_v58 = vmul.f32 %v3565_v13, %v1262_v56  ;;  %v4479_v52 = vsub.f32 %v3640_v43, %v1437_v49  ;;  %5716 = vst [vmem:[#allocation21_spill] sm:$0xff] %v4550_v54  ;;  %v1536_v40 = vpack.c.bf16 %v4550_v54, %v4558_v45  ;;  %v1831_v13 = vld [vmem:[#allocation4 + $0x58] sm:$0xff]  ;;  %v1895_v56 = vld [vmem:[#allocation5 + $0x10] sm:$0xff] }
 0x290   : > { %3377 = vmatprep.subr.bf16.mxu0 %v1543_v53  ;;  %3412 = vmatpush3.msra.mxu1 %v4433_v8  ;;  %v4462_v61 = vsub.f32 %v3638_v21, %v1445_v33  ;;  %5710 = vst [vmem:[#allocation15_spill] sm:$0xff] %v4470_v32  ;;  %v1541_v38 = vpack.c.bf16 %v4451_v1, %v4470_v32  ;;  %v1757_v20 = vmul.f32 8.0, %v4610_v23  ;;  %v2241_v33 = vld [vmem:[#allocation7] sm:$0x1]  ;;  %v1829_v49 = vld [vmem:[#allocation4 + $0x30] sm:$0xff]  ;;  %v1832_v21 = vld [vmem:[#allocation4 + $0x18] sm:$0xff] }
 0x291   : > { %3378 = vmatpush3.bf16.msra.mxu0 %v1543_v53  ;;  %3413 = vmatprep.subr.mxu1 %v5688_v15  ;;  %5711 = vst [vmem:[#allocation16_spill] sm:$0xff] %v4479_v52  ;;  %v4486_v57 = vsub.f32 %v3641_v35, %v1435_v58  ;;  %v2237_v53 = vld [vmem:[#allocation6] sm:$0x1]  ;;  %v1894_v43 = vld [vmem:[#allocation5 + $0x68] sm:$0xff]  ;;  %v2242_v35 = vmul.f32 0.999, %v2241_v33  ;;  %v4615_v11 = vrot.slane %v4606_v36, %v3849_v7 }
 0x292   : > { %5709 = vst [vmem:[#allocation14_spill] sm:$0xff] %v4462_v61  ;;  %v1542_v41 = vpack.c.bf16 %v4462_v61, %v4457_v2  ;;  %3414 = vmatpush3.msra.mxu1 %v4462_v61  ;;  %v1896_v26 = vld [vmem:[#allocation5 + $0x40] sm:$0xff]  ;;  %v1847_v27 = vmul.f32 0.9, %v1831_v13  ;;  %v1911_v3 = vmul.f32 0.999, %v1895_v56 }
 0x293   : > { %3415 = vmatprep.subr.mxu1 %v5688_v15  ;;  %5712 = vst [vmem:[#allocation17_spill] sm:$0xff] %v4486_v57  ;;  %v1540_v63 = vpack.c.bf16 %v4479_v52, %v4486_v57  ;;  %v1845_v0 = vmul.f32 0.9, %v1829_v49  ;;  %v1900_v33 = vld [vmem:[#allocation5 + $0x38] sm:$0xff]  ;;  %v4621_v61 = vmul.f32 0.999, %v1896_v26 }
 0x294   : > { %3379 = vmatprep.subr.bf16.mxu0 %v1542_v41  ;;  %3416 = vmatpush3.msra.mxu1 %v4457_v2  ;;  %v4625_v13 = vmul.f32 0.999, %v1894_v43  ;;  %v1898_v49 = vld [vmem:[#allocation5 + $0x30] sm:$0xff] }
 0x295   : > { %3380 = vmatpush3.bf16.msra.mxu0 %v1542_v41  ;;  %3417 = vmatprep.subr.mxu1 %v5688_v15  ;;  %v2238_v41 = vmul.f32 0.9, %v2237_v53  ;;  %v4619_v53 = vmul.f32 0.9, %v1832_v21 }
 0x296   : > { %3381 = vmatprep.subr.bf16.mxu0 %v1541_v38  ;;  %3418 = vmatpush3.msra.mxu1 %v4451_v1  ;;  %v1901_v1 = vld [vmem:[#allocation5 + $0x20] sm:$0xff] }
 0x297   : > { %3419 = vmatprep.subr.mxu1 %v5688_v15 }
 0x298   : > { %3420 = vmatpush3.msra.mxu1 %v4470_v32  ;;  %v1904_v32 = vld [vmem:[#allocation5 + $0x58] sm:$0xff] }
 0x299   : > { %3382 = vmatpush3.bf16.msra.mxu0 %v1541_v38  ;;  %3421 = vmatprep.subr.mxu1 %v5688_v15  ;;  %v1830_v38 = vld [vmem:[#allocation4] sm:$0xff] }
 0x29a   : > { %3383 = vmatprep.subr.bf16.mxu0 %v1540_v63  ;;  %3422 = vmatpush3.msra.mxu1 %v4479_v52  ;;  %v4623_v2 = vmul.f32 0.9, %v1830_v38  ;;  %v4631_v52 = vmul.f32 0.999, %v1899_v29  ;;  %v1837_v29 = vld [vmem:[#allocation4 + $0x40] sm:$0xff] }
 0x29b   : > { %3423 = vmatprep.subr.mxu1 %v5688_v15 }
 0x29c   : > { %3424 = vmatpush3.msra.mxu1 %v4486_v57 }
 0x29d   : > { %3384 = vmatpush3.bf16.msra.mxu0 %v1540_v63  ;;  %3425 = vmatprep.subr.mxu1 %v5688_v15  ;;  %v1835_v63 = vld [vmem:[#allocation4 + $0x8] sm:$0xff] }
 0x29e   : > { %3385 = vmatprep.subr.bf16.mxu0 %v1539_v50  ;;  %3426 = vmatpush3.msra.mxu1 %v4496_v18  ;;  %v4627_v56 = vmul.f32 0.9, %v1835_v63 }
 0x29f   : > { %3427 = vmatprep.subr.mxu1 %v5688_v15 }
 0x2a0   : > { %3428 = vmatpush3.msra.mxu1 %v4504_v46 }
 0x2a1   : > { %3386 = vmatpush3.bf16.msra.mxu0 %v1539_v50  ;;  %3429 = vmatprep.subr.mxu1 %v5688_v15 }
 0x2a2   : > { %3387 = vmatprep.subr.bf16.mxu0 %v1538_v14  ;;  %3430 = vmatpush3.msra.mxu1 %v4514_v24 }
 0x2a3   : > { %3431 = vmatprep.subr.mxu1 %v5688_v15 }
 0x2a4   : > { %3432 = vmatpush3.msra.mxu1 %v4522_v42 }
 0x2a5   : > { %3388 = vmatpush3.bf16.msra.mxu0 %v1538_v14  ;;  %3433 = vmatprep.subr.mxu1 %v5688_v15 }
 0x2a6   : > { %3389 = vmatprep.subr.bf16.mxu0 %v1537_v16  ;;  %3434 = vmatpush3.msra.mxu1 %v4532_v10 }
 0x2a7   : > { %3435 = vmatprep.subr.mxu1 %v5688_v15 }
 0x2a8   : > { %3436 = vmatpush3.msra.mxu1 %v4540_v39 }
 0x2a9   : > { %3390 = vmatpush3.bf16.msra.mxu0 %v1537_v16  ;;  %3437 = vmatprep.subr.mxu1 %v5688_v15  ;;  %v1897_v16 = vld [vmem:[#allocation5 + $0x48] sm:$0xff] }
 0x2aa   : > { %3391 = vmatprep.subr.bf16.mxu0 %v1536_v40  ;;  %3438 = vmatpush3.msra.mxu1 %v4550_v54  ;;  %v1905_v54 = vld [vmem:[#allocation5] sm:$0xff] }
 0x2ab   : > { %3439 = vmatprep.subr.mxu1 %v5688_v15 }
 0x2ac   : > { %3440 = vmatpush3.msra.mxu1 %v4558_v45 }
 0x2ad   : > { %3392 = vmatpush3.bf16.msra.mxu0 %v1536_v40  ;;  %3442 = vmatmul.mubr.f32.vlgmr.msra.gmra.mxu1 %v3972_v48  ;;  %v3363_v48 = vpop.f32.mrf.mxu1  ;;  %v4617_v40 = vmul.f32 0.999, %v1893_v22  ;;  %v1839_v22 = vld [vmem:[#allocation4 + $0x10] sm:$0xff] }
 0x2ae   : > { %3444 = vmatprep.subr.bf16.mxu0 %v5688_v15 }
 0x2af   : > { %v1581_v55 = vpop.f32.mrf.mxu1 }
 0x2b0   : > { %3394 = vmatmul.mubr.bf16.vlgmr.msra.gmra.mxu0 %v3986_v60 }
 0x2b1   : > { %3397 = vmatprep.mubr.bf16.mxu0 %v3995_v4  ;;  %v4579_v9 = vpop.f32.mrf.mxu1 }
 0x2b3   : > { %v4581_v60 = vpop.f32.mrf.mxu1 }
 0x2b5   : > { %v4583_v4 = vpop.f32.mrf.mxu1 }
 0x2b8   : > { %3398 = vmatmul.mubr.bf16.gmra.mxu0 %v3999_v6  ;;  %v4585_v6 = vpop.f32.mrf.mxu1 }
 0x2b9   : > { %3401 = vmatprep.mubr.bf16.mxu0 %v4009_v17 }
 0x2ba   : > { %v4587_v17 = vpop.f32.mrf.mxu1 }
 0x2c0   : > { %3402 = vmatmul.mubr.bf16.gmra.mxu0 %v4013_v19  ;;  %v4589_v19 = vpop.f32.mrf.mxu1 }
 0x2c1   : > { %3405 = vmatprep.mubr.bf16.mxu0 %v4024_v31 }
 0x2c2   : > { %v4591_v31 = vpop.f32.mrf.mxu1 }
 0x2c8   : > { %3406 = vmatmul.mubr.bf16.gmra.mxu0 %v4028_v34  ;;  %v4593_v34 = vpop.f32.mrf.mxu1 }
 0x2c9   : > { %3460 = vmatprep.mubr.msk.bf16.mxu0 %vm3730_vm2, %v5688_v15 }
 0x2ca   : > { %v4595_v28 = vpop.f32.mrf.mxu1 }
 0x2cc   : > { %v4597_v30 = vpop.f32.mrf.mxu1 }
 0x2ce   : > { %v4599_v12 = vpop.f32.mrf.mxu1 }
 0x2d0   : > { %v4601_v37 = vpop.f32.mrf.mxu1 }
 0x2d2   : > { %v4603_v47 = vpop.f32.mrf.mxu1 }
 0x2d4   : > { %v4608_v59 = vpop.f32.mrf.mxu1 }
 0x36d   : > { %v1824_v51 = vpop.f32.mrf.mxu1 }
 0x36e   : > { %v1825_v58 = vadd.f32 %v1824_v51, %v1757_v20  ;;  %v1836_v20 = vld [vmem:[#allocation4 + $0x48] sm:$0xff] }
 0x36f   : > { %v3443_v50 = vpop.f32.mrf.mxu1 }
 0x370   : > { %v1828_v44 = vmul.f32 0.001953125, %v1825_v58  ;;  %v3395_v14 = vpop.f32.mrf.mxu0 }
 0x371   : > { %v1687_v25 = vadd.f32 %v3395_v14, %v3363_v48  ;;  %v1834_v48 = vld [vmem:[#allocation4 + $0x68] sm:$0xff] }
 0x372   : > { %v2239_v51 = vmul.f32 0.1, %v1828_v44  ;;  %v2243_v15 = vmul.f32 %v1828_v44, %v1828_v44  ;;  %v1678_v50 = vpop.f32.mrf.mxu0  ;;  %v4633_v44 = vmul.f32 0.9, %v1833_v62  ;;  %v1840_v62 = vld [vmem:[#allocation4 + $0x38] sm:$0xff] }
 0x373   : > { %v1743_v58 = vmul.f32 0.001953125, %v1687_v25  ;;  %v1679_v5 = vadd.f32 %v1678_v50, %v1581_v55  ;;  %v4635_v25 = vmul.f32 0.999, %v1897_v16  ;;  %v1903_v55 = vld [vmem:[#allocation5 + $0x18] sm:$0xff] }
 0x374   : > { %v4629_v21 = vadd.f32 %v2239_v51, %v2238_v41  ;;  %v2244_v14 = vmul.f32 0.001, %v2243_v15  ;;  %v3396_v8 = vpop.f32.mrf.mxu0  ;;  %v4641_v51 = vmul.f32 0.9, %v1836_v20  ;;  %v4643_v15 = vmul.f32 0.999, %v1900_v33 }
 0x375   : > { %v1863_v26 = vmul.f32 0.1, %v1743_v58  ;;  %v1927_v38 = vmul.f32 %v1743_v58, %v1743_v58  ;;  %v1741_v57 = vmul.f32 0.001953125, %v1679_v5  ;;  %v1690_v63 = vadd.f32 %v3396_v8, %v4579_v9 }
 0x376   : > { %v4637_v43 = vadd.f32 %v2244_v14, %v2242_v35  ;;  %2246 = vst [vmem:[#allocation6] sm:$0x1] %v4629_v21  ;;  %v1681_v41 = vpop.f32.mrf.mxu0  ;;  %v4649_v8 = vmul.f32 0.9, %v1834_v48  ;;  %v4651_v9 = vmul.f32 0.999, %v1898_v49 }
 0x377   : > { %v4645_v50 = vadd.f32 %v1863_v26, %v1847_v27  ;;  %v1943_v58 = vmul.f32 0.001, %v1927_v38  ;;  %v1861_v5 = vmul.f32 0.1, %v1741_v57  ;;  %v1925_v16 = vmul.f32 %v1741_v57, %v1741_v57  ;;  %v1838_v26 = vld [vmem:[#allocation4 + $0x20] sm:$0xff] }
 0x378   : > { %2247 = vst [vmem:[#allocation7] sm:$0x1] %v4637_v43  ;;  %3566 = vrsqrt.f32 %v4637_v43  ;;  %v3399_v35 = vpop.f32.mrf.mxu0  ;;  %v4653_v20 = vmul.f32 0.9, %v1839_v22  ;;  %v4660_v14 = vmul.f32 0.999, %v1903_v55  ;;  %v1682_v24 = vadd.f32 %v1681_v41, %v4581_v60 }
 0x379   : > { %v4655_v33 = vadd.f32 %v1943_v58, %v1911_v3  ;;  %1975 = vst [vmem:[#allocation4 + $0x58] sm:$0xff] %v4645_v50  ;;  %v4658_v27 = vadd.f32 %v1861_v5, %v1845_v0  ;;  %v1941_v57 = vmul.f32 0.001, %v1925_v16  ;;  %v1744_v38 = vmul.f32 0.001953125, %v1690_v63  ;;  %v1902_v22 = vld [vmem:[#allocation5 + $0x78] sm:$0xff]  ;;  %v1907_v58 = vld [vmem:[#allocation5 + $0x60] sm:$0xff] }
 0x37a   : > { %v1703_v48 = vadd.f32 %v3399_v35, %v4583_v4  ;;  %v1694_v42 = vpop.f32.mrf.mxu0  ;;  %v4664_v49 = vmul.f32 0.9, %v1837_v29  ;;  %v1843_v3 = vld [vmem:[#allocation4 + $0x78] sm:$0xff]  ;;  %v4669_v0 = vmul.f32 0.999, %v1901_v1  ;;  %v1742_v35 = vmul.f32 0.001953125, %v1682_v24 }
 0x37b   : > { %1991 = vst [vmem:[#allocation5 + $0x10] sm:$0xff] %v4655_v33  ;;  %3568 = vrsqrt.f32 %v4655_v33  ;;  %1973 = vst [vmem:[#allocation4 + $0x30] sm:$0xff] %v4658_v27  ;;  %v4671_v55 = vmul.f32 0.9, %v1840_v62  ;;  %v4673_v60 = vmul.f32 0.999, %v1904_v32  ;;  %v4676_v4 = vadd.f32 %v1941_v57, %v4617_v40 }
 0x37c   : > { %v1864_v63 = vmul.f32 0.1, %v1744_v38  ;;  %v1928_v41 = vmul.f32 %v1744_v38, %v1744_v38  ;;  %v3400_v29 = vpop.f32.mrf.mxu0  ;;  %v4678_v5 = vmul.f32 0.9, %v1838_v26  ;;  %v3122_v16 = vld [vmem:[%s4045_s23 + $0x1] sm:$0x1]  ;;  %v1695_v39 = vadd.f32 %v1694_v42, %v4585_v6  ;;  %s2346_s23 = scalar_lea.vmem %s5681_s10, %s3822_s22 }
 0x37d   : > { %v1747_v45 = vmul.f32 0.001953125, %v1703_v48  ;;  %v1706_v1 = vadd.f32 %v3400_v29, %v4587_v17  ;;  %1989 = vst [vmem:[#allocation5 + $0x28] sm:$0xff] %v4676_v4  ;;  %3570 = vrsqrt.f32 %v4676_v4  ;;  %v4685_v32 = vmul.f32 0.999, %v1902_v22  ;;  %v1841_v29 = vld [vmem:[#allocation4 + $0x60] sm:$0xff] }
 0x37e   : > { %v4687_v40 = vmul.f32 0.9, %v1843_v3  ;;  %v4689_v62 = vmul.f32 0.999, %v1907_v58  ;;  %v4692_v57 = vadd.f32 %v1864_v63, %v4619_v53  ;;  %v1944_v26 = vmul.f32 0.001, %v1928_v41 }
 0x37f   : > { %v1862_v24 = vmul.f32 0.1, %v1742_v35  ;;  %v1926_v38 = vmul.f32 %v1742_v35, %v1742_v35  ;;  %v4695_v42 = vrot.slane %v3122_v16, %v3849_v7  ;;  %v1867_v6 = vmul.f32 0.1, %v1747_v45 }
 0x380   : > { %v1931_v17 = vmul.f32 %v1747_v45, %v1747_v45  ;;  %v1745_v48 = vmul.f32 0.001953125, %v1695_v39  ;;  %v4698_v22 = vadd.f32 %v1944_v26, %v4621_v61  ;;  %1976 = vst [vmem:[#allocation4 + $0x18] sm:$0xff] %v4692_v57  ;;  %v1748_v58 = vmul.f32 0.001953125, %v1706_v1 }
 0x381   : > { %v4702_v3 = vadd.f32 %v1862_v24, %v4623_v2  ;;  %v1942_v53 = vmul.f32 0.001, %v1926_v38  ;;  %v4705_v63 = vadd.f32 %v1867_v6, %v4627_v56  ;;  %v4708_v39 = vmul.f32 %v3122_v16, %v4629_v21  ;;  %v1697_v21 = vpop.f32.mrf.mxu0 }
 0x382   : > { %v1947_v7 = vmul.f32 0.001, %v1931_v17  ;;  %v1865_v41 = vmul.f32 0.1, %v1745_v48  ;;  %v1929_v35 = vmul.f32 %v1745_v48, %v1745_v48  ;;  %1992 = vst [vmem:[#allocation5 + $0x40] sm:$0xff] %v4698_v22  ;;  %3572 = vrsqrt.f32 %v4698_v22 }
 0x383   : > { %1974 = vst [vmem:[#allocation4] sm:$0xff] %v4702_v3  ;;  %v4713_v61 = vmul.f32 0.9, %v1841_v29  ;;  %v4715_v2 = vmul.f32 0.999, %v1905_v54  ;;  %vm2251_vm2 = vcmp.eq.f32.partialorder %v4637_v43, inf  ;;  %v4720_v45 = vadd.f32 %v1942_v53, %v4625_v13  ;;  %v3403_v48 = vpop.f32.mrf.mxu0 }
 0x384   : > { %vm2253_vm11 = vcmp.eq.f32.partialorder %v4637_v43, 0.0  ;;  %v4723_v56 = vadd.f32 %v1947_v7, %v4631_v52  ;;  %1979 = vst [vmem:[#allocation4 + $0x8] sm:$0xff] %v4705_v63  ;;  %v4727_v1 = vadd.f32 %v1865_v41, %v4633_v44  ;;  %v1945_v26 = vmul.f32 0.001, %v1929_v35 }
 0x385   : > { %v3567_v16 = vpop.eup %3566  ;;  %v1868_v54 = vmul.f32 0.1, %v1748_v58  ;;  %v1932_v24 = vmul.f32 %v1748_v58, %v1748_v58  ;;  %v2254_v6 = vand.u32 2147483648, %v4637_v43  ;;  %v4733_v13 = vmul.f32 %v4695_v42, %v4645_v50  ;;  %1990 = vst [vmem:[#allocation5 + $0x68] sm:$0xff] %v4720_v45 }
 0x386   : > { %v2250_v38 = vmul.f32 %v3567_v16, %v4637_v43  ;;  %3574 = vrsqrt.f32 %v4720_v45  ;;  %1995 = vst [vmem:[#allocation5 + $0x70] sm:$0xff] %v4723_v56  ;;  %vm2041_vm12 = vcmp.eq.f32.partialorder %v4655_v33, inf  ;;  %vm2043_vm13 = vcmp.eq.f32.partialorder %v4655_v33, 0.0  ;;  %1977 = vst [vmem:[#allocation4 + $0x50] sm:$0xff] %v4727_v1 }
 0x387   : > { %v2044_v52 = vand.u32 2147483648, %v4655_v33  ;;  %3576 = vrsqrt.f32 %v4723_v56  ;;  %vm2027_vm14 = vcmp.eq.f32.partialorder %v4676_v4, inf  ;;  %vm2029_vm15 = vcmp.eq.f32.partialorder %v4676_v4, 0.0 }
 0x388   : > { %v3569_v44 = vpop.eup %3568  ;;  %v2252_v50 = vsel %vm2251_vm2, %v4637_v43, %v2250_v38  ;;  %v4749_v17 = vadd.f32 %v1945_v26, %v4635_v25  ;;  %v4755_v58 = vadd.f32 %v1868_v54, %v4641_v51  ;;  %v1948_v7 = vmul.f32 0.001, %v1932_v24  ;;  %v1710_v38 = vpop.f32.mrf.mxu0 }
 0x389   : > { %v2255_v29 = vsel %vm2253_vm11, %v2254_v6, %v2252_v50  ;;  %v2040_v53 = vmul.f32 %v3569_v44, %v4655_v33  ;;  %v2030_v35 = vand.u32 2147483648, %v4676_v4  ;;  %vm2048_vm3 = vcmp.eq.f32.partialorder %v4698_v22, inf }
 0x38a   : > { %v2256_v41 = vmul.f32 %v4606_v36, %v2255_v29  ;;  %1993 = vst [vmem:[#allocation5 + $0x48] sm:$0xff] %v4749_v17  ;;  %3578 = vrsqrt.f32 %v4749_v17  ;;  %v3571_v25 = vpop.eup %3570  ;;  %vm2050_vm4 = vcmp.eq.f32.partialorder %v4698_v22, 0.0  ;;  %v2051_v51 = vand.u32 2147483648, %v4698_v22  ;;  %1980 = vst [vmem:[#allocation4 + $0x48] sm:$0xff] %v4755_v58 }
 0x38b   : > { %v2042_v43 = vsel %vm2041_vm12, %v4655_v33, %v2040_v53  ;;  %v4768_v16 = vadd.f32 %v1948_v7, %v4643_v15  ;;  %v2026_v54 = vmul.f32 %v3571_v25, %v4676_v4  ;;  %v1698_v24 = vadd.f32 %v1697_v21, %v4589_v19 }
 0x38c   : > { %v2257_v36 = vadd.f32 1e-08, %v2256_v41  ;;  %v2045_v26 = vsel %vm2043_vm13, %v2044_v52, %v2042_v43  ;;  %vm2034_vm5 = vcmp.eq.f32.partialorder %v4720_v45, inf  ;;  %v2037_v44 = vand.u32 2147483648, %v4720_v45 }
 0x38d   : > { %v2143_v6 = vmul.f32 %v4615_v11, %v2045_v26  ;;  %1996 = vst [vmem:[#allocation5 + $0x38] sm:$0xff] %v4768_v16  ;;  %3580 = vrsqrt.f32 %v4768_v16  ;;  %v2028_v15 = vsel %vm2027_vm14, %v4676_v4, %v2026_v54  ;;  %vm2036_vm6 = vcmp.eq.f32.partialorder %v4720_v45, 0.0 }
 0x38e   : > { %3582 = vrcp.f32 %v2257_v36  ;;  %vm2069_vm7 = vcmp.eq.f32.partialorder %v4723_v56, inf  ;;  %v1746_v19 = vmul.f32 0.001953125, %v1698_v24  ;;  %v2031_v21 = vsel %vm2029_vm15, %v2030_v35, %v2028_v15 }
 0x38f   : > { %v2159_v33 = vadd.f32 1e-08, %v2143_v6  ;;  %v1719_v52 = vadd.f32 %v3403_v48, %v4591_v31  ;;  %v1711_v50 = vadd.f32 %v1710_v38, %v4593_v34  ;;  %v3573_v29 = vpop.eup %3572  ;;  %v2141_v53 = vmul.f32 %v4615_v11, %v2031_v21  ;;  %v3404_v38 = vpop.f32.mrf.mxu0 }
 0x390   : > { %vm2071_vm8 = vcmp.eq.f32.partialorder %v4723_v56, 0.0  ;;  %v1866_v7 = vmul.f32 0.1, %v1746_v19  ;;  %v1930_v41 = vmul.f32 %v1746_v19, %v1746_v19  ;;  %v2047_v25 = vmul.f32 %v3573_v29, %v4698_v22 }
 0x391   : > { %3584 = vrcp.f32 %v2159_v33  ;;  %v1751_v43 = vmul.f32 0.001953125, %v1719_v52  ;;  %v1749_v36 = vmul.f32 0.001953125, %v1711_v50  ;;  %v2157_v26 = vadd.f32 1e-08, %v2141_v53 }
 0x392   : > { %v2072_v4 = vand.u32 2147483648, %v4723_v56  ;;  %v4794_v35 = vadd.f32 %v1866_v7, %v4649_v8  ;;  %v1946_v31 = vmul.f32 0.001, %v1930_v41  ;;  %v2049_v48 = vsel %vm2048_vm3, %v4698_v22, %v2047_v25 }
 0x393   : > { %v3575_v34 = vpop.eup %3574  ;;  %vm2055_vm9 = vcmp.eq.f32.partialorder %v4749_v17, inf  ;;  %v1871_v54 = vmul.f32 0.1, %v1751_v43  ;;  %v1935_v24 = vmul.f32 %v1751_v43, %v1751_v43  ;;  %3586 = vrcp.f32 %v2157_v26  ;;  %v1713_v26 = vpop.f32.mrf.mxu0 }
 0x394   : > { %v3577_v6 = vpop.eup %3576  ;;  %v2052_v15 = vsel %vm2050_vm4, %v2051_v51, %v2049_v48  ;;  %v2033_v19 = vmul.f32 %v3575_v34, %v4720_v45  ;;  %v4804_v8 = vadd.f32 %v1946_v31, %v4651_v9  ;;  %1978 = vst [vmem:[#allocation4 + $0x68] sm:$0xff] %v4794_v35  ;;  %v1869_v50 = vmul.f32 0.1, %v1749_v36 }
 0x395   : > { %v2144_v33 = vmul.f32 %v4615_v11, %v2052_v15  ;;  %v2068_v21 = vmul.f32 %v3577_v6, %v4723_v56  ;;  %v4810_v52 = vadd.f32 %v1871_v54, %v4653_v20  ;;  %vm2057_vm10 = vcmp.eq.f32.partialorder %v4749_v17, 0.0 }
 0x396   : > { %v2035_v22 = vsel %vm2034_vm5, %v4720_v45, %v2033_v19  ;;  %1994 = vst [vmem:[#allocation5 + $0x30] sm:$0xff] %v4804_v8  ;;  %3588 = vrsqrt.f32 %v4804_v8  ;;  %v1722_v9 = vadd.f32 %v3404_v38, %v4595_v28  ;;  %v2058_v7 = vand.u32 2147483648, %v4749_v17 }
 0x397   : > { %v3579_v51 = vpop.eup %3578  ;;  %v2160_v29 = vadd.f32 1e-08, %v2144_v33  ;;  %v2038_v53 = vsel %vm2036_vm6, %v2037_v44, %v2035_v22  ;;  %v2070_v20 = vsel %vm2069_vm7, %v4723_v56, %v2068_v21  ;;  %1983 = vst [vmem:[#allocation4 + $0x10] sm:$0xff] %v4810_v52  ;;  %v1951_v43 = vmul.f32 0.001, %v1935_v24 }
 0x398   : > { %v2142_v41 = vmul.f32 %v4615_v11, %v2038_v53  ;;  %v2073_v25 = vsel %vm2071_vm8, %v2072_v4, %v2070_v20  ;;  %v2054_v28 = vmul.f32 %v3579_v51, %v4749_v17  ;;  %vm2076_vm2 = vcmp.eq.f32.partialorder %v4768_v16, inf }
 0x399   : > { %3590 = vrcp.f32 %v2160_v29  ;;  %v2147_v45 = vmul.f32 %v4615_v11, %v2073_v25  ;;  %v4833_v44 = vadd.f32 %v1869_v50, %v4664_v49  ;;  %v4839_v56 = vadd.f32 %v1951_v43, %v4660_v14 }
 0x39a   : > { %v3581_v31 = vpop.eup %3580  ;;  %v2158_v34 = vadd.f32 1e-08, %v2142_v41  ;;  %v2056_v48 = vsel %vm2055_vm9, %v4749_v17, %v2054_v28  ;;  %v1752_v4 = vmul.f32 0.001953125, %v1722_v9  ;;  %v1933_v49 = vmul.f32 %v1749_v36, %v1749_v36  ;;  %v3407_v36 = vpop.f32.mrf.mxu0  ;;  %v1844_v9 = vld [vmem:[#allocation4 + $0x28] sm:$0xff] }
 0x39b   : > { %v3583_v54 = vpop.eup %3582  ;;  %v2163_v24 = vadd.f32 1e-08, %v2147_v45  ;;  %v2059_v38 = vsel %vm2057_vm10, %v2058_v7, %v2056_v48  ;;  %v2075_v6 = vmul.f32 %v3581_v31, %v4768_v16  ;;  %1981 = vst [vmem:[#allocation4 + $0x40] sm:$0xff] %v4833_v44  ;;  %v2079_v33 = vand.u32 2147483648, %v4768_v16  ;;  %1999 = vst [vmem:[#allocation5 + $0x18] sm:$0xff] %v4839_v56 }
 0x39c   : > { %v2259_v15 = vmul.f32 %v3583_v54, %v4708_v39  ;;  %3592 = vrcp.f32 %v2158_v34  ;;  %v2145_v19 = vmul.f32 %v4615_v11, %v2059_v38  ;;  %v2009_v14 = vmul.f32 %v4695_v42, %v4658_v27 }
 0x39d   : > { %3594 = vrcp.f32 %v2163_v24  ;;  %v2077_v17 = vsel %vm2076_vm2, %v4768_v16, %v2075_v6  ;;  %vm2078_vm11 = vcmp.eq.f32.partialorder %v4768_v16, 0.0  ;;  %v1949_v29 = vmul.f32 0.001, %v1933_v49 }
 0x39e   : > { %v3585_v21 = vpop.eup %3584  ;;  %v2260_v39 = vsub.f32 %v4610_v23, %v2259_v15  ;;  %v2161_v50 = vadd.f32 1e-08, %v2145_v19  ;;  %v2080_v22 = vsel %vm2078_vm11, %v2079_v33, %v2077_v17  ;;  %3596 = vrsqrt.f32 %v4839_v56 }
 0x39f   : > { %v4858_v51 = vmul.f32 %v3585_v21, %v4733_v13  ;;  %v2148_v27 = vmul.f32 %v4615_v11, %v2080_v22  ;;  %v1872_v53 = vmul.f32 0.1, %v1752_v4  ;;  %v1936_v20 = vmul.f32 %v1752_v4, %v1752_v4  ;;  %v1726_v13 = vpop.f32.mrf.mxu0 }
 0x3a0   : > { %2261 = vst [vmem:[#allocation3] sm:$0x1] %v2260_v39  ;;  %3598 = vrcp.f32 %v2161_v50  ;;  %v1714_v16 = vadd.f32 %v1713_v26, %v4597_v30  ;;  %v1735_v7 = vadd.f32 %v3407_v36, %v4599_v12  ;;  %v3587_v23 = vpop.eup %3586  ;;  %v4864_v25 = vadd.f32 %v1949_v29, %v4669_v0  ;;  %v1908_v0 = vld [vmem:[#allocation5 + $0x50] sm:$0xff] }
 0x3a1   : > { %v2164_v41 = vadd.f32 1e-08, %v2148_v27  ;;  %v4867_v28 = vadd.f32 %v1872_v53, %v4671_v55  ;;  %v4869_v43 = vmul.f32 0.9, %v1844_v9  ;;  %v4871_v45 = vmul.f32 %v3587_v23, %v2009_v14  ;;  %v3408_v49 = vpop.f32.mrf.mxu0  ;;  %v1906_v14 = vld [vmem:[#allocation5 + $0x8] sm:$0xff] }
 0x3a2   : > { %v1952_v31 = vmul.f32 0.001, %v1936_v20  ;;  %v1750_v34 = vmul.f32 0.001953125, %v1714_v16  ;;  %v1755_v48 = vmul.f32 0.001953125, %v1735_v7  ;;  %v2012_v30 = vmul.f32 %v4695_v42, %v4692_v57  ;;  %1997 = vst [vmem:[#allocation5 + $0x20] sm:$0xff] %v4864_v25 }
 0x3a3   : > { %v3589_v4 = vpop.eup %3588  ;;  %3600 = vrcp.f32 %v2164_v41  ;;  %vm2062_vm12 = vcmp.eq.f32.partialorder %v4804_v8, inf  ;;  %v2065_v12 = vand.u32 2147483648, %v4804_v8  ;;  %1984 = vst [vmem:[#allocation4 + $0x38] sm:$0xff] %v4867_v28  ;;  %v1727_v54 = vadd.f32 %v1726_v13, %v4601_v37  ;;  %v1729_v53 = vpop.f32.mrf.mxu0 }
 0x3a4   : > { %v2061_v55 = vmul.f32 %v3589_v4, %v4804_v8  ;;  %3602 = vrsqrt.f32 %v4864_v25  ;;  %v4882_v26 = vadd.f32 %v1952_v31, %v4673_v60  ;;  %v1870_v57 = vmul.f32 0.1, %v1750_v34  ;;  %v1842_v60 = vld [vmem:[#allocation4 + $0x70] sm:$0xff] }
 0x3a5   : > { %v1934_v24 = vmul.f32 %v1750_v34, %v1750_v34  ;;  %v1875_v38 = vmul.f32 0.1, %v1755_v48  ;;  %v1939_v6 = vmul.f32 %v1755_v48, %v1755_v48  ;;  %vm2064_vm13 = vcmp.eq.f32.partialorder %v4804_v8, 0.0 }
 0x3a6   : > { %v3591_v15 = vpop.eup %3590  ;;  %v2063_v19 = vsel %vm2062_vm12, %v4804_v8, %v2061_v55  ;;  %2000 = vst [vmem:[#allocation5 + $0x58] sm:$0xff] %v4882_v26  ;;  %3604 = vrsqrt.f32 %v4882_v26  ;;  %v4889_v33 = vmul.f32 0.999, %v1908_v0  ;;  %v2010_v37 = vmul.f32 %v4695_v42, %v4702_v3 }
 0x3a7   : > { %v4891_v17 = vmul.f32 %v3591_v15, %v2012_v30  ;;  %v2066_v36 = vsel %vm2064_vm13, %v2065_v12, %v2063_v19  ;;  %v4896_v21 = vadd.f32 %v1870_v57, %v4678_v5  ;;  %v1950_v8 = vmul.f32 0.001, %v1934_v24 }
 0x3a8   : > { %v2146_v39 = vmul.f32 %v4615_v11, %v2066_v36  ;;  %v4900_v50 = vadd.f32 %v1875_v38, %v4687_v40  ;;  %v1955_v22 = vmul.f32 0.001, %v1939_v6  ;;  %v2015_v27 = vmul.f32 %v4695_v42, %v4705_v63 }
 0x3a9   : > { %v3593_v9 = vpop.eup %3592  ;;  %1982 = vst [vmem:[#allocation4 + $0x20] sm:$0xff] %v4896_v21  ;;  %v1753_v29 = vmul.f32 0.001953125, %v1727_v54  ;;  %v1858_v3 = vmul.f32 0.9, %v1842_v60  ;;  %v4905_v20 = vmul.f32 0.999, %v1906_v14  ;;  %v4910_v23 = vadd.f32 %v1950_v8, %v4685_v32 }
 0x3aa   : > { %v3595_v5 = vpop.eup %3594  ;;  %v4907_v16 = vmul.f32 %v3593_v9, %v2010_v37  ;;  %v2162_v7 = vadd.f32 1e-08, %v2146_v39  ;;  %v4913_v40 = vadd.f32 %v1955_v22, %v4689_v62  ;;  %1987 = vst [vmem:[#allocation4 + $0x78] sm:$0xff] %v4900_v50  ;;  %v1738_v34 = vadd.f32 %v3408_v49, %v4603_v47 }
 0x3ab   : > { %v3597_v63 = vpop.eup %3596  ;;  %v4916_v41 = vmul.f32 %v3595_v5, %v2015_v27  ;;  %v1873_v13 = vmul.f32 0.1, %v1753_v29  ;;  %v1937_v31 = vmul.f32 %v1753_v29, %v1753_v29  ;;  %v2013_v48 = vmul.f32 %v4695_v42, %v4727_v1  ;;  %1998 = vst [vmem:[#allocation5 + $0x78] sm:$0xff] %v4910_v23 }
 0x3ac   : > { %3606 = vrcp.f32 %v2162_v7  ;;  %v2096_v4 = vmul.f32 %v3597_v63, %v4839_v56  ;;  %2003 = vst [vmem:[#allocation5 + $0x60] sm:$0xff] %v4913_v40  ;;  %v1730_v32 = vadd.f32 %v1729_v53, %v4608_v59  ;;  %v2016_v30 = vmul.f32 %v4695_v42, %v4755_v58 }
 0x3ad   : > { %v3599_v62 = vpop.eup %3598  ;;  %vm2097_vm14 = vcmp.eq.f32.partialorder %v4839_v56, inf  ;;  %v2100_v47 = vand.u32 2147483648, %v4839_v56  ;;  %3608 = vrsqrt.f32 %v4910_v23  ;;  %vm2099_vm15 = vcmp.eq.f32.partialorder %v4839_v56, 0.0 }
 0x3ae   : > { %v4930_v1 = vmul.f32 %v3599_v62, %v2013_v48  ;;  %v2098_v12 = vsel %vm2097_vm14, %v4839_v56, %v2096_v4  ;;  %3610 = vrsqrt.f32 %v4913_v40  ;;  %v4936_v59 = vadd.f32 %v1873_v13, %v4713_v61 }
 0x3af   : > { %v2101_v0 = vsel %vm2099_vm15, %v2100_v47, %v2098_v12  ;;  %v1953_v55 = vmul.f32 0.001, %v1937_v31  ;;  %v1756_v58 = vmul.f32 0.001953125, %v1738_v34  ;;  %vm2083_vm3 = vcmp.eq.f32.partialorder %v4864_v25, inf  ;;  %v5718_v47 = vld [vmem:[#allocation21_spill] sm:$0xff] }
 0x3b0   : > { %v3601_v54 = vpop.eup %3600  ;;  %v2151_v57 = vmul.f32 %v4615_v11, %v2101_v0  ;;  %vm2085_vm4 = vcmp.eq.f32.partialorder %v4864_v25, 0.0  ;;  %v1754_v24 = vmul.f32 0.001953125, %v1730_v32  ;;  %v2086_v56 = vand.u32 2147483648, %v4864_v25  ;;  %1985 = vst [vmem:[#allocation4 + $0x60] sm:$0xff] %v4936_v59 }
 0x3b1   : > { %v3603_v38 = vpop.eup %3602  ;;  %v2188_v6 = vmul.f32 %v3601_v54, %v2016_v30  ;;  %v4943_v49 = vadd.f32 %v1953_v55, %v4715_v2  ;;  %v1876_v61 = vmul.f32 0.1, %v1756_v58  ;;  %v1940_v60 = vmul.f32 %v1756_v58, %v1756_v58  ;;  %v5719_v55 = vld [vmem:[#allocation20_spill] sm:$0xff]  ;;  %v5720_v58 = vld [vmem:[#allocation22_spill] sm:$0xff] }
 0x3b2   : > { %v2167_v15 = vadd.f32 1e-08, %v2151_v57  ;;  %v2082_v19 = vmul.f32 %v3603_v38, %v4864_v25  ;;  %v1874_v14 = vmul.f32 0.1, %v1754_v24  ;;  %vm2104_vm5 = vcmp.eq.f32.partialorder %v4882_v26, inf  ;;  %v2262_v57 = vld [vmem:[%s3836_s30] sm:$0xff] }
 0x3b3   : > { %v3605_v37 = vpop.eup %3604  ;;  %vm2106_vm6 = vcmp.eq.f32.partialorder %v4882_v26, 0.0  ;;  %v2107_v36 = vand.u32 2147483648, %v4882_v26  ;;  %2001 = vst [vmem:[#allocation5] sm:$0xff] %v4943_v49  ;;  %3612 = vrsqrt.f32 %v4943_v49  ;;  %v4957_v8 = vadd.f32 %v1876_v61, %v4869_v43 }
 0x3b4   : > { %3614 = vrcp.f32 %v2167_v15  ;;  %v2084_v2 = vsel %vm2083_vm3, %v4864_v25, %v2082_v19  ;;  %v2103_v39 = vmul.f32 %v3605_v37, %v4882_v26  ;;  %v1956_v9 = vmul.f32 0.001, %v1940_v60 }
 0x3b5   : > { %v2087_v22 = vsel %vm2085_vm4, %v2086_v56, %v2084_v2  ;;  %v4961_v27 = vadd.f32 %v1874_v14, %v1858_v3  ;;  %v1938_v29 = vmul.f32 %v1754_v24, %v1754_v24  ;;  %1988 = vst [vmem:[#allocation4 + $0x28] sm:$0xff] %v4957_v8  ;;  %v2211_v7 = vsub.f32 %v4504_v46, %v4916_v41 }
 0x3b6   : > { %v2149_v53 = vmul.f32 %v4615_v11, %v2087_v22  ;;  %v2105_v5 = vsel %vm2104_vm5, %v4882_v26, %v2103_v39  ;;  %v2212_v63 = vsub.f32 %v4496_v18, %v2188_v6  ;;  %v2014_v43 = vmul.f32 %v4695_v42, %v4794_v35 }
 0x3b7   : > { %v2108_v25 = vsel %vm2106_vm6, %v2107_v36, %v2105_v5  ;;  %v4974_v3 = vadd.f32 %v1956_v9, %v4889_v33  ;;  %v1954_v13 = vmul.f32 0.001, %v1938_v29  ;;  %1986 = vst [vmem:[#allocation4 + $0x70] sm:$0xff] %v4961_v27  ;;  %vm2090_vm7 = vcmp.eq.f32.partialorder %v4910_v23, inf }
 0x3b8   : > { %v2165_v31 = vadd.f32 1e-08, %v2149_v53  ;;  %v2152_v34 = vmul.f32 %v4615_v11, %v2108_v25  ;;  %v4979_v46 = vpack.c.bf16 %v2212_v63, %v2211_v7  ;;  %vm2092_vm8 = vcmp.eq.f32.partialorder %v4910_v23, 0.0 }
 0x3b9   : > { %v3607_v18 = vpop.eup %3606  ;;  %v2093_v35 = vand.u32 2147483648, %v4910_v23  ;;  %vm2125_vm9 = vcmp.eq.f32.partialorder %v4913_v40, inf  ;;  %2004 = vst [vmem:[#allocation5 + $0x50] sm:$0xff] %v4974_v3  ;;  %3616 = vrsqrt.f32 %v4974_v3  ;;  %v4987_v48 = vadd.f32 %v1954_v13, %v4905_v20 }
 0x3ba   : > { %v3609_v26 = vpop.eup %3608  ;;  %v2184_v33 = vmul.f32 %v3607_v18, %v2014_v43  ;;  %3618 = vrcp.f32 %v2165_v31  ;;  %v2168_v41 = vadd.f32 1e-08, %v2152_v34  ;;  %v2128_v62 = vand.u32 2147483648, %v4913_v40 }
 0x3bb   : > { %v3611_v4 = vpop.eup %3610  ;;  %v2089_v32 = vmul.f32 %v3609_v26, %v4910_v23  ;;  %v2208_v30 = vsub.f32 %v4532_v10, %v4891_v17  ;;  %v2206_v12 = vsub.f32 %v5718_v47, %v4907_v16  ;;  %2002 = vst [vmem:[#allocation5 + $0x8] sm:$0xff] %v4987_v48  ;;  %v2207_v20 = vsub.f32 %v5719_v55, %v4858_v51  ;;  %v5721_v10 = vld [vmem:[#allocation19_spill] sm:$0xff]  ;;  %v5722_v16 = vld [vmem:[#allocation18_spill] sm:$0xff] }
 0x3bc   : > { %3620 = vrcp.f32 %v2168_v41  ;;  %v2124_v0 = vmul.f32 %v3611_v4, %v4913_v40  ;;  %v2205_v54 = vsub.f32 %v5720_v58, %v4871_v45  ;;  %v2209_v17 = vsub.f32 %v5721_v10, %v4930_v1  ;;  %v5723_v41 = vld [vmem:[#allocation15_spill] sm:$0xff]  ;;  %v5726_v10 = vld [vmem:[#allocation16_spill] sm:$0xff] }
 0x3bd   : > { %v2091_v24 = vsel %vm2090_vm7, %v4910_v23, %v2089_v32  ;;  %3622 = vrsqrt.f32 %v4987_v48  ;;  %v2210_v38 = vsub.f32 %v5722_v16, %v2184_v33  ;;  %v5014_v45 = vpack.c.bf16 %v2208_v30, %v2207_v20  ;;  %v5724_v32 = vld [vmem:[#allocation12_spill] sm:$0xff] }
 0x3be   : > { %v2094_v6 = vsel %vm2092_vm8, %v2093_v35, %v2091_v24  ;;  %v2126_v51 = vsel %vm2125_vm9, %v4913_v40, %v2124_v0  ;;  %v5016_v56 = vpack.c.bf16 %v2206_v12, %v2205_v54  ;;  %vm2127_vm10 = vcmp.eq.f32.partialorder %v4913_v40, 0.0 }
 0x3bf   : > { %v2150_v61 = vmul.f32 %v4615_v11, %v2094_v6  ;;  %v5020_v15 = vpack.c.bf16 %v2210_v38, %v2209_v17  ;;  %v5022_v1 = vpack.c.bf16 %v2262_v57, %v2262_v57  ;;  %v2019_v23 = vmul.f32 %v4695_v42, %v4810_v52  ;;  %v5725_v57 = vld [vmem:[#allocation17_spill] sm:$0xff] }
 0x3c0   : > { %v3613_v19 = vpop.eup %3612  ;;  %v2129_v60 = vsel %vm2127_vm10, %v2128_v62, %v2126_v51  ;;  %vm2111_vm2 = vcmp.eq.f32.partialorder %v4943_v49, inf  ;;  %v2114_v40 = vand.u32 2147483648, %v4943_v49  ;;  %vm2113_vm11 = vcmp.eq.f32.partialorder %v4943_v49, 0.0 }
 0x3c1   : > { %v3615_v14 = vpop.eup %3614  ;;  %v2166_v37 = vadd.f32 1e-08, %v2150_v61  ;;  %v2110_v36 = vmul.f32 %v3613_v19, %v4943_v49  ;;  %2350 = vxpose.xlu0.c.b16.start.end [1/1] (short) %v5022_v1, 128  ;;  %v2155_v39 = vmul.f32 %v4615_v11, %v2129_v60  ;;  %v2017_v53 = vmul.f32 %v4695_v42, %v4833_v44 }
 0x3c2   : > { %v2194_v2 = vmul.f32 %v3615_v14, %v2019_v23  ;;  %v2020_v13 = vmul.f32 %v4695_v42, %v4867_v28  ;;  %vm2132_vm12 = vcmp.eq.f32.partialorder %v4974_v3, inf  ;;  %vm2134_vm13 = vcmp.eq.f32.partialorder %v4974_v3, 0.0  ;;  %v5727_v14 = vld [vmem:[#allocation11_spill] sm:$0xff] }
 0x3c3   : > { %3624 = vrcp.f32 %v2166_v37  ;;  %v2112_v22 = vsel %vm2111_vm2, %v4943_v49, %v2110_v36  ;;  %v2171_v7 = vadd.f32 1e-08, %v2155_v39  ;;  %v2135_v49 = vand.u32 2147483648, %v4974_v3  ;;  %v5728_v36 = vld [vmem:[#allocation10_spill] sm:$0xff] }
 0x3c4   : > { %v2115_v52 = vsel %vm2113_vm11, %v2114_v40, %v2112_v22  ;;  %vm2118_vm14 = vcmp.eq.f32.partialorder %v4987_v48, inf  ;;  %v2121_v28 = vand.u32 2147483648, %v4987_v48  ;;  %v2215_v4 = vsub.f32 %v5723_v41, %v2194_v2  ;;  %v5729_v22 = vld [vmem:[#allocation13_spill] sm:$0xff] }
 0x3c5   : > { %v2153_v9 = vmul.f32 %v4615_v11, %v2115_v52  ;;  %vm2120_vm15 = vcmp.eq.f32.partialorder %v4987_v48, 0.0  ;;  %v2018_v0 = vmul.f32 %v4695_v42, %v4896_v21  ;;  %v2021_v16 = vmul.f32 %v4695_v42, %v4936_v59 }
 0x3c6   : > { %v3617_v29 = vpop.eup %3616  ;;  %v2023_v21 = vmul.f32 %v4695_v42, %v4900_v50  ;;  %v2022_v60 = vmul.f32 %v4695_v42, %v4961_v27  ;;  %v5730_v50 = vld [vmem:[#allocation14_spill] sm:$0xff] }
 0x3c7   : > { %v3619_v5 = vpop.eup %3618  ;;  %v2169_v63 = vadd.f32 1e-08, %v2153_v9  ;;  %v2131_v43 = vmul.f32 %v3617_v29, %v4974_v3  ;;  %v5731_v29 = vmov 0.0  }
 0x3c8   : > { %v2190_v25 = vmul.f32 %v3619_v5, %v2017_v53  ;;  %v3133_v53 = vld [vmem:[#allocation3] ss:$0 sm:$0xff] }
 0x3c9   : > { %v3621_v31 = vpop.eup %3620  ;;  %3626 = vrcp.f32 %v2169_v63  ;;  %v2133_v34 = vsel %vm2132_vm12, %v4974_v3, %v2131_v43 }
 0x3ca   : > { %v3623_v44 = vpop.eup %3622  ;;  %v2196_v18 = vmul.f32 %v3621_v31, %v2020_v13  ;;  %v2136_v35 = vsel %vm2134_vm13, %v2135_v49, %v2133_v34  ;;  %3628 = vrcp.f32 %v2171_v7  ;;  %v2213_v24 = vsub.f32 %v5725_v57, %v2190_v25 }
 0x3cb   : > { %v2156_v26 = vmul.f32 %v4615_v11, %v2136_v35  ;;  %v2117_v33 = vmul.f32 %v3623_v44, %v4987_v48 }
 0x3cc   : > { %v2216_v62 = vsub.f32 %v5724_v32, %v2196_v18  ;;  %v2544_v32 = vld [vmem:[#allocation9] sm:$0x1] }
 0x3cd   : > { %v2172_v30 = vadd.f32 1e-08, %v2156_v26  ;;  %v2119_v47 = vsel %vm2118_vm14, %v4987_v48, %v2117_v33 }
 0x3ce   : > { %v2122_v3 = vsel %vm2120_vm15, %v2121_v28, %v2119_v47  ;;  %v2286_v12 = vpack.c.bf16 %v2216_v62, %v2215_v4 }
 0x3cf   : > { %3630 = vrcp.f32 %v2172_v30  ;;  %v2154_v55 = vmul.f32 %v4615_v11, %v2122_v3  ;;  %v2024_v11 = vmul.f32 %v4695_v42, %v4957_v8 }
 0x3d0   : > { %v3625_v20 = vpop.eup %3624 }
 0x3d1   : > { %v2192_v58 = vmul.f32 %v3625_v20, %v2018_v0  ;;  %v2170_v54 = vadd.f32 1e-08, %v2154_v55 }
 0x3d3   : > { %3632 = vrcp.f32 %v2170_v54  ;;  %v2214_v17 = vsub.f32 %v5726_v10, %v2192_v58  ;;  %v2498_v54 = vld [vmem:[#allocation8 + $0x48] sm:$0xff] }
 0x3d5   : > { %v2285_v48 = vpack.c.bf16 %v2214_v17, %v2213_v24  ;;  %v2496_v24 = vld [vmem:[#allocation8 + $0x8] sm:$0xff] }
 0x3d6   : > { %v3627_v38 = vpop.eup %3626 }
 0x3d7   : > { %v2198_v6 = vmul.f32 %v3627_v38, %v2021_v16  ;;  %v3629_v51 = vpop.eup %3628  ;;  %v2499_v16 = vld [vmem:[#allocation8 + $0x60] sm:$0xff] }
 0x3d8   : > { %v2202_v61 = vmul.f32 %v3629_v51, %v2023_v21 }
 0x3d9   : > { %v2217_v52 = vsub.f32 %v5729_v22, %v2198_v6  ;;  %v2497_v6 = vld [vmem:[#allocation8] sm:$0xff]  ;;  %v2506_v22 = vld [vmem:[#allocation8 + $0x70] sm:$0xff] }
 0x3da   : > { %v2219_v37 = vsub.f32 %v5727_v14, %v2202_v61  ;;  %v2502_v61 = vld [vmem:[#allocation8 + $0x10] sm:$0xff] }
 0x3dc   : > { %v3631_v19 = vpop.eup %3630 }
 0x3dd   : > { %v2204_v23 = vmul.f32 %v3631_v19, %v2024_v11 }
 0x3df   : > { %v2220_v59 = vsub.f32 %v5728_v36, %v2204_v23  ;;  %v2500_v23 = vld [vmem:[#allocation8 + $0x68] sm:$0xff] }
 0x3e0   : > { %v3633_v2 = vpop.eup %3632 }
 0x3e1   : > { %v2200_v40 = vmul.f32 %v3633_v2, %v2022_v60  ;;  %v2288_v39 = vpack.c.bf16 %v2220_v59, %v2219_v37  ;;  %v2503_v37 = vld [vmem:[#allocation8 + $0x38] sm:$0xff] }
 0x3e2   : > { %v2501_v2 = vld [vmem:[#allocation8 + $0x18] sm:$0xff] }
 0x3e3   : > { %3445 = vmatpush3.bf16.msra.mxu0 %v2288_v39  ;;  %v2218_v9 = vsub.f32 %v5730_v50, %v2200_v40 }
 0x3e4   : > { %3446 = vmatprep.subr.bf16.mxu0 %v5731_v29 }
 0x3e5   : > { %v2287_v8 = vpack.c.bf16 %v2218_v9, %v2217_v52  ;;  %v2504_v9 = vld [vmem:[#allocation8 + $0x40] sm:$0xff] }
 0x3e7   : > { %3447 = vmatpush3.bf16.msra.mxu0 %v2287_v8 }
 0x3e8   : > { %3448 = vmatprep.subr.bf16.mxu0 %v5731_v29 }
 0x3eb   : > { %3449 = vmatpush3.bf16.msra.mxu0 %v2286_v12 }
 0x3ec   : > { %3450 = vmatprep.subr.bf16.mxu0 %v5731_v29 }
 0x3ef   : > { %3451 = vmatpush3.bf16.msra.mxu0 %v2285_v48 }
 0x3f0   : > { %3452 = vmatprep.subr.bf16.mxu0 %v5731_v29 }
 0x3f3   : > { %3453 = vmatpush3.bf16.msra.mxu0 %v4979_v46 }
 0x3f4   : > { %3454 = vmatprep.subr.bf16.mxu0 %v5731_v29 }
 0x3f7   : > { %3455 = vmatpush3.bf16.msra.mxu0 %v5020_v15 }
 0x3f8   : > { %3456 = vmatprep.subr.bf16.mxu0 %v5731_v29 }
 0x3fb   : > { %3457 = vmatpush3.bf16.msra.mxu0 %v5014_v45 }
 0x3fc   : > { %3458 = vmatprep.subr.bf16.mxu0 %v5731_v29 }
 0x3ff   : > { %3459 = vmatpush3.bf16.msra.mxu0 %v5016_v56 }
 0x402   : > { %3461 = vmatmul.mubr.bf16.vlgmr.msra.gmra.mxu0 %v5022_v1 }
 0x423   : > { %v2358_v42 = vpop.trf.xlu0 }
 0x424   : > { %3466 = vmatprep.mubr.msk.bf16.mxu1 %vm612_vm1, %v2358_v42  ;;  %v2507_v42 = vld [vmem:[#allocation8 + $0x20] sm:$0xff] }
 0x427   : > { %v2359_v27 = vpop.trf.xlu0 }
 0x42b   : > { %v2360_v7 = vpop.trf.xlu0 }
 0x42f   : > { %v2361_v44 = vpop.trf.xlu0 }
 0x433   : > { %v2362_v4 = vpop.trf.xlu0 }
 0x437   : > { %v2363_v3 = vpop.trf.xlu0 }
 0x43b   : > { %v2364_v12 = vpop.trf.xlu0 }
 0x43f   : > { %v2365_v0 = vpop.trf.xlu0 }
 0x4c2   : > { %v2329_v46 = vpop.f32.mrf.mxu0 }
 0x4c3   : > { %v2330_v5 = vadd.f32 %v3133_v53, %v2329_v46  ;;  %v2505_v46 = vld [vmem:[#allocation8 + $0x28] sm:$0xff] }
 0x4c4   : > { %v3462_v63 = vpop.f32.mrf.mxu0 }
 0x4c5   : > { %v2335_v15 = vmul.f32 %v2330_v5, %v2330_v5  ;;  %v2348_v43 = vmul.f32 0.001953125, %v2330_v5  ;;  %v2510_v63 = vld [vmem:[#allocation8 + $0x50] sm:$0xff] }
 0x4c6   : > { %v2332_v25 = vpop.f32.mrf.mxu0 }
 0x4c7   : > { %v2336_v13 = vrot.slane %v2335_v15, 4  ;;  %v2349_v45 = vpack.c.bf16 %v2348_v43, %v2348_v43  ;;  %v2490_v49 = vrot.slane %v2348_v43, 4  ;;  %v2508_v25 = vld [vmem:[#allocation8 + $0x58] sm:$0xff] }
 0x4c8   : > { %v3463_v31 = vpop.f32.mrf.mxu0 }
 0x4c9   : > { %v2491_v34 = vadd.f32 %v2490_v49, %v2348_v43  ;;  %3485 = vmatprep.subr.msk.bf16.mxu1 %vm637_vm0, %v2349_v45  ;;  %v2391_v56 = vsel %vm637_vm0, %v2349_v45, 0  ;;  %v2337_v1 = vadd.f32 %v2336_v13, %v2335_v15  ;;  %v2511_v49 = vld [vmem:[#allocation8 + $0x78] sm:$0xff] }
 0x4ca   : > { %3465 = vmatpush3.bf16.msra.mxu1 %v2391_v56  ;;  %v2509_v56 = vld [vmem:[#allocation8 + $0x30] sm:$0xff] }
 0x4cb   : > { %v2492_v18 = vrot.slane %v2491_v34, 2  ;;  %v2338_v35 = vrot.slane %v2337_v1, 2 }
 0x4cd   : > { %v2493_v26 = vadd.f32 %v2492_v18, %v2491_v34  ;;  %3467 = vmatmul.mubr.msk.bf16.vlgmr.msra.gmra.mxu1 %vm612_vm1, %v2359_v27  ;;  %v2339_v33 = vadd.f32 %v2338_v35, %v2337_v1 }
 0x4ce   : > { %3470 = vmatprep.mubr.msk.bf16.mxu1 %vm612_vm1, %v2360_v7 }
 0x4cf   : > { %v2494_v28 = vrot.slane %v2493_v26, 1  ;;  %v2340_v41 = vrot.slane %v2339_v33, 1 }
 0x4d1   : > { %v2495_v62 = vadd.f32 %v2494_v28, %v2493_v26  ;;  %v2341_v30 = vadd.f32 %v2340_v41, %v2339_v33 }
 0x4d3   : > { %v2545_v47 = vadd.f32 %v2544_v32, %v2495_v62  ;;  %2342 = vadd.xlane.f32.xlu1 %v2341_v30 }
 0x4d5   : > { %2546 = vst [vmem:[#allocation9] sm:$0x1] %v2545_v47  ;;  %3471 = vmatmul.mubr.msk.bf16.gmra.mxu1 %vm612_vm1, %v2361_v44 }
 0x4d6   : > { %3474 = vmatprep.mubr.msk.bf16.mxu1 %vm612_vm1, %v2362_v4 }
 0x4dd   : > { %3475 = vmatmul.mubr.msk.bf16.gmra.mxu1 %vm612_vm1, %v2363_v3 }
 0x4de   : > { %3478 = vmatprep.mubr.msk.bf16.mxu1 %vm612_vm1, %v2364_v12 }
 0x4e5   : > { %3479 = vmatmul.mubr.msk.bf16.gmra.mxu1 %vm612_vm1, %v2365_v0 }
 0x55c   : > { %v2343_v55 = vpop.xlane.xlu1 %2342 }
 0x55d   : > { %v2344_v20 = vmul.f32 0.0009765625, %v2343_v55 }
 0x55f   : > { %v2345_v58 = vmul.f32 0.006666667, %v2344_v20 }
 0x561   : > { %2347 = vst [vmem:[%s2346_s23] sm:$0x1] %v2345_v58 }
 0x58d   : > { %v3468_v57 = vpop.f32.mrf.mxu1 }
 0x58e   : > { %v2514_v10 = vadd.f32 %v3468_v57, %v2498_v54 }
 0x58f   : > { %v2427_v17 = vpop.f32.mrf.mxu1 }
 0x590   : > { %2530 = vst [vmem:[#allocation8 + $0x48] sm:$0xff] %v2514_v10  ;;  %v2512_v48 = vadd.f32 %v2496_v24, %v2427_v17 }
 0x591   : > { %v3469_v38 = vpop.f32.mrf.mxu1 }
 0x592   : > { %2528 = vst [vmem:[#allocation8 + $0x8] sm:$0xff] %v2512_v48  ;;  %v2515_v51 = vadd.f32 %v3469_v38, %v2499_v16 }
 0x593   : > { %v2430_v21 = vpop.f32.mrf.mxu1 }
 0x594   : > { %2531 = vst [vmem:[#allocation8 + $0x60] sm:$0xff] %v2515_v51  ;;  %v2513_v11 = vadd.f32 %v2497_v6, %v2430_v21 }
 0x595   : > { %v3472_v19 = vpop.f32.mrf.mxu1 }
 0x596   : > { %2529 = vst [vmem:[#allocation8] sm:$0xff] %v2513_v11  ;;  %v2518_v60 = vadd.f32 %v3472_v19, %v2502_v61 }
 0x597   : > { %v2443_v14 = vpop.f32.mrf.mxu1 }
 0x598   : > { %2534 = vst [vmem:[#allocation8 + $0x10] sm:$0xff] %v2518_v60  ;;  %v2516_v36 = vadd.f32 %v2500_v23, %v2443_v14 }
 0x599   : > { %v3473_v59 = vpop.f32.mrf.mxu1 }
 0x59a   : > { %2532 = vst [vmem:[#allocation8 + $0x68] sm:$0xff] %v2516_v36  ;;  %v2519_v40 = vadd.f32 %v3473_v59, %v2503_v37 }
 0x59b   : > { %v2446_v39 = vpop.f32.mrf.mxu1 }
 0x59c   : > { %2535 = vst [vmem:[#allocation8 + $0x38] sm:$0xff] %v2519_v40  ;;  %v2517_v52 = vadd.f32 %v2501_v2, %v2446_v39 }
 0x59d   : > { %v3476_v50 = vpop.f32.mrf.mxu1 }
 0x59e   : > { %2533 = vst [vmem:[#allocation8 + $0x18] sm:$0xff] %v2517_v52  ;;  %v2522_v29 = vadd.f32 %v3476_v50, %v2506_v22 }
 0x59f   : > { %v2459_v8 = vpop.f32.mrf.mxu1 }
 0x5a0   : > { %2538 = vst [vmem:[#allocation8 + $0x70] sm:$0xff] %v2522_v29  ;;  %v2520_v27 = vadd.f32 %v2504_v9, %v2459_v8 }
 0x5a1   : > { %v3477_v53 = vpop.f32.mrf.mxu1 }
 0x5a2   : > { %2536 = vst [vmem:[#allocation8 + $0x40] sm:$0xff] %v2520_v27  ;;  %v2523_v5 = vadd.f32 %v3477_v53, %v2507_v42 }
 0x5a3   : > { %v2462_v7 = vpop.f32.mrf.mxu1 }
 0x5a4   : > { %2539 = vst [vmem:[#allocation8 + $0x20] sm:$0xff] %v2523_v5  ;;  %v2521_v15 = vadd.f32 %v2505_v46, %v2462_v7 }
 0x5a5   : > { %v3480_v43 = vpop.f32.mrf.mxu1 }
 0x5a6   : > { %2537 = vst [vmem:[#allocation8 + $0x28] sm:$0xff] %v2521_v15  ;;  %v2526_v13 = vadd.f32 %v3480_v43, %v2510_v63 }
 0x5a7   : > { %v2475_v45 = vpop.f32.mrf.mxu1 }
 0x5a8   : > { %2542 = vst [vmem:[#allocation8 + $0x50] sm:$0xff] %v2526_v13  ;;  %v2524_v31 = vadd.f32 %v2508_v25, %v2475_v45 }
 0x5a9   : > { %v3481_v34 = vpop.f32.mrf.mxu1 }
 0x5aa   : > { %2540 = vst [vmem:[#allocation8 + $0x58] sm:$0xff] %v2524_v31  ;;  %v2527_v1 = vadd.f32 %v3481_v34, %v2511_v49  ;;  %2550 = sbr.rel (%p3142_p5) target bundleno = 1643 (0x66b), region = 68 }
 0x5ab   : > { %v2478_v44 = vpop.f32.mrf.mxu1 }
 0x5ac   : > { %2543 = vst [vmem:[#allocation8 + $0x78] sm:$0xff] %v2527_v1  ;;  %v2525_v18 = vadd.f32 %v2509_v56, %v2478_v44 }
 0x5ae   : > { %2541 = vst [vmem:[#allocation8 + $0x30] sm:$0xff] %v2525_v18 }
 0x5af   : > { %v2551_v35 = vld [vmem:[#allocation8 + $0x8] sm:$0xff]  ;;  %v2568_v26 = vld [vmem:[%s5677_s6] sm:$0xff]  ;;  %v2557_v15 = vld [vmem:[#allocation8 + $0x10] sm:$0xff] }
 0x5b0   : > { %v2632_v33 = vld [vmem:[%s5678_s7] sm:$0xff]  ;;  %v2584_v28 = vmul.f32 0.9, %v2568_v26  ;;  %v2600_v41 = vmul.f32 0.1, %v2551_v35  ;;  %v2664_v32 = vmul.f32 %v2551_v35, %v2551_v35  ;;  %v2569_v30 = vld [vmem:[%s5677_s6 + $0x8] sm:$0xff] }
 0x5b1   : > { %v2648_v4 = vmul.f32 0.999, %v2632_v33  ;;  %v2552_v62 = vld [vmem:[#allocation8] sm:$0xff]  ;;  %v2585_v12 = vmul.f32 0.9, %v2569_v30  ;;  %v2553_v58 = vld [vmem:[#allocation8 + $0x48] sm:$0xff] }
 0x5b2   : > { %v2616_v47 = vadd.f32 %v2600_v41, %v2584_v28  ;;  %v2680_v3 = vmul.f32 0.001, %v2664_v32  ;;  %v2601_v0 = vmul.f32 0.1, %v2552_v62  ;;  %v2633_v55 = vld [vmem:[%s5678_s7 + $0x8] sm:$0xff]  ;;  %v2665_v20 = vmul.f32 %v2552_v62, %v2552_v62  ;;  %v2634_v17 = vld [vmem:[%s5678_s7 + $0x10] sm:$0xff] }
 0x5b3   : > { %v2649_v24 = vmul.f32 0.999, %v2633_v55  ;;  %v2602_v38 = vmul.f32 0.1, %v2553_v58  ;;  %v2666_v6 = vmul.f32 %v2553_v58, %v2553_v58  ;;  %v2554_v51 = vld [vmem:[#allocation8 + $0x60] sm:$0xff]  ;;  %v2555_v59 = vld [vmem:[#allocation8 + $0x68] sm:$0xff]  ;;  %v2670_v41 = vmul.f32 %v2557_v15, %v2557_v15 }
 0x5b4   : > { %v5107_v54 = vadd.f32 %v2680_v3, %v2648_v4  ;;  %2952 = vst [vmem:[%s5684_s13] sm:$0xff] %v2616_v47  ;;  %v2617_v57 = vadd.f32 %v2601_v0, %v2585_v12  ;;  %v2681_v16 = vmul.f32 0.001, %v2665_v20  ;;  %v2650_v19 = vmul.f32 0.999, %v2634_v17  ;;  %v2556_v50 = vld [vmem:[#allocation8 + $0x18] sm:$0xff] }
 0x5b5   : > { %v2682_v60 = vmul.f32 0.001, %v2666_v6  ;;  %v2603_v37 = vmul.f32 0.1, %v2554_v51  ;;  %v2667_v36 = vmul.f32 %v2554_v51, %v2554_v51  ;;  %v2604_v8 = vmul.f32 0.1, %v2555_v59 }
 0x5b6   : > { %3651 = vrsqrt.f32 %v5107_v54  ;;  %2968 = vst [vmem:[%s5685_s14] sm:$0xff] %v5107_v54  ;;  %v5129_v61 = vadd.f32 %v2681_v16, %v2649_v24  ;;  %v2668_v42 = vmul.f32 %v2555_v59, %v2555_v59  ;;  %v5150_v27 = vmul.f32 0.01, %v2616_v47  ;;  %v2558_v12 = vld [vmem:[#allocation8 + $0x38] sm:$0xff]  ;;  %v2559_v59 = vld [vmem:[#allocation8 + $0x40] sm:$0xff] }
 0x5b7   : > { %v5145_v40 = vadd.f32 %v2682_v60, %v2650_v19  ;;  %v2683_v9 = vmul.f32 0.001, %v2667_v36  ;;  %vm2746_vm0 = vcmp.eq.f32.partialorder %v5107_v54, inf  ;;  %vm2748_vm1 = vcmp.eq.f32.partialorder %v5107_v54, 0.0 }
 0x5b8   : > { %3653 = vrsqrt.f32 %v5129_v61  ;;  %v2684_v25 = vmul.f32 0.001, %v2668_v42  ;;  %v2605_v45 = vmul.f32 0.1, %v2556_v50  ;;  %v2669_v49 = vmul.f32 %v2556_v50, %v2556_v50 }
 0x5b9   : > { %3655 = vrsqrt.f32 %v5145_v40  ;;  %v2749_v31 = vand.u32 2147483648, %v5107_v54  ;;  %v5176_v34 = vmul.f32 0.01, %v2617_v57  ;;  %vm2753_vm3 = vcmp.eq.f32.partialorder %v5129_v61, inf }
 0x5ba   : > { %vm2755_vm4 = vcmp.eq.f32.partialorder %v5129_v61, 0.0  ;;  %v2685_v26 = vmul.f32 0.001, %v2669_v49  ;;  %v2606_v28 = vmul.f32 0.1, %v2557_v15  ;;  %v2756_v4 = vand.u32 2147483648, %v5129_v61 }
 0x5bb   : > { %v2570_v10 = vld [vmem:[%s5677_s6 + $0x10] sm:$0xff]  ;;  %vm2760_vm5 = vcmp.eq.f32.partialorder %v5145_v40, inf  ;;  %vm2762_vm6 = vcmp.eq.f32.partialorder %v5145_v40, 0.0  ;;  %v2686_v20 = vmul.f32 0.001, %v2670_v41  ;;  %v2763_v24 = vand.u32 2147483648, %v5145_v40 }
 0x5bc   : > { %v2586_v48 = vmul.f32 0.9, %v2570_v10  ;;  %2953 = vst [vmem:[%s5684_s13 + $0x8] sm:$0xff] %v2617_v57  ;;  %v2607_v57 = vmul.f32 0.1, %v2558_v12 }
 0x5bd   : > { %v2635_v23 = vld [vmem:[%s5678_s7 + $0x18] sm:$0xff]  ;;  %v2608_v42 = vmul.f32 0.1, %v2559_v59 }
 0x5be   : > { %v2618_v11 = vadd.f32 %v2602_v38, %v2586_v48  ;;  %2969 = vst [vmem:[%s5685_s14 + $0x8] sm:$0xff] %v5129_v61  ;;  %v2651_v22 = vmul.f32 0.999, %v2635_v23 }
 0x5c0   : > { %v5165_v46 = vadd.f32 %v2683_v9, %v2651_v22  ;;  %v5200_v32 = vmul.f32 0.01, %v2618_v11 }
 0x5c2   : > { %3657 = vrsqrt.f32 %v5165_v46  ;;  %vm2767_vm7 = vcmp.eq.f32.partialorder %v5165_v46, inf  ;;  %vm2769_vm8 = vcmp.eq.f32.partialorder %v5165_v46, 0.0  ;;  %v2770_v23 = vand.u32 2147483648, %v5165_v46 }
 0x5c3   : > { %v2571_v21 = vld [vmem:[%s5677_s6 + $0x18] sm:$0xff]  ;;  %v3652_v62 = vpop.eup %3651 }
 0x5c4   : > { %v2587_v14 = vmul.f32 0.9, %v2571_v21  ;;  %2954 = vst [vmem:[%s5684_s13 + $0x10] sm:$0xff] %v2618_v11  ;;  %v2745_v55 = vmul.f32 %v3652_v62, %v5107_v54  ;;  %v2671_v11 = vmul.f32 %v2558_v12, %v2558_v12 }
 0x5c5   : > { %v2636_v52 = vld [vmem:[%s5678_s7 + $0x20] sm:$0xff]  ;;  %v3654_v17 = vpop.eup %3653 }
 0x5c6   : > { %v2619_v39 = vadd.f32 %v2603_v37, %v2587_v14  ;;  %2970 = vst [vmem:[%s5685_s14 + $0x10] sm:$0xff] %v5145_v40  ;;  %v2652_v7 = vmul.f32 0.999, %v2636_v52  ;;  %v2747_v16 = vsel %vm2746_vm0, %v5107_v54, %v2745_v55  ;;  %v2752_v51 = vmul.f32 %v3654_v17, %v5129_v61  ;;  %v3656_v60 = vpop.eup %3655 }
 0x5c7   : > { %v2750_v6 = vsel %vm2748_vm1, %v2749_v31, %v2747_v16  ;;  %v2687_v36 = vmul.f32 0.001, %v2671_v11  ;;  %v2759_v52 = vmul.f32 %v3656_v60, %v5145_v40  ;;  %v2561_v11 = vld [vmem:[#allocation8 + $0x70] sm:$0xff] }
 0x5c8   : > { %v5189_v56 = vadd.f32 %v2684_v25, %v2652_v7  ;;  %v5222_v10 = vmul.f32 0.01, %v2619_v39  ;;  %v2856_v19 = vmul.f32 31.622776, %v2750_v6  ;;  %v2754_v14 = vsel %vm2753_vm3, %v5129_v61, %v2752_v51 }
 0x5c9   : > { %v2757_v22 = vsel %vm2755_vm4, %v2756_v4, %v2754_v14  ;;  %v2761_v61 = vsel %vm2760_vm5, %v5145_v40, %v2759_v52  ;;  %v2712_v52 = vld [vmem:[%s5675_s4] sm:$0xff] }
 0x5ca   : > { %3659 = vrsqrt.f32 %v5189_v56  ;;  %vm2774_vm9 = vcmp.eq.f32.partialorder %v5189_v56, inf  ;;  %vm2776_vm10 = vcmp.eq.f32.partialorder %v5189_v56, 0.0  ;;  %v2777_v37 = vand.u32 2147483648, %v5189_v56 }
 0x5cb   : > { %v2572_v2 = vld [vmem:[%s5677_s6 + $0x20] sm:$0xff]  ;;  %v2857_v9 = vmul.f32 31.622776, %v2757_v22 }
 0x5cc   : > { %v2588_v29 = vmul.f32 0.9, %v2572_v2  ;;  %2955 = vst [vmem:[%s5684_s13 + $0x18] sm:$0xff] %v2619_v39  ;;  %v2872_v39 = vadd.f32 1e-08, %v2856_v19 }
 0x5cd   : > { %v2637_v63 = vld [vmem:[%s5678_s7 + $0x28] sm:$0xff]  ;;  %v2873_v15 = vadd.f32 1e-08, %v2857_v9 }
 0x5ce   : > { %v5167_v5 = vadd.f32 %v2604_v8, %v2588_v29  ;;  %2971 = vst [vmem:[%s5685_s14 + $0x18] sm:$0xff] %v5165_v46  ;;  %v2653_v44 = vmul.f32 0.999, %v2637_v63  ;;  %v2672_v63 = vmul.f32 %v2559_v59, %v2559_v59 }
 0x5d0   : > { %v5213_v30 = vadd.f32 %v2685_v26, %v2653_v44 }
 0x5d2   : > { %3661 = vrsqrt.f32 %v5213_v30  ;;  %vm2781_vm2 = vcmp.eq.f32.partialorder %v5213_v30, inf  ;;  %vm2783_vm11 = vcmp.eq.f32.partialorder %v5213_v30, 0.0  ;;  %v2784_v62 = vand.u32 2147483648, %v5213_v30 }
 0x5d3   : > { %v2573_v53 = vld [vmem:[%s5677_s6 + $0x28] sm:$0xff]  ;;  %v2574_v43 = vld [vmem:[%s5677_s6 + $0x30] sm:$0xff] }
 0x5d4   : > { %v2589_v13 = vmul.f32 0.9, %v2573_v53  ;;  %2956 = vst [vmem:[%s5684_s13 + $0x20] sm:$0xff] %v5167_v5  ;;  %v2590_v33 = vmul.f32 0.9, %v2574_v43  ;;  %v3658_v53 = vpop.eup %3657  ;;  %v2764_v43 = vsel %vm2762_vm6, %v2763_v24, %v2761_v61 }
 0x5d5   : > { %v2638_v18 = vld [vmem:[%s5678_s7 + $0x30] sm:$0xff]  ;;  %v2766_v25 = vmul.f32 %v3658_v53, %v5165_v46 }
 0x5d6   : > { %v5191_v1 = vadd.f32 %v2605_v45, %v2589_v13  ;;  %2972 = vst [vmem:[%s5685_s14 + $0x20] sm:$0xff] %v5189_v56  ;;  %v5215_v47 = vadd.f32 %v2606_v28, %v2590_v33  ;;  %v2654_v3 = vmul.f32 0.999, %v2638_v18  ;;  %v2858_v13 = vmul.f32 31.622776, %v2764_v43 }
 0x5d7   : > { %v3660_v31 = vpop.eup %3659  ;;  %v2768_v40 = vsel %vm2767_vm7, %v5165_v46, %v2766_v25  ;;  %v2688_v18 = vmul.f32 0.001, %v2672_v63 }
 0x5d8   : > { %v5238_v48 = vadd.f32 %v2686_v20, %v2654_v3  ;;  %v2874_v26 = vadd.f32 1e-08, %v2858_v13  ;;  %v2771_v33 = vsel %vm2769_vm8, %v2770_v23, %v2768_v40  ;;  %v2773_v28 = vmul.f32 %v3660_v31, %v5189_v56 }
 0x5d9   : > { %v2859_v4 = vmul.f32 31.622776, %v2771_v33  ;;  %v2732_v31 = vmul.f32 0.01, %v5167_v5 }
 0x5da   : > { %3663 = vrsqrt.f32 %v5238_v48  ;;  %v2775_v46 = vsel %vm2774_vm9, %v5189_v56, %v2773_v28  ;;  %vm2788_vm12 = vcmp.eq.f32.partialorder %v5238_v48, inf  ;;  %vm2790_vm13 = vcmp.eq.f32.partialorder %v5238_v48, 0.0 }
 0x5db   : > { %v2575_v35 = vld [vmem:[%s5677_s6 + $0x38] sm:$0xff]  ;;  %3665 = vrcp.f32 %v2872_v39  ;;  %v2791_v51 = vand.u32 2147483648, %v5238_v48  ;;  %v2674_v39 = vmul.f32 %v2561_v11, %v2561_v11 }
 0x5dc   : > { %2957 = vst [vmem:[%s5684_s13 + $0x28] sm:$0xff] %v5191_v1  ;;  %v2591_v58 = vmul.f32 0.9, %v2575_v35  ;;  %2958 = vst [vmem:[%s5684_s13 + $0x30] sm:$0xff] %v5215_v47  ;;  %v2560_v35 = vld [vmem:[#allocation8 + $0x28] sm:$0xff] }
 0x5dd   : > { %v2639_v0 = vld [vmem:[%s5678_s7 + $0x38] sm:$0xff]  ;;  %v2609_v41 = vmul.f32 0.1, %v2560_v35  ;;  %v2673_v20 = vmul.f32 %v2560_v35, %v2560_v35  ;;  %v2690_v13 = vmul.f32 0.001, %v2674_v39 }
 0x5de   : > { %2973 = vst [vmem:[%s5685_s14 + $0x28] sm:$0xff] %v5213_v30  ;;  %v5240_v38 = vadd.f32 %v2607_v57, %v2591_v58  ;;  %v2655_v21 = vmul.f32 0.999, %v2639_v0  ;;  %2974 = vst [vmem:[%s5685_s14 + $0x30] sm:$0xff] %v5238_v48  ;;  %v2875_v58 = vadd.f32 1e-08, %v2859_v4  ;;  %v2778_v57 = vsel %vm2776_vm10, %v2777_v37, %v2775_v46 }
 0x5df   : > { %v3662_v0 = vpop.eup %3661  ;;  %v2860_v17 = vmul.f32 31.622776, %v2778_v57  ;;  %v2733_v46 = vmul.f32 0.01, %v5191_v1  ;;  %v2563_v1 = vld [vmem:[#allocation8 + $0x58] sm:$0xff] }
 0x5e0   : > { %2959 = vst [vmem:[%s5684_s13 + $0x38] sm:$0xff] %v5240_v38  ;;  %v5274_v29 = vadd.f32 %v2687_v36, %v2655_v21  ;;  %v2780_v24 = vmul.f32 %v3662_v0, %v5213_v30  ;;  %v2689_v21 = vmul.f32 0.001, %v2673_v20 }
 0x5e1   : > { %v2876_v19 = vadd.f32 1e-08, %v2860_v17 }
 0x5e2   : > { %3667 = vrsqrt.f32 %v5274_v29  ;;  %v2782_v6 = vsel %vm2781_vm2, %v5213_v30, %v2780_v24  ;;  %vm2795_vm14 = vcmp.eq.f32.partialorder %v5274_v29, inf  ;;  %vm2797_vm15 = vcmp.eq.f32.partialorder %v5274_v29, 0.0 }
 0x5e3   : > { %3669 = vrcp.f32 %v2873_v15  ;;  %v2785_v23 = vsel %vm2783_vm11, %v2784_v62, %v2782_v6  ;;  %v2713_v15 = vld [vmem:[%s5675_s4 + $0x8] sm:$0xff] }
 0x5e4   : > { %3671 = vrcp.f32 %v2874_v26  ;;  %v2861_v37 = vmul.f32 31.622776, %v2785_v23  ;;  %v2612_v23 = vmul.f32 0.1, %v2563_v1 }
 0x5e5   : > { %v2640_v2 = vld [vmem:[%s5678_s7 + $0x40] sm:$0xff] }
 0x5e6   : > { %v2656_v7 = vmul.f32 0.999, %v2640_v2  ;;  %2975 = vst [vmem:[%s5685_s14 + $0x38] sm:$0xff] %v5274_v29  ;;  %v2610_v2 = vmul.f32 0.1, %v2561_v11 }
 0x5e7   : > { %v2576_v54 = vld [vmem:[%s5677_s6 + $0x40] sm:$0xff]  ;;  %v2577_v50 = vld [vmem:[%s5677_s6 + $0x48] sm:$0xff]  ;;  %v3664_v16 = vpop.eup %3663  ;;  %v2734_v11 = vmul.f32 0.01, %v5215_v47 }
 0x5e8   : > { %v2592_v8 = vmul.f32 0.9, %v2576_v54  ;;  %v2593_v45 = vmul.f32 0.9, %v2577_v50  ;;  %v5300_v3 = vadd.f32 %v2688_v18, %v2656_v7  ;;  %v2787_v54 = vmul.f32 %v3664_v16, %v5238_v48  ;;  %v3666_v22 = vpop.eup %3665 }
 0x5e9   : > { %v2877_v50 = vadd.f32 1e-08, %v2861_v37  ;;  %v2889_v53 = vmul.f32 %v3666_v22, %v5150_v27  ;;  %v2798_v7 = vand.u32 2147483648, %v5274_v29 }
 0x5ea   : > { %v5294_v44 = vadd.f32 %v2608_v42, %v2592_v8  ;;  %v5309_v55 = vadd.f32 %v2609_v41, %v2593_v45  ;;  %3673 = vrsqrt.f32 %v5300_v3  ;;  %v2789_v30 = vsel %vm2788_vm12, %v5238_v48, %v2787_v54  ;;  %v2562_v45 = vld [vmem:[#allocation8 + $0x20] sm:$0xff] }
 0x5eb   : > { %3675 = vrcp.f32 %v2875_v58  ;;  %v2792_v9 = vsel %vm2790_vm13, %v2791_v51, %v2789_v30  ;;  %v2611_v18 = vmul.f32 0.1, %v2562_v45  ;;  %v2675_v41 = vmul.f32 %v2562_v45, %v2562_v45 }
 0x5ec   : > { %2960 = vst [vmem:[%s5684_s13 + $0x40] sm:$0xff] %v5294_v44  ;;  %2961 = vst [vmem:[%s5684_s13 + $0x48] sm:$0xff] %v5309_v55  ;;  %3677 = vrcp.f32 %v2876_v19  ;;  %v2862_v61 = vmul.f32 31.622776, %v2792_v9  ;;  %vm2802_vm0 = vcmp.eq.f32.partialorder %v5300_v3, inf  ;;  %v2805_v57 = vand.u32 2147483648, %v5300_v3 }
 0x5ed   : > { %v2641_v49 = vld [vmem:[%s5678_s7 + $0x48] sm:$0xff]  ;;  %v2691_v24 = vmul.f32 0.001, %v2675_v41  ;;  %vm2804_vm1 = vcmp.eq.f32.partialorder %v5300_v3, 0.0 }
 0x5ee   : > { %v2657_v12 = vmul.f32 0.999, %v2641_v49  ;;  %2976 = vst [vmem:[%s5685_s14 + $0x40] sm:$0xff] %v5300_v3  ;;  %v2920_v49 = vsub.f32 %v2712_v52, %v2889_v53  ;;  %v2878_v40 = vadd.f32 1e-08, %v2862_v61  ;;  %v2564_v52 = vld [vmem:[#allocation8 + $0x30] sm:$0xff] }
 0x5ef   : > { %v3668_v42 = vpop.eup %3667  ;;  %v2613_v61 = vmul.f32 0.1, %v2564_v52 }
 0x5f0   : > { %v5342_v36 = vadd.f32 %v2689_v21, %v2657_v12  ;;  %v2794_v43 = vmul.f32 %v3668_v42, %v5274_v29  ;;  %v3670_v27 = vpop.eup %3669  ;;  %2936 = vst [vmem:[%s5682_s11] sm:$0xff] %v2920_v49  ;;  %v2677_v49 = vmul.f32 %v2564_v52, %v2564_v52 }
 0x5f1   : > { %v2891_v35 = vmul.f32 %v3670_v27, %v5176_v34  ;;  %v3672_v62 = vpop.eup %3671 }
 0x5f2   : > { %3679 = vrsqrt.f32 %v5342_v36  ;;  %v2796_v26 = vsel %vm2795_vm14, %v5274_v29, %v2794_v43  ;;  %v2893_v58 = vmul.f32 %v3672_v62, %v5200_v32  ;;  %vm2809_vm3 = vcmp.eq.f32.partialorder %v5342_v36, inf }
 0x5f3   : > { %v2578_v56 = vld [vmem:[%s5677_s6 + $0x50] sm:$0xff]  ;;  %v2579_v14 = vld [vmem:[%s5677_s6 + $0x58] sm:$0xff]  ;;  %3681 = vrcp.f32 %v2877_v50  ;;  %v2799_v5 = vsel %vm2797_vm15, %v2798_v7, %v2796_v26  ;;  %v2921_v12 = vsub.f32 %v2713_v15, %v2891_v35  ;;  %v2812_v39 = vand.u32 2147483648, %v5342_v36 }
 0x5f4   : > { %v2594_v59 = vmul.f32 0.9, %v2578_v56  ;;  %v2595_v63 = vmul.f32 0.9, %v2579_v14  ;;  %3683 = vrcp.f32 %v2878_v40  ;;  %v2863_v20 = vmul.f32 31.622776, %v2799_v5 }
 0x5f5   : > { %v2642_v60 = vld [vmem:[%s5678_s7 + $0x50] sm:$0xff]  ;;  %v2676_v14 = vmul.f32 %v2563_v1, %v2563_v1  ;;  %v2735_v7 = vmul.f32 0.01, %v5240_v38  ;;  %vm2811_vm4 = vcmp.eq.f32.partialorder %v5342_v36, 0.0 }
 0x5f6   : > { %2977 = vst [vmem:[%s5685_s14 + $0x48] sm:$0xff] %v5342_v36  ;;  %v2658_v8 = vmul.f32 0.999, %v2642_v60  ;;  %v5367_v25 = vadd.f32 %v2610_v2, %v2594_v59  ;;  %v5385_v34 = vadd.f32 %v2611_v18, %v2595_v63  ;;  %v2879_v17 = vadd.f32 1e-08, %v2863_v20  ;;  %v2565_v5 = vld [vmem:[#allocation8 + $0x50] sm:$0xff] }
 0x5f7   : > { %v2714_v0 = vld [vmem:[%s5675_s4 + $0x10] sm:$0xff]  ;;  %v3674_v29 = vpop.eup %3673  ;;  %v2692_v42 = vmul.f32 0.001, %v2676_v14 }
 0x5f8   : > { %v5374_v33 = vadd.f32 %v2690_v13, %v2658_v8  ;;  %2962 = vst [vmem:[%s5684_s13 + $0x50] sm:$0xff] %v5367_v25  ;;  %2937 = vst [vmem:[%s5682_s11 + $0x8] sm:$0xff] %v2921_v12  ;;  %v2801_v56 = vmul.f32 %v3674_v29, %v5300_v3  ;;  %v3676_v6 = vpop.eup %3675  ;;  %v2922_v51 = vsub.f32 %v2714_v0, %v2893_v58  ;;  %v2693_v12 = vmul.f32 0.001, %v2677_v49 }
 0x5f9   : > { %v2895_v54 = vmul.f32 %v3676_v6, %v5222_v10  ;;  %v2614_v58 = vmul.f32 0.1, %v2565_v5 }
 0x5fa   : > { %3685 = vrsqrt.f32 %v5374_v33  ;;  %v2803_v60 = vsel %vm2802_vm0, %v5300_v3, %v2801_v56  ;;  %v3678_v3 = vpop.eup %3677  ;;  %vm2816_vm5 = vcmp.eq.f32.partialorder %v5374_v33, inf  ;;  %vm2818_vm6 = vcmp.eq.f32.partialorder %v5374_v33, 0.0 }
 0x5fb   : > { %3687 = vrcp.f32 %v2879_v17  ;;  %v2806_v47 = vsel %vm2804_vm1, %v2805_v57, %v2803_v60  ;;  %v2897_v8 = vmul.f32 %v3678_v3, %v2732_v31  ;;  %v2819_v29 = vand.u32 2147483648, %v5374_v33 }
 0x5fc   : > { %v2864_v30 = vmul.f32 31.622776, %v2806_v47  ;;  %v2678_v56 = vmul.f32 %v2565_v5, %v2565_v5 }
 0x5fd   : > { %v2643_v48 = vld [vmem:[%s5678_s7 + $0x58] sm:$0xff] }
 0x5fe   : > { %v2659_v28 = vmul.f32 0.999, %v2643_v48  ;;  %2978 = vst [vmem:[%s5685_s14 + $0x50] sm:$0xff] %v5374_v33  ;;  %v2880_v63 = vadd.f32 1e-08, %v2864_v30 }
 0x5ff   : > { %v2580_v4 = vld [vmem:[%s5677_s6 + $0x60] sm:$0xff]  ;;  %v2715_v21 = vld [vmem:[%s5675_s4 + $0x18] sm:$0xff]  ;;  %v3680_v9 = vpop.eup %3679  ;;  %v2694_v14 = vmul.f32 0.001, %v2678_v56  ;;  %v2738_v56 = vmul.f32 0.01, %v5367_v25 }
 0x600   : > { %2963 = vst [vmem:[%s5684_s13 + $0x58] sm:$0xff] %v5385_v34  ;;  %v2596_v32 = vmul.f32 0.9, %v2580_v4  ;;  %v5418_v19 = vadd.f32 %v2691_v24, %v2659_v28  ;;  %2938 = vst [vmem:[%s5682_s11 + $0x10] sm:$0xff] %v2922_v51  ;;  %v2923_v59 = vsub.f32 %v2715_v21, %v2895_v54  ;;  %v2808_v48 = vmul.f32 %v3680_v9, %v5342_v36  ;;  %v3682_v43 = vpop.eup %3681 }
 0x601   : > { %v2899_v31 = vmul.f32 %v3682_v43, %v2733_v46  ;;  %v3684_v4 = vpop.eup %3683 }
 0x602   : > { %3689 = vrsqrt.f32 %v5418_v19  ;;  %v5440_v22 = vadd.f32 %v2612_v23, %v2596_v32  ;;  %v2810_v40 = vsel %vm2809_vm3, %v5342_v36, %v2808_v48  ;;  %v2901_v20 = vmul.f32 %v3684_v4, %v2734_v11  ;;  %v2566_v32 = vld [vmem:[#allocation8 + $0x78] sm:$0xff] }
 0x603   : > { %3691 = vrcp.f32 %v2880_v63  ;;  %v2813_v28 = vsel %vm2811_vm4, %v2812_v39, %v2810_v40  ;;  %v2615_v21 = vmul.f32 0.1, %v2566_v32  ;;  %v2736_v11 = vmul.f32 0.01, %v5294_v44 }
 0x604   : > { %v2865_v36 = vmul.f32 31.622776, %v2813_v28  ;;  %vm2823_vm7 = vcmp.eq.f32.partialorder %v5418_v19, inf  ;;  %vm2825_vm8 = vcmp.eq.f32.partialorder %v5418_v19, 0.0  ;;  %v2679_v52 = vmul.f32 %v2566_v32, %v2566_v32 }
 0x605   : > { %v2644_v16 = vld [vmem:[%s5678_s7 + $0x60] sm:$0xff] }
 0x606   : > { %2979 = vst [vmem:[%s5685_s14 + $0x58] sm:$0xff] %v5418_v19  ;;  %v2660_v10 = vmul.f32 0.999, %v2644_v16  ;;  %v2881_v24 = vadd.f32 1e-08, %v2865_v36 }
 0x607   : > { %v2581_v37 = vld [vmem:[%s5677_s6 + $0x68] sm:$0xff]  ;;  %v2716_v2 = vld [vmem:[%s5675_s4 + $0x20] sm:$0xff]  ;;  %v3686_v46 = vpop.eup %3685 }
 0x608   : > { %v2597_v53 = vmul.f32 0.9, %v2581_v37  ;;  %2939 = vst [vmem:[%s5682_s11 + $0x18] sm:$0xff] %v2923_v59  ;;  %2964 = vst [vmem:[%s5684_s13 + $0x60] sm:$0xff] %v5440_v22  ;;  %v2924_v13 = vsub.f32 %v2716_v2, %v2897_v8  ;;  %v5461_v45 = vadd.f32 %v2692_v42, %v2660_v10  ;;  %v2815_v1 = vmul.f32 %v3686_v46, %v5374_v33  ;;  %v3688_v54 = vpop.eup %3687  ;;  %v2984_v2 = vld [vmem:[%s5679_s8] sm:$0x1] }
 0x609   : > { %v2903_v10 = vmul.f32 %v3688_v54, %v2735_v7  ;;  %v2985_v7 = vmul.f32 0.9, %v2984_v2 }
 0x60a   : > { %v5463_v27 = vadd.f32 %v2613_v61, %v2597_v53  ;;  %3693 = vrsqrt.f32 %v5461_v45  ;;  %v2817_v23 = vsel %vm2816_vm5, %v5374_v33, %v2815_v1  ;;  %v2826_v33 = vand.u32 2147483648, %v5418_v19  ;;  %v2988_v53 = vld [vmem:[%s5680_s9] sm:$0x1] }
 0x60b   : > { %3695 = vrcp.f32 %v2881_v24  ;;  %v2820_v44 = vsel %vm2818_vm6, %v2819_v29, %v2817_v23  ;;  %vm2830_vm9 = vcmp.eq.f32.partialorder %v5461_v45, inf  ;;  %v2989_v49 = vmul.f32 0.999, %v2988_v53 }
 0x60c   : > { %v2866_v3 = vmul.f32 31.622776, %v2820_v44  ;;  %vm2832_vm10 = vcmp.eq.f32.partialorder %v5461_v45, 0.0 }
 0x60d   : > { %v2645_v50 = vld [vmem:[%s5678_s7 + $0x68] sm:$0xff]  ;;  %v2646_v35 = vld [vmem:[%s5678_s7 + $0x70] sm:$0xff] }
 0x60e   : > { %v2661_v18 = vmul.f32 0.999, %v2645_v50  ;;  %2980 = vst [vmem:[%s5685_s14 + $0x60] sm:$0xff] %v5461_v45  ;;  %v2662_v57 = vmul.f32 0.999, %v2646_v35  ;;  %v2833_v35 = vand.u32 2147483648, %v5461_v45 }
 0x60f   : > { %v2582_v15 = vld [vmem:[%s5677_s6 + $0x70] sm:$0xff]  ;;  %v2717_v38 = vld [vmem:[%s5675_s4 + $0x28] sm:$0xff]  ;;  %v3690_v47 = vpop.eup %3689  ;;  %v2567_v50 = vld [vmem:[#allocation9] sm:$0x1]  ;;  %v2882_v8 = vadd.f32 1e-08, %v2866_v3 }
 0x610   : > { %2940 = vst [vmem:[%s5682_s11 + $0x20] sm:$0xff] %v2924_v13  ;;  %2965 = vst [vmem:[%s5684_s13 + $0x68] sm:$0xff] %v5463_v27  ;;  %v2598_v41 = vmul.f32 0.9, %v2582_v15  ;;  %v2925_v62 = vsub.f32 %v2717_v38, %v2899_v31  ;;  %v5498_v17 = vadd.f32 %v2693_v12, %v2661_v18  ;;  %v2822_v30 = vmul.f32 %v3690_v47, %v5418_v19  ;;  %v3692_v43 = vpop.eup %3691 }
 0x611   : > { %v5535_v39 = vadd.f32 %v2694_v14, %v2662_v57  ;;  %v2695_v15 = vmul.f32 0.001, %v2679_v52  ;;  %v2986_v38 = vmul.f32 0.1, %v2567_v50  ;;  %v2990_v31 = vmul.f32 %v2567_v50, %v2567_v50 }
 0x612   : > { %v5500_v6 = vadd.f32 %v2614_v58, %v2598_v41  ;;  %2981 = vst [vmem:[%s5685_s14 + $0x68] sm:$0xff] %v5498_v17  ;;  %3697 = vrsqrt.f32 %v5498_v17  ;;  %v2824_v61 = vsel %vm2823_vm7, %v5418_v19, %v2822_v30  ;;  %v2905_v18 = vmul.f32 %v3692_v43, %v2736_v11 }
 0x613   : > { %3699 = vrsqrt.f32 %v5535_v39  ;;  %v2827_v48 = vsel %vm2825_vm8, %v2826_v33, %v2824_v61  ;;  %v5566_v5 = vadd.f32 %v2986_v38, %v2985_v7  ;;  %v2991_v41 = vmul.f32 0.001, %v2990_v31 }
 0x614   : > { %3701 = vrcp.f32 %v2882_v8  ;;  %v2867_v13 = vmul.f32 31.622776, %v2827_v48  ;;  %vm2837_vm2 = vcmp.eq.f32.partialorder %v5498_v17, inf  ;;  %vm2839_vm11 = vcmp.eq.f32.partialorder %v5498_v17, 0.0 }
 0x615   : > { %v5577_v12 = vadd.f32 %v2991_v41, %v2989_v49  ;;  %3008 = vst [vmem:[%s5686_s15] sm:$0x1] %v5566_v5  ;;  %vm2844_vm12 = vcmp.eq.f32.partialorder %v5535_v39, inf  ;;  %vm2846_vm13 = vcmp.eq.f32.partialorder %v5535_v39, 0.0  ;;  %v2740_v52 = vmul.f32 0.01, %v5440_v22 }
 0x616   : > { %v2883_v28 = vadd.f32 1e-08, %v2867_v13 }
 0x617   : > { %v2718_v26 = vld [vmem:[%s5675_s4 + $0x30] sm:$0xff]  ;;  %v2583_v0 = vld [vmem:[%s5677_s6 + $0x78] sm:$0xff]  ;;  %v3694_v40 = vpop.eup %3693  ;;  %3009 = vst [vmem:[%s5687_s16] sm:$0x1] %v5577_v12  ;;  %vm2997_vm0 = vcmp.eq.f32.partialorder %v5577_v12, inf  ;;  %vm2999_vm1 = vcmp.eq.f32.partialorder %v5577_v12, 0.0 }
 0x618   : > { %2941 = vst [vmem:[%s5682_s11 + $0x28] sm:$0xff] %v2925_v62  ;;  %v2926_v16 = vsub.f32 %v2718_v26, %v2901_v20  ;;  %v2599_v51 = vmul.f32 0.9, %v2583_v0  ;;  %2966 = vst [vmem:[%s5684_s13 + $0x70] sm:$0xff] %v5500_v6  ;;  %v2829_v19 = vmul.f32 %v3694_v40, %v5461_v45  ;;  %v2737_v62 = vmul.f32 0.01, %v5309_v55  ;;  %v3696_v0 = vpop.eup %3695 }
 0x619   : > { %v2647_v37 = vld [vmem:[%s5678_s7 + $0x78] sm:$0xff]  ;;  %v2741_v40 = vmul.f32 0.01, %v5463_v27 }
 0x61a   : > { %2942 = vst [vmem:[%s5682_s11 + $0x30] sm:$0xff] %v2926_v16  ;;  %v5528_v59 = vadd.f32 %v2615_v21, %v2599_v51  ;;  %v2663_v42 = vmul.f32 0.999, %v2647_v37  ;;  %2982 = vst [vmem:[%s5685_s14 + $0x70] sm:$0xff] %v5535_v39  ;;  %v2831_v36 = vsel %vm2830_vm9, %v5461_v45, %v2829_v19  ;;  %v2907_v58 = vmul.f32 %v3696_v0, %v2737_v62 }
 0x61b   : > { %v2834_v55 = vsel %vm2832_vm10, %v2833_v35, %v2831_v36  ;;  %v2840_v45 = vand.u32 2147483648, %v5498_v17  ;;  %v2847_v21 = vand.u32 2147483648, %v5535_v39  ;;  %v2742_v19 = vmul.f32 0.01, %v5500_v6 }
 0x61c   : > { %2967 = vst [vmem:[%s5684_s13 + $0x78] sm:$0xff] %v5528_v59  ;;  %v5563_v26 = vadd.f32 %v2695_v15, %v2663_v42  ;;  %v2868_v20 = vmul.f32 31.622776, %v2834_v55  ;;  %v3000_v42 = vand.u32 2147483648, %v5577_v12  ;;  %v2743_v36 = vmul.f32 0.01, %v5528_v59 }
 0x61d   : > { %v2994_v0 = vmul.f32 0.01, %v5566_v5 }
 0x61e   : > { %3703 = vrsqrt.f32 %v5563_v26  ;;  %2983 = vst [vmem:[%s5685_s14 + $0x78] sm:$0xff] %v5563_v26  ;;  %v2884_v57 = vadd.f32 1e-08, %v2868_v20  ;;  %vm2851_vm14 = vcmp.eq.f32.partialorder %v5563_v26, inf  ;;  %v2854_v33 = vand.u32 2147483648, %v5563_v26 }
 0x61f   : > { %3705 = vrcp.f32 %v2883_v28  ;;  %v3698_v29 = vpop.eup %3697  ;;  %vm2853_vm15 = vcmp.eq.f32.partialorder %v5563_v26, 0.0 }
 0x620   : > { %3707 = vrsqrt.f32 %v5577_v12  ;;  %v2836_v24 = vmul.f32 %v3698_v29, %v5498_v17  ;;  %v3700_v16 = vpop.eup %3699 }
 0x621   : > { %v2719_v60 = vld [vmem:[%s5675_s4 + $0x38] sm:$0xff]  ;;  %3709 = vrcp.f32 %v2884_v57  ;;  %v3702_v11 = vpop.eup %3701  ;;  %v2843_v25 = vmul.f32 %v3700_v16, %v5535_v39 }
 0x622   : > { %v2927_v9 = vsub.f32 %v2719_v60, %v2903_v10  ;;  %v2838_v32 = vsel %vm2837_vm2, %v5498_v17, %v2836_v24  ;;  %v2909_v17 = vmul.f32 %v3702_v11, %v2738_v56  ;;  %v2739_v60 = vmul.f32 0.01, %v5385_v34 }
 0x623   : > { %v2841_v51 = vsel %vm2839_vm11, %v2840_v45, %v2838_v32  ;;  %v2845_v14 = vsel %vm2844_vm12, %v5535_v39, %v2843_v25 }
 0x624   : > { %2943 = vst [vmem:[%s5682_s11 + $0x38] sm:$0xff] %v2927_v9  ;;  %v2869_v54 = vmul.f32 31.622776, %v2841_v51  ;;  %v2848_v47 = vsel %vm2846_vm13, %v2847_v21, %v2845_v14 }
 0x625   : > { %v2870_v3 = vmul.f32 31.622776, %v2848_v47 }
 0x626   : > { %v2885_v44 = vadd.f32 1e-08, %v2869_v54 }
 0x627   : > { %v2886_v50 = vadd.f32 1e-08, %v2870_v3 }
 0x628   : > { %3711 = vrcp.f32 %v2885_v44 }
 0x629   : > { %3713 = vrcp.f32 %v2886_v50 }
 0x62b   : > { %v2720_v63 = vld [vmem:[%s5675_s4 + $0x40] sm:$0xff]  ;;  %v3704_v10 = vpop.eup %3703 }
 0x62c   : > { %v2928_v4 = vsub.f32 %v2720_v63, %v2905_v18  ;;  %v3706_v2 = vpop.eup %3705  ;;  %v2850_v30 = vmul.f32 %v3704_v10, %v5563_v26 }
 0x62d   : > { %v2911_v39 = vmul.f32 %v3706_v2, %v2739_v60  ;;  %v3708_v9 = vpop.eup %3707 }
 0x62e   : > { %2944 = vst [vmem:[%s5682_s11 + $0x40] sm:$0xff] %v2928_v4  ;;  %v2852_v8 = vsel %vm2851_vm14, %v5563_v26, %v2850_v30  ;;  %v2996_v7 = vmul.f32 %v3708_v9, %v5577_v12  ;;  %v3710_v48 = vpop.eup %3709 }
 0x62f   : > { %v2855_v61 = vsel %vm2853_vm15, %v2854_v33, %v2852_v8  ;;  %v2913_v38 = vmul.f32 %v3710_v48, %v2740_v52 }
 0x630   : > { %v2871_v63 = vmul.f32 31.622776, %v2855_v61  ;;  %v2998_v22 = vsel %vm2997_vm0, %v5577_v12, %v2996_v7 }
 0x631   : > { %v3001_v13 = vsel %vm2999_vm1, %v3000_v42, %v2998_v22 }
 0x632   : > { %v2887_v43 = vadd.f32 1e-08, %v2871_v63  ;;  %v3002_v49 = vmul.f32 31.622776, %v3001_v13 }
 0x634   : > { %3715 = vrcp.f32 %v2887_v43  ;;  %v3003_v18 = vadd.f32 1e-08, %v3002_v49 }
 0x635   : > { %v2721_v46 = vld [vmem:[%s5675_s4 + $0x48] sm:$0xff]  ;;  %v3712_v35 = vpop.eup %3711 }
 0x636   : > { %v2929_v1 = vsub.f32 %v2721_v46, %v2907_v58  ;;  %3717 = vrcp.f32 %v3003_v18  ;;  %v2915_v28 = vmul.f32 %v3712_v35, %v2741_v40  ;;  %v3714_v4 = vpop.eup %3713  ;;  %v2993_v58 = vld [vmem:[%s5676_s5] sm:$0x1] }
 0x637   : > { %v2917_v62 = vmul.f32 %v3714_v4, %v2742_v19 }
 0x638   : > { %2945 = vst [vmem:[%s5682_s11 + $0x48] sm:$0xff] %v2929_v1 }
 0x63f   : > { %v2722_v23 = vld [vmem:[%s5675_s4 + $0x50] sm:$0xff] }
 0x640   : > { %v2930_v37 = vsub.f32 %v2722_v23, %v2909_v17 }
 0x641   : > { %v3716_v55 = vpop.eup %3715 }
 0x642   : > { %2946 = vst [vmem:[%s5682_s11 + $0x50] sm:$0xff] %v2930_v37  ;;  %v2919_v46 = vmul.f32 %v3716_v55, %v2743_v36 }
 0x643   : > { %v3718_v20 = vpop.eup %3717 }
 0x644   : > { %v3005_v59 = vmul.f32 %v3718_v20, %v2994_v0 }
 0x646   : > { %v3006_v45 = vsub.f32 %v2993_v58, %v3005_v59 }
 0x648   : > { %3007 = vst [vmem:[%s5683_s12] sm:$0x1] %v3006_v45 }
 0x649   : > { %v2723_v34 = vld [vmem:[%s5675_s4 + $0x58] sm:$0xff] }
 0x64a   : > { %v2931_v53 = vsub.f32 %v2723_v34, %v2911_v39 }
 0x64c   : > { %2947 = vst [vmem:[%s5682_s11 + $0x58] sm:$0xff] %v2931_v53 }
 0x653   : > { %v2724_v15 = vld [vmem:[%s5675_s4 + $0x60] sm:$0xff] }
 0x654   : > { %v2932_v31 = vsub.f32 %v2724_v15, %v2913_v38 }
 0x656   : > { %2948 = vst [vmem:[%s5682_s11 + $0x60] sm:$0xff] %v2932_v31 }
 0x65d   : > { %v2725_v26 = vld [vmem:[%s5675_s4 + $0x68] sm:$0xff]  ;;  %v2726_v27 = vld [vmem:[%s5675_s4 + $0x70] sm:$0xff] }
 0x65e   : > { %v2933_v41 = vsub.f32 %v2725_v26, %v2915_v28  ;;  %v2934_v12 = vsub.f32 %v2726_v27, %v2917_v62 }
 0x660   : > { %2949 = vst [vmem:[%s5682_s11 + $0x68] sm:$0xff] %v2933_v41  ;;  %2950 = vst [vmem:[%s5682_s11 + $0x70] sm:$0xff] %v2934_v12 }
 0x667   : > { %v2727_v6 = vld [vmem:[%s5675_s4 + $0x78] sm:$0xff] }
 0x668   : > { %v2935_v29 = vsub.f32 %v2727_v6, %v2919_v46 }
 0x66a   : > { %2951 = vst [vmem:[%s5682_s11 + $0x78] sm:$0xff] %v2935_v29 }
 0x66b PF: > { %s27_s21 = sadd.s32 1, %s3726_s21  }
 0x66c   : > { %p24_p6 = scmp.ge.s32.totalorder %s27_s21, 4  }
 0x66e   :  { %26 = sbr.rel (!%p24_p6) target bundleno = 2 (0x2), region = 150 }

</bundles_post_ra>
